<compile_context>
chip_gen: v7x
topology: tpu7x:2x2x1
jax: 0.10.0
libtpu: 0.0.40
codegen_flags: <defaults>
</compile_context>

<pallas_src>
import math

import jax
import jax.numpy as jnp
from jax.experimental import pallas as pl
from jax.experimental.pallas import tpu as pltpu

_TWO_PI = 2.0 * math.pi
_MIN_GRID_STEPS = 4  # keep >= this many grid steps so multi-TC chips (v7x) shard work


def _round_up(x: int, m: int) -> int:
    return (x + m - 1) // m * m


def _gfft_concat_kernel(x_ref, b2_ref, bias_ref, o_ref):
    # x_ref: (TN, C) f32, b2_ref: (C, 2M) f32 = 2*pi*[B | B],
    # bias_ref: (1, 2M) f32 = [0,...,0 | pi/2,...,pi/2], o_ref: (TN, 2M)
    proj = jnp.dot(
        x_ref[...], b2_ref[...],
        precision=jax.lax.Precision.HIGHEST,
        preferred_element_type=jnp.float32,
    )
    # cos(t) == sin(t + pi/2): one fused sin over the full width, one aligned store.
    o_ref[...] = jnp.sin(proj + bias_ref[...]).astype(o_ref.dtype)


def _gfft_sin_kernel(x_ref, b_ref, o_ref):
    # concat=False path: out = sin(2*pi * x @ B)  (2*pi already folded into b_ref)
    proj = jnp.dot(
        x_ref[...], b_ref[...],
        precision=jax.lax.Precision.HIGHEST,
        preferred_element_type=jnp.float32,
    )
    o_ref[...] = jnp.sin(proj).astype(o_ref.dtype)


def gaussian_fourier_feature_transform(x, B, *, concat=True, tile_n=2048,
                                        out_dtype=None):
    """Pallas equivalent of GaussianFourierFeatureTransform.forward."""
    if x.ndim == 3:            # mirrors x.squeeze(0) in the PyTorch module
        x = jnp.squeeze(x, axis=0)
    assert x.ndim == 2, f"Expected 2D input (got {x.ndim}D input)"

    N, C = x.shape
    Cb, M = B.shape
    assert C == Cb
    out_dtype = x.dtype if out_dtype is None else jnp.dtype(out_dtype)

    # Keep the projection in f32 regardless of the input dtype (trig arguments with
    # scale=25 lose O(0.1-1 rad) in bf16). Input is tiny (C floats/row), so the cast
    # is free relative to the output writeback.
    x32 = x.astype(jnp.float32)
    two_pi_B = (_TWO_PI * B.astype(jnp.float32))        # fold 2*pi into the constant

    if concat:
        out_w = 2 * M
        b_k = jnp.concatenate([two_pi_B, two_pi_B], axis=1)            # (C, 2M)
        bias = jnp.concatenate(
            [jnp.zeros((1, M), jnp.float32),
             jnp.full((1, M), 0.5 * math.pi, jnp.float32)], axis=1)    # (1, 2M)
    else:
        out_w = M
        b_k = two_pi_B

    # --- tile selection: big tiles to amortize grid-step overhead, but keep >= 4
    # grid steps where possible so v7x's two TensorCores both get work. ---
    tile_n = max(8, _round_up(int(tile_n), 8))
    tile = min(tile_n, max(8, _round_up(pl.cdiv(N, _MIN_GRID_STEPS), 8)))
    grid = (pl.cdiv(N, tile),)   # uneven last block: OOB output rows are dropped

    in_specs = [
        pl.BlockSpec((tile, C), lambda i: (i, 0)),       # tile of points
        pl.BlockSpec((C, out_w), lambda i: (0, 0)),      # full (tiny) projection matrix
    ]
    args = [x32, b_k]
    if concat:
        in_specs.append(pl.BlockSpec((1, out_w), lambda i: (0, 0)))   # phase bias row
        args.append(bias)
        kernel = _gfft_concat_kernel
    else:
        kernel = _gfft_sin_kernel

    cost = pl.CostEstimate(
        flops=2 * N * C * out_w,
        transcendentals=N * out_w,
        bytes_accessed=N * C * 4 + C * out_w * 4 + N * out_w * out_dtype.itemsize,
    )

    return pl.pallas_call(
        kernel,
        out_shape=jax.ShapeDtypeStruct((N, out_w), out_dtype),
        grid_spec=pltpu.PrefetchScalarGridSpec(
            num_scalar_prefetch=0,
            grid=grid,
            in_specs=in_specs,
            out_specs=pl.BlockSpec((tile, out_w), lambda i: (i, 0)),
        ),
        compiler_params=pltpu.CompilerParams(
            dimension_semantics=("parallel",),
            vmem_limit_bytes=32 * 1024 * 1024,   # headroom for big tiles on v5e
        ),
        cost_estimate=cost,
    )(*args)


if __name__ == "__main__":
    # Module config (matches __init__ defaults: mapping_size=93, scale=25)
    num_input_channels = 3
    mapping_size = 93
    scale = 25.0

    key = jax.random.PRNGKey(0)
    k_b, k_x = jax.random.split(key)

    # Deterministic synthetic parameter B ~ N(0,1) * scale, shape (C, M)
    B = (jax.random.normal(k_b, (num_input_channels, mapping_size),
                           dtype=jnp.float32) * scale)

    # Small input consistent with the forward: (1, N, C) -> squeeze(0) -> (N, C)
    # N deliberately not a multiple of the tile to exercise the uneven last block.
    N = 300
    x = jax.random.normal(k_x, (1, N, num_input_channels), dtype=jnp.float32)

    out = gaussian_fourier_feature_transform(x, B, concat=True)
    out = jax.block_until_ready(out)

    # Pure-JAX reference (PyTorch forward semantics). HIGHEST precision so the
    # reference matmul is not silently bf16-truncated on TPU.
    x2 = jnp.squeeze(x, 0)
    proj = _TWO_PI * jnp.dot(x2, B, precision=jax.lax.Precision.HIGHEST)
    ref = jnp.concatenate([jnp.sin(proj), jnp.cos(proj)], axis=-1)
    assert out.shape == (N, 2 * mapping_size)
    err = float(jnp.max(jnp.abs(out - ref)))
    assert jnp.allclose(out, ref, atol=2e-3, rtol=2e-3), err

    # sin-only path (concat=False)
    out_sin = jax.block_until_ready(
        gaussian_fourier_feature_transform(x, B, concat=False))
    assert out_sin.shape == (N, mapping_size)
    err_sin = float(jnp.max(jnp.abs(out_sin - jnp.sin(proj))))
    assert jnp.allclose(out_sin, jnp.sin(proj), atol=2e-3, rtol=2e-3), err_sin

    print("KERNEL_OK")
</pallas_src>

<mosaic_0001>
module attributes {stable_mosaic.version = 11 : i64} {
  func.func @_gfft_concat_kernel(%arg0: i32, %arg1: memref<80x3xf32, #tpu.memory_space<vmem>>, %arg2: memref<3x186xf32, #tpu.memory_space<vmem>>, %arg3: memref<1x186xf32, #tpu.memory_space<vmem>>, %arg4: memref<80x186xf32, #tpu.memory_space<vmem>>) attributes {dimension_semantics = [#tpu.dimension_semantics<parallel>], iteration_bounds = array<i64: 4>, scalar_prefetch = 0 : i64, scratch_operands = 0 : i64, tpu.core_type = #tpu.core_type<tc>, window_params = [{transform_indices = @transform_0, window_bounds = array<i64: 80, 3>}, {pipeline_mode = #tpu.pipeline_mode<synchronous>, transform_indices = @transform_1, window_bounds = array<i64: 3, 186>}, {pipeline_mode = #tpu.pipeline_mode<synchronous>, transform_indices = @transform_2, window_bounds = array<i64: 1, 186>}, {transform_indices = @transform_3, window_bounds = array<i64: 80, 186>}]} {
    %c0 = arith.constant 0 : index
    %c0_0 = arith.constant 0 : index
    %0 = vector.load %arg1[%c0, %c0_0] : memref<80x3xf32, #tpu.memory_space<vmem>>, vector<80x3xf32>
    %c0_1 = arith.constant 0 : index
    %c0_2 = arith.constant 0 : index
    %1 = vector.load %arg2[%c0_1, %c0_2] : memref<3x186xf32, #tpu.memory_space<vmem>>, vector<3x186xf32>
    %cst = arith.constant dense<0.000000e+00> : vector<80x186xf32>
    %2 = tpu.matmul %0, %1, %cst {dimension_numbers = #tpu.dot_dimension_numbers<[1], [0], [0], [1], [0, 0, 1, 1], [], []>, precision = #tpu.contract_precision<fp32>} : vector<80x3xf32>, vector<3x186xf32>, vector<80x186xf32> -> vector<80x186xf32>
    %c0_3 = arith.constant 0 : index
    %c0_4 = arith.constant 0 : index
    %3 = vector.load %arg3[%c0_3, %c0_4] : memref<1x186xf32, #tpu.memory_space<vmem>>, vector<1x186xf32>
    %4 = vector.broadcast %3 : vector<1x186xf32> to vector<80x186xf32>
    %5 = arith.addf %2, %4 : vector<80x186xf32>
    %6 = math.sin %5 : vector<80x186xf32>
    %c0_5 = arith.constant 0 : index
    %c0_6 = arith.constant 0 : index
    %7 = vector.load %arg4[%c0_5, %c0_6] : memref<80x186xf32, #tpu.memory_space<vmem>>, vector<80x186xf32>
    tpu.vector_store %arg4[%c0_5, %c0_6], %6 {strides = array<i32>} : memref<80x186xf32, #tpu.memory_space<vmem>>, vector<80x186xf32>,
    return
  }
  func.func @transform_0(%arg0: i32) -> (i32, i32) {
    %c0_i32 = arith.constant 0 : i32
    %c0_i32_0 = arith.constant 0 : i32
    return %arg0, %c0_i32 : i32, i32
  }
  func.func @transform_1(%arg0: i32) -> (i32, i32) {
    %c0_i32 = arith.constant 0 : i32
    %c0_i32_0 = arith.constant 0 : i32
    %c0_i32_1 = arith.constant 0 : i32
    return %c0_i32, %c0_i32_0 : i32, i32
  }
  func.func @transform_2(%arg0: i32) -> (i32, i32) {
    %c0_i32 = arith.constant 0 : i32
    %c0_i32_0 = arith.constant 0 : i32
    %c0_i32_1 = arith.constant 0 : i32
    return %c0_i32, %c0_i32_0 : i32, i32
  }
  func.func @transform_3(%arg0: i32) -> (i32, i32) {
    %c0_i32 = arith.constant 0 : i32
    %c0_i32_0 = arith.constant 0 : i32
    return %arg0, %c0_i32 : i32, i32
  }
}

</mosaic_0001>

<bundles_post_ra>
// kernel: tpu_custom_call.1
= control target key start
LH: loop header
LB: loop body
LE: loop exit
PB: predicated region body
PF: predicated region fallthrough
CT: control target
= control target key end

     0   :  { %s4058_s12 = smov 0   ;;  %s4060_s13 = smov 0   ;;  %s6121_s0 = inlined_call_operand.vmem [shape: f32[300,3], index: 0, kind: input, shape index: {}]   ;;  %s6122_s1 = inlined_call_operand.vmem [shape: f32[3,186], index: 1, kind: input, shape index: {}]   ;;  %s6123_s2 = inlined_call_operand.vmem [shape: f32[1,186], index: 2, kind: input, shape index: {}]   ;;  %s6124_s3 = inlined_call_operand.vmem [shape: f32[300,186], index: 3, kind: output, shape index: {}]  }
   0x1   :  { %s4062_s14 = smov 0  }
   0x2 LB: > { %s4071_s15 = sadd.s32 4294967295, %s3997_s14   ;;  %s4073_s16 = sadd.s32 1, %s3997_s14   ;;  %s3997_s14 = sphi %s4062_s14, %s6167_s14   ;;  %s3993_s13 = sphi %s4060_s13, %s6166_s13   ;;  %s3989_s12 = sphi %s4058_s12, %s6165_s12  }
   0x3   : > { %s85_s17 = ssub.s32 %s3997_s14, %s4073_s16  ;;  %s88_s18 = sadd.s32 1, %s3993_s13 }
   0x4   : > { %p86_p0 = scmp.eq.s32.totalorder %s85_s17, 0  ;;  %p98_p1 = scmp.ne.s32.totalorder %s3993_s13, %s3989_s12 }
   0x5   : > { %p99_p2 = scmp.eq.s32.totalorder %s4071_s15, 3  ;;  %p3461_p3 = scmp.ge.s32.totalorder %s3997_s14, 1 }
   0x6   : > { %s4081_s19 = scalar_select %p86_p0, %s3993_s13, %s88_s18  }
   0x7   : > { %p4083_p4 = por %p99_p2, %p98_p1  ;;  %p146_p5 = scmp.lt.s32.totalorder %s3997_s14, 5 }
   0x9   : > { %p147_p6 = pnand %p3461_p3, %p146_p5 }
   0xa   : > { %v203_v0 = vld [vmem:[%s6122_s1] sm:$0x77] (!%p147_p6)  ;;  %vm249_vm0 = vcmask (!%p147_p6), 1042432   ;;  %s4091_s23 = smul.u32 (!%p147_p6), 10, %s4071_s15  ;;  %v4031_v3 = vmov (!%p147_p6), 0.0   ;;  %vm218_vm1 = vcmask (!%p147_p6), 23552  }
   0xb   : > { %150 = sbr.rel (%p147_p6) target bundleno = 931 (0x3a3), region = 32  ;;  %v217_v1 = vcombine.high (!%p147_p6), %v203_v0, %v203_v0  ;;  %v250_v2 = vsel (!%p147_p6), %vm249_vm0, %v203_v0, 0  ;;  %791 = vmatprep.mubr.f32.mxu0 (!%p147_p6), %v4031_v3  ;;  %320 = vmatprep.mubr.f32.mxu1 (!%p147_p6), %v4031_v3  ;;  %s170_s4 = sand.u32 (!%p147_p6), 1, %s3989_s12  }
   0xc   : > { %p178_p7 = scmp.lt.s32.totalorder (!%p147_p6), %s4091_s23, 37  ;;  %v4096_v5 = vand.u32 (!%p147_p6), 4294901760, %v250_v2  ;;  %s4586_s5 = smul.u32 (!%p147_p6), 160, %s170_s4 }
   0xd   : > { %v252_v4 = vsel (!%p147_p6), %vm249_vm0, %v217_v1, 0 }
   0xe   : > { %v254_v6 = vand.u32 (!%p147_p6), 4294901760, %v252_v4  ;;  %v4100_v7 = vsub.f32 (!%p147_p6), %v250_v2, %v4096_v5  ;;  %s4624_s6 = scalar_lea.vmem (!%p147_p6), [#allocation2], %s4586_s5  }
  0x10   : > { %726 = vmatprep.subr.mxu0 (!%p147_p6), %v254_v6  ;;  %255 = vmatprep.subr.mxu1 (!%p147_p6), %v254_v6  ;;  %v432_v8 = vsub.f32 (!%p147_p6), %v252_v4, %v254_v6  ;;  %v439_v14 = vand.u32 (!%p147_p6), 4294901760, %v4100_v7 }
  0x11   : > { %728 = vmatpush1.msra.mxu0 (!%p147_p6), %v4096_v5  ;;  %257 = vmatpush1.msra.mxu1 (!%p147_p6), %v4096_v5 }
  0x12   : > { %s179_s24 = scalar_select %p178_p7, %s4091_s23, 37  ;;  %v433_v10 = vand.u32 4294901760, %v432_v8  ;;  %v440_v30 = vsub.f32 %v4100_v7, %v439_v14 }
  0x13   : > { %s3269_s7 = ssub.s32 (%p4083_p4), 38, %s4091_s23  ;;  %s3560_s8 = smul.u32 (%p4083_p4), 160, %s4071_s15 }
  0x14   : > { %s3462_s25 = sshll.u32 %s179_s24, 3  ;;  %v434_v20 = vsub.f32 %v432_v8, %v433_v10  ;;  %885 = vmatprep.subr.mxu0 %v433_v10  ;;  %v441_v41 = vand.u32 4294901760, %v440_v30  ;;  %p3270_p8 = scmp.lt.s32.totalorder (%p4083_p4), %s3269_s7, 10 }
  0x15   : > { %s4106_s28 = scalar_lea.vmem %s6121_s0, %s3462_s25  ;;  %s6017_s11 = scalar_lea.vmem (%p4083_p4), %s6124_s3, %s3560_s8  }
  0x16   : > { %v193_v9 = vld [vmem:[%s4106_s28] sm:$0xff]  ;;  %v194_v11 = vld [vmem:[%s4106_s28 + $0x8] sm:$0xff]  ;;  %v195_v12 = vld [vmem:[%s4106_s28 + $0x10] sm:$0xff]  ;;  %v435_v26 = vand.u32 4294901760, %v434_v20 }
  0x17   : > { %v220_v13 = vsel %vm218_vm1, %v193_v9, 0  ;;  %v223_v15 = vsel %vm218_vm1, %v194_v11, 0  ;;  %v226_v16 = vsel %vm218_vm1, %v195_v12, 0  ;;  %v196_v17 = vld [vmem:[%s4106_s28 + $0x18] sm:$0xff]  ;;  %v197_v18 = vld [vmem:[%s4106_s28 + $0x20] sm:$0xff]  ;;  %v198_v29 = vld [vmem:[%s4106_s28 + $0x28] sm:$0xff] }
  0x18   : > { %v4118_v19 = vand.u32 4294901760, %v220_v13  ;;  %v4120_v21 = vand.u32 4294901760, %v223_v15  ;;  %v4122_v22 = vand.u32 4294901760, %v226_v16  ;;  %v229_v23 = vsel %vm218_vm1, %v196_v17, 0  ;;  %436 = vmatprep.subr.mxu1 %v435_v26  ;;  %v199_v40 = vld [vmem:[%s4106_s28 + $0x30] sm:$0xff]  ;;  %v200_v49 = vld [vmem:[%s4106_s28 + $0x38] sm:$0xff] }
  0x19   : > { %v232_v24 = vsel %vm218_vm1, %v197_v18, 0  ;;  %v4132_v28 = vand.u32 4294901760, %v229_v23  ;;  %v235_v35 = vsel %vm218_vm1, %v198_v29, 0  ;;  %v238_v44 = vsel %vm218_vm1, %v199_v40, 0  ;;  %v201_v56 = vld [vmem:[%s4106_s28 + $0x40] sm:$0xff]  ;;  %v202_v63 = vld [vmem:[%s4106_s28 + $0x48] sm:$0xff] }
  0x1a   : > { %v4127_v25 = vsub.f32 %v220_v13, %v4118_v19  ;;  %v4130_v27 = vsub.f32 %v223_v15, %v4120_v21  ;;  %v4137_v31 = vsub.f32 %v226_v16, %v4122_v22  ;;  %v4141_v34 = vand.u32 4294901760, %v232_v24 }
  0x1b   : > { %v4148_v39 = vsub.f32 %v229_v23, %v4132_v28  ;;  %v4152_v43 = vand.u32 4294901760, %v235_v35  ;;  %v4163_v50 = vand.u32 4294901760, %v238_v44  ;;  %v241_v55 = vsel %vm218_vm1, %v200_v49, 0 }
  0x1c   : > { %v323_v32 = vand.u32 4294901760, %v4127_v25  ;;  %v334_v33 = vand.u32 4294901760, %v4130_v27  ;;  %v345_v38 = vand.u32 4294901760, %v4137_v31  ;;  %v4158_v48 = vsub.f32 %v232_v24, %v4141_v34 }
  0x1d   : > { %v356_v47 = vand.u32 4294901760, %v4148_v39  ;;  %v4168_v54 = vsub.f32 %v235_v35, %v4152_v43  ;;  %v4175_v57 = vsub.f32 %v238_v44, %v4163_v50  ;;  %v4179_v61 = vand.u32 4294901760, %v241_v55 }
  0x1e   : > { %795 = vmatmul.mubr.f32.vlgmr.msra.gmra.mrb[0].mxu0 %v323_v32  ;;  %v324_v36 = vsub.f32 %v4127_v25, %v323_v32  ;;  %v335_v37 = vsub.f32 %v4130_v27, %v334_v33  ;;  %v346_v46 = vsub.f32 %v4137_v31, %v345_v38  ;;  %v367_v53 = vand.u32 4294901760, %v4158_v48 }
  0x1f   : > { %800 = vmatprep.mubr.f32.mxu0 %v4031_v3  ;;  %889 = vmatpush1.msra.mxu0 %v439_v14  ;;  %v357_v52 = vsub.f32 %v4148_v39, %v356_v47  ;;  %v378_v60 = vand.u32 4294901760, %v4168_v54  ;;  %v244_v62 = vsel %vm218_vm1, %v201_v56, 0  ;;  %v389_v0 = vand.u32 4294901760, %v4175_v57 }
  0x20   : > { %v325_v42 = vand.u32 4294901760, %v324_v36  ;;  %1024 = vmatprep.subr.mxu0 %v254_v6  ;;  %v336_v45 = vand.u32 4294901760, %v335_v37  ;;  %v347_v51 = vand.u32 4294901760, %v346_v46  ;;  %v368_v59 = vsub.f32 %v4158_v48, %v367_v53 }
  0x21   : > { %v358_v58 = vand.u32 4294901760, %v357_v52  ;;  %v379_v2 = vsub.f32 %v4168_v54, %v378_v60  ;;  %v4188_v4 = vsub.f32 %v241_v55, %v4179_v61  ;;  %v4190_v6 = vand.u32 4294901760, %v244_v62 }
  0x22   : > { %326 = vmatmul.mubr.f32.vlgmr.msra.gmra.mrb[0].mxu1 %v325_v42  ;;  %804 = vmatmul.mubr.f32.gmra.mrb[2].mxu0 %v334_v33  ;;  %v369_v1 = vand.u32 4294901760, %v368_v59  ;;  %v390_v9 = vsub.f32 %v4175_v57, %v389_v0 }
  0x23   : > { %442 = vmatpush1.msra.mxu1 %v441_v41  ;;  %331 = vmatprep.mubr.f32.mxu1 %v4031_v3  ;;  %v380_v10 = vand.u32 4294901760, %v379_v2  ;;  %v400_v11 = vand.u32 4294901760, %v4188_v4  ;;  %v4198_v12 = vsub.f32 %v244_v62, %v4190_v6 }
  0x24   : > { %809 = vmatprep.mubr.f32.mxu0 %v4031_v3  ;;  %578 = vmatprep.subr.mxu1 %v432_v8  ;;  %v247_v8 = vsel %vm218_vm1, %v202_v63, 0  ;;  %v391_v14 = vand.u32 4294901760, %v390_v9 }
  0x25   : > { %v4200_v13 = vand.u32 4294901760, %v247_v8  ;;  %v401_v15 = vsub.f32 %v4188_v4, %v400_v11  ;;  %v411_v16 = vand.u32 4294901760, %v4198_v12 }
  0x26   : > { %337 = vmatmul.mubr.f32.gmra.mrb[2].mxu1 %v336_v45  ;;  %813 = vmatmul.mubr.f32.gmra.mrb[4].mxu0 %v345_v38 }
  0x27   : > { %342 = vmatprep.mubr.f32.mxu1 %v4031_v3  ;;  %818 = vmatprep.mubr.f32.mxu0 %v4031_v3  ;;  %v4207_v17 = vsub.f32 %v247_v8, %v4200_v13  ;;  %v402_v18 = vand.u32 4294901760, %v401_v15  ;;  %v412_v20 = vsub.f32 %v4198_v12, %v411_v16 }
  0x29   : > { %v422_v23 = vand.u32 4294901760, %v4207_v17  ;;  %v413_v24 = vand.u32 4294901760, %v412_v20 }
  0x2a   : > { %348 = vmatmul.mubr.f32.gmra.mrb[4].mxu1 %v347_v51  ;;  %822 = vmatmul.mubr.f32.gmra.mrb[6].mxu0 %v356_v47 }
  0x2b   : > { %353 = vmatprep.mubr.f32.mxu1 %v4031_v3  ;;  %827 = vmatprep.mubr.f32.mxu0 %v4031_v3  ;;  %v423_v26 = vsub.f32 %v4207_v17, %v422_v23 }
  0x2d   : > { %v424_v29 = vand.u32 4294901760, %v423_v26 }
  0x2e   : > { %359 = vmatmul.mubr.f32.gmra.mrb[6].mxu1 %v358_v58  ;;  %831 = vmatmul.mubr.f32.gmra.mrb[8].mxu0 %v367_v53 }
  0x2f   : > { %364 = vmatprep.mubr.f32.mxu1 %v4031_v3  ;;  %836 = vmatprep.mubr.f32.mxu0 %v4031_v3 }
  0x32   : > { %370 = vmatmul.mubr.f32.gmra.mrb[8].mxu1 %v369_v1  ;;  %840 = vmatmul.mubr.f32.gmra.mrb[10].mxu0 %v378_v60 }
  0x33   : > { %375 = vmatprep.mubr.f32.mxu1 %v4031_v3  ;;  %845 = vmatprep.mubr.f32.mxu0 %v4031_v3 }
  0x36   : > { %381 = vmatmul.mubr.f32.gmra.mrb[10].mxu1 %v380_v10  ;;  %849 = vmatmul.mubr.f32.gmra.mrb[12].mxu0 %v389_v0 }
  0x37   : > { %386 = vmatprep.mubr.f32.mxu1 %v4031_v3  ;;  %854 = vmatprep.mubr.f32.mxu0 %v4031_v3 }
  0x3a   : > { %392 = vmatmul.mubr.f32.gmra.mrb[12].mxu1 %v391_v14  ;;  %858 = vmatmul.mubr.f32.gmra.mrb[14].mxu0 %v400_v11 }
  0x3b   : > { %397 = vmatprep.mubr.f32.mxu1 %v4031_v3  ;;  %863 = vmatprep.mubr.f32.mxu0 %v4031_v3 }
  0x3e   : > { %403 = vmatmul.mubr.f32.gmra.mrb[14].mxu1 %v402_v18  ;;  %867 = vmatmul.mubr.f32.gmra.mrb[16].mxu0 %v411_v16 }
  0x3f   : > { %408 = vmatprep.mubr.f32.mxu1 %v4031_v3  ;;  %872 = vmatprep.mubr.f32.mxu0 %v4031_v3 }
  0x42   : > { %414 = vmatmul.mubr.f32.gmra.mrb[16].mxu1 %v413_v24  ;;  %876 = vmatmul.mubr.f32.gmra.mrb[18].mxu0 %v422_v23  ;;  %v4033_v24 = vmov 2475754826  }
  0x43   : > { %419 = vmatprep.mubr.f32.mxu1 %v4031_v3  ;;  %952 = vmatprep.mubr.f32.mxu0 %v4031_v3 }
  0x46   : > { %425 = vmatmul.mubr.f32.gmra.mrb[18].mxu1 %v424_v29  ;;  %954 = vmatmul.mubr.f32.vlgmr.msra.gmra.mrb[0].mxu0 %v4118_v19  ;;  %v4034_v29 = vmov 2131351028  }
  0x47   : > { %505 = vmatprep.mubr.f32.mxu1 %v4031_v3  ;;  %959 = vmatprep.mubr.f32.mxu0 %v4031_v3 }
  0x48   : > { %1026 = vmatpush1.msra.mxu0 %v4096_v5  ;;  %v206_v5 = vlaneseq }
  0x4a   : > { %507 = vmatmul.mubr.f32.vlgmr.msra.gmra.mrb[0].mxu1 %v4118_v19  ;;  %961 = vmatmul.mubr.f32.gmra.mrb[2].mxu0 %v4120_v21 }
  0x4b   : > { %581 = vmatpush1.msra.mxu1 %v4100_v7  ;;  %512 = vmatprep.mubr.f32.mxu1 %v4031_v3  ;;  %v207_v7 = vshrl.u32 %v206_v5, 7 }
  0x4c   : > { %966 = vmatprep.mubr.f32.mxu0 %v4031_v3 }
  0x4e   : > { %514 = vmatmul.mubr.f32.gmra.mrb[2].mxu1 %v4120_v21  ;;  %968 = vmatmul.mubr.f32.gmra.mrb[4].mxu0 %v4122_v22 }
  0x4f   : > { %519 = vmatprep.mubr.f32.mxu1 %v4031_v3  ;;  %973 = vmatprep.mubr.f32.mxu0 %v4031_v3 }
  0x52   : > { %521 = vmatmul.mubr.f32.gmra.mrb[4].mxu1 %v4122_v22  ;;  %975 = vmatmul.mubr.f32.gmra.mrb[6].mxu0 %v4132_v28 }
  0x53   : > { %526 = vmatprep.mubr.f32.mxu1 %v4031_v3  ;;  %980 = vmatprep.mubr.f32.mxu0 %v4031_v3 }
  0x56   : > { %528 = vmatmul.mubr.f32.gmra.mrb[6].mxu1 %v4132_v28  ;;  %982 = vmatmul.mubr.f32.gmra.mrb[8].mxu0 %v4141_v34 }
  0x57   : > { %533 = vmatprep.mubr.f32.mxu1 %v4031_v3  ;;  %987 = vmatprep.mubr.f32.mxu0 %v4031_v3 }
  0x5a   : > { %535 = vmatmul.mubr.f32.gmra.mrb[8].mxu1 %v4141_v34  ;;  %989 = vmatmul.mubr.f32.gmra.mrb[10].mxu0 %v4152_v43 }
  0x5b   : > { %540 = vmatprep.mubr.f32.mxu1 %v4031_v3  ;;  %994 = vmatprep.mubr.f32.mxu0 %v4031_v3 }
  0x5e   : > { %542 = vmatmul.mubr.f32.gmra.mrb[10].mxu1 %v4152_v43  ;;  %996 = vmatmul.mubr.f32.gmra.mrb[12].mxu0 %v4163_v50 }
  0x5f   : > { %547 = vmatprep.mubr.f32.mxu1 %v4031_v3  ;;  %1001 = vmatprep.mubr.f32.mxu0 %v4031_v3 }
  0x62   : > { %549 = vmatmul.mubr.f32.gmra.mrb[12].mxu1 %v4163_v50  ;;  %1003 = vmatmul.mubr.f32.gmra.mrb[14].mxu0 %v4179_v61 }
  0x63   : > { %554 = vmatprep.mubr.f32.mxu1 %v4031_v3  ;;  %1008 = vmatprep.mubr.f32.mxu0 %v4031_v3 }
  0x66   : > { %556 = vmatmul.mubr.f32.gmra.mrb[14].mxu1 %v4179_v61  ;;  %1010 = vmatmul.mubr.f32.gmra.mrb[16].mxu0 %v4190_v6 }
  0x67   : > { %561 = vmatprep.mubr.f32.mxu1 %v4031_v3  ;;  %1015 = vmatprep.mubr.f32.mxu0 %v4031_v3 }
  0x6a   : > { %563 = vmatmul.mubr.f32.gmra.mrb[16].mxu1 %v4190_v6  ;;  %1017 = vmatmul.mubr.f32.gmra.mrb[18].mxu0 %v4200_v13 }
  0x6b   : > { %568 = vmatprep.mubr.f32.mxu1 %v4031_v3  ;;  %1089 = vmatprep.mubr.f32.mxu0 %v4031_v3 }
  0x6e   : > { %570 = vmatmul.mubr.f32.gmra.mrb[18].mxu1 %v4200_v13  ;;  %1091 = vmatmul.mubr.f32.vlgmr.msra.gmra.mrb[0].mxu0 %v4118_v19  ;;  %v208_v19 = vsub.s32 0, %v207_v7 }
  0x6f   : > { %644 = vmatprep.mubr.f32.mxu1 %v4031_v3  ;;  %1096 = vmatprep.mubr.f32.mxu0 %v4031_v3 }
  0x72   : > { %647 = vmatmul.mubr.f32.vlgmr.msra.gmra.mrb[0].mxu1 %v4127_v25  ;;  %1098 = vmatmul.mubr.f32.gmra.mrb[2].mxu0 %v4120_v21  ;;  %v204_v21 = vld [vmem:[%s6123_s2] sm:$0x3] }
  0x73   : > { %652 = vmatprep.mubr.f32.mxu1 %v4031_v3  ;;  %1103 = vmatprep.mubr.f32.mxu0 %v4031_v3 }
  0x76   : > { %655 = vmatmul.mubr.f32.gmra.mrb[2].mxu1 %v4130_v27  ;;  %1105 = vmatmul.mubr.f32.gmra.mrb[4].mxu0 %v4122_v22  ;;  %v212_v22 = vsub.s32 1, %v207_v7  ;;  %v4035_v7 = vmov 2102212464  }
  0x77   : > { %660 = vmatprep.mubr.f32.mxu1 %v4031_v3  ;;  %1110 = vmatprep.mubr.f32.mxu0 %v4031_v3 }
  0x78   : > { %v4306_v30 = vrot.slane %v204_v21, %v212_v22 }
  0x7a   : > { %663 = vmatmul.mubr.f32.gmra.mrb[4].mxu1 %v4137_v31  ;;  %1112 = vmatmul.mubr.f32.gmra.mrb[6].mxu0 %v4132_v28  ;;  %v4304_v28 = vrot.slane %v204_v21, %v208_v19  ;;  %v4036_v21 = vmov 920167782  }
  0x7b   : > { %668 = vmatprep.mubr.f32.mxu1 %v4031_v3  ;;  %1117 = vmatprep.mubr.f32.mxu0 %v4031_v3 }
  0x7e   : > { %671 = vmatmul.mubr.f32.gmra.mrb[6].mxu1 %v4148_v39  ;;  %1119 = vmatmul.mubr.f32.gmra.mrb[8].mxu0 %v4141_v34 }
  0x7f   : > { %676 = vmatprep.mubr.f32.mxu1 %v4031_v3  ;;  %1124 = vmatprep.mubr.f32.mxu0 %v4031_v3 }
  0x82   : > { %679 = vmatmul.mubr.f32.gmra.mrb[8].mxu1 %v4158_v48  ;;  %1126 = vmatmul.mubr.f32.gmra.mrb[10].mxu0 %v4152_v43 }
  0x83   : > { %684 = vmatprep.mubr.f32.mxu1 %v4031_v3  ;;  %1131 = vmatprep.mubr.f32.mxu0 %v4031_v3 }
  0x86   : > { %687 = vmatmul.mubr.f32.gmra.mrb[10].mxu1 %v4168_v54  ;;  %1133 = vmatmul.mubr.f32.gmra.mrb[12].mxu0 %v4163_v50 }
  0x87   : > { %692 = vmatprep.mubr.f32.mxu1 %v4031_v3  ;;  %1138 = vmatprep.mubr.f32.mxu0 %v4031_v3 }
  0x8a   : > { %695 = vmatmul.mubr.f32.gmra.mrb[12].mxu1 %v4175_v57  ;;  %1140 = vmatmul.mubr.f32.gmra.mrb[14].mxu0 %v4179_v61 }
  0x8b   : > { %700 = vmatprep.mubr.f32.mxu1 %v4031_v3  ;;  %1145 = vmatprep.mubr.f32.mxu0 %v4031_v3 }
  0x8e   : > { %703 = vmatmul.mubr.f32.gmra.mrb[14].mxu1 %v4188_v4  ;;  %1147 = vmatmul.mubr.f32.gmra.mrb[16].mxu0 %v4190_v6 }
  0x8f   : > { %708 = vmatprep.mubr.f32.mxu1 %v4031_v3  ;;  %1152 = vmatprep.mubr.f32.mxu0 %v4031_v3 }
  0x92   : > { %711 = vmatmul.mubr.f32.gmra.mrb[16].mxu1 %v4198_v12  ;;  %1154 = vmatmul.mubr.f32.gmra.mrb[18].mxu0 %v4200_v13 }
  0x93   : > { %716 = vmatprep.mubr.f32.mxu1 %v4031_v3 }
  0x96   : > { %719 = vmatmul.mubr.f32.gmra.mrb[18].mxu1 %v4207_v17  ;;  %v4032_v17 = vmov 683565275  }
 0x141   : > { %v1092_v25 = vpop.f32.mrb[0].mxu0 }
 0x142   : > { %v1094_v27 = vpop.f32.mrb[1].mxu0 }
 0x145   : > { %v648_v31 = vpop.f32.mrb[0].mxu1  ;;  %v1099_v32 = vpop.f32.mrb[2].mxu0 }
 0x146   : > { %v3561_v3 = vadd.f32 %v648_v31, %v4304_v28  ;;  %v650_v33 = vpop.f32.mrb[1].mxu1  ;;  %v1101_v34 = vpop.f32.mrb[3].mxu0 }
 0x147   : > { %v3563_v35 = vadd.f32 %v650_v33, %v4306_v30  ;;  %v4037_v33 = vmov 1326507024  }
 0x148   : > { %v4310_v36 = vadd.f32 %v3561_v3, %v1092_v25 }
 0x149   : > { %v4312_v37 = vadd.f32 %v3563_v35, %v1094_v27  ;;  %v656_v38 = vpop.f32.mrb[2].mxu1  ;;  %v4314_v39 = vpop.f32.mrb[4].mxu0 }
 0x14a   : > { %v1160_v40 = vand.u32 2147483647, %v4310_v36  ;;  %v1163_v41 = vand.u32 2139095040, %v4310_v36  ;;  %v658_v42 = vpop.f32.mrb[3].mxu1  ;;  %v4318_v43 = vpop.f32.mrb[5].mxu0  ;;  %v3565_v47 = vadd.f32 %v656_v38, %v4304_v28  ;;  %vm1162_vm15 = vcmp.lt.s32.totalorder %v4310_v36, 0 }
 0x14b   : > { %v1264_v44 = vand.u32 2147483647, %v4312_v37  ;;  %v1267_v45 = vand.u32 2139095040, %v4312_v37  ;;  %v3567_v51 = vadd.f32 %v658_v42, %v4306_v30  ;;  %vm1266_vm1 = vcmp.lt.s32.totalorder %v4312_v37, 0 }
 0x14c   : > { %v1164_v46 = vshrl.u32 %v1163_v41, 23  ;;  %v1167_v48 = vand.u32 8388607, %v1160_v40  ;;  %v4330_v54 = vadd.f32 %v3565_v47, %v1099_v32  ;;  %vm4433_vm0 = vcmp.le.f32.partialorder %v1160_v40, 0.7853982 }
 0x14d   : > { %v1268_v49 = vshrl.u32 %v1267_v45, 23  ;;  %v1271_v50 = vand.u32 8388607, %v1264_v44  ;;  %v4328_v52 = vpop.f32.mrb[4].mxu1  ;;  %v4332_v55 = vpop.f32.mrb[6].mxu0  ;;  %v4336_v58 = vadd.f32 %v3567_v51, %v1101_v34 }
 0x14e   : > { %v3463_v53 = vadd.s32 4294967169, %v1164_v46  ;;  %v4334_v56 = vpop.f32.mrb[5].mxu1  ;;  %v4338_v59 = vpop.f32.mrb[7].mxu0  ;;  %v1168_v61 = vor.u32 8388608, %v1167_v48  ;;  %v1371_v0 = vand.u32 2139095040, %v4330_v54 }
 0x14f   : > { %v3467_v57 = vadd.s32 4294967169, %v1268_v49  ;;  %v1272_v62 = vor.u32 8388608, %v1271_v50  ;;  %v1368_v15 = vand.u32 2147483647, %v4330_v54 }
 0x150   : > { %v1170_v60 = vadd.s32 1, %v3463_v53  ;;  %v1372_v6 = vshrl.u32 %v1371_v0, 23  ;;  %v4347_v12 = vshll.u32 %v1168_v61, 8 }
 0x151   : > { %v1274_v63 = vadd.s32 1, %v3467_v57  ;;  %v4341_v1 = vpop.f32.mrb[6].mxu1  ;;  %v4343_v2 = vpop.f32.mrb[8].mxu0  ;;  %v4351_v14 = vshll.u32 %v1272_v62, 8 }
 0x152   : > { %vm1171_vm2 = vcmp.gt.s32.totalorder %v1170_v60, 0  ;;  %v4345_v8 = vpop.f32.mrb[7].mxu1  ;;  %v4355_v23 = vadd.s32 4294967169, %v1372_v6 }
 0x153   : > { %v1172_v4 = vsel %vm1171_vm2, %v1170_v60, 0  ;;  %vm1275_vm3 = vcmp.gt.s32.totalorder %v1274_v63, 0 }
 0x154   : > { %v1173_v9 = vshrl.u32 %v1172_v4, 5  ;;  %v1174_v10 = vand.u32 31, %v1172_v4  ;;  %v1276_v11 = vsel %vm1275_vm3, %v1274_v63, 0 }
 0x155   : > { %v4349_v13 = vshrl.u32 %v1276_v11, 5  ;;  %v1278_v20 = vand.u32 31, %v1276_v11 }
 0x156   : > { %v1175_v16 = vsub.s32 32, %v1174_v10  ;;  %v1177_v18 = vshll.u32 %v4032_v17, %v1174_v10  ;;  %v1180_v26 = vshll.u32 %v4033_v24, %v1174_v10  ;;  %v1183_v5 = vshll.u32 %v4034_v29, %v1174_v10 }
 0x157   : > { %v1186_v19 = vshll.u32 %v4035_v7, %v1174_v10  ;;  %v1189_v22 = vshll.u32 %v4036_v21, %v1174_v10  ;;  %vm1192_vm4 = vcmp.lt.s32.totalorder %v1173_v9, 1  ;;  %vm1193_vm5 = vcmp.lt.s32.totalorder %v1173_v9, 2 }
 0x158   : > { %v1178_v25 = vshrl.u32 %v4033_v24, %v1175_v16  ;;  %v1181_v27 = vshrl.u32 %v4034_v29, %v1175_v16  ;;  %v1184_v31 = vshrl.u32 %v4035_v7, %v1175_v16  ;;  %v1176_v32 = vshrl.u32 %v4032_v17, %v1175_v16 }
 0x159   : > { %v1187_v3 = vshrl.u32 %v4036_v21, %v1175_v16  ;;  %v1190_v34 = vshrl.u32 %v4037_v33, %v1175_v16  ;;  %v1279_v42 = vsub.s32 32, %v1278_v20  ;;  %vm1194_vm6 = vcmp.lt.s32.totalorder %v1173_v9, 3 }
 0x15a   : > { %v1179_v35 = vor.u32 %v1178_v25, %v1177_v18  ;;  %v1182_v38 = vor.u32 %v1181_v27, %v1180_v26  ;;  %v1185_v41 = vor.u32 %v1184_v31, %v1183_v5  ;;  %vm1195_vm7 = vcmp.lt.s32.totalorder %v1173_v9, 4 }
 0x15b   : > { %v1188_v45 = vor.u32 %v1187_v3, %v1186_v19  ;;  %v1191_v46 = vor.u32 %v1190_v34, %v1189_v22  ;;  %v1281_v60 = vshll.u32 %v4032_v17, %v1278_v20  ;;  %v1282_v63 = vshrl.u32 %v4033_v24, %v1279_v42 }
 0x15c   : > { %v1196_v47 = vsel %vm1192_vm4, %v1176_v32, %v1179_v35  ;;  %v1197_v48 = vsel %vm1195_vm7, %v1185_v41, 2102212464  ;;  %v1200_v49 = vsel %vm1192_vm4, %v1179_v35, %v1182_v38  ;;  %v1204_v50 = vsel %vm1192_vm4, %v1182_v38, %v1185_v41 }
 0x15d   : > { %v1198_v51 = vsel %vm1194_vm6, %v1182_v38, %v1197_v48  ;;  %v1201_v53 = vsel %vm1195_vm7, %v1188_v45, 920167782  ;;  %v1205_v57 = vsel %vm1195_vm7, %v1191_v46, 1326507024  ;;  %v1284_v0 = vshll.u32 %v4033_v24, %v1278_v20 }
 0x15e   : > { %v1202_v61 = vsel %vm1194_vm6, %v1185_v41, %v1201_v53  ;;  %v1206_v62 = vsel %vm1194_vm6, %v1188_v45, %v1205_v57  ;;  %v1199_v4 = vsel %vm1193_vm5, %v1196_v47, %v1198_v51  ;;  %v1285_v11 = vshrl.u32 %v4034_v29, %v1279_v42 }
 0x15f   : > { %v1203_v6 = vsel %vm1193_vm5, %v1200_v49, %v1202_v61  ;;  %v1207_v10 = vsel %vm1193_vm5, %v1204_v50, %v1206_v62  ;;  %v1283_v19 = vor.u32 %v1282_v63, %v1281_v60  ;;  %v1287_v25 = vshll.u32 %v4034_v29, %v1278_v20 }
 0x160   : > { %v4378_v16 = vmul.u32.u64.low %v4347_v12, %v1207_v10  ;;  %v4379_v18 = vmul.u32.u64.high %v4347_v12, %v1207_v10, %v4378_v16  ;;  %v4382_v26 = vmul.u32.u64.low %v4347_v12, %v1203_v6  ;;  %v4383_v5 = vmul.u32.u64.high %v4347_v12, %v1203_v6, %v4382_v26  ;;  %v4411_v10 = vpop.f32.mrb[9].mxu0 }
 0x161   : > { %v1286_v22 = vor.u32 %v1285_v11, %v1284_v0  ;;  %v1288_v27 = vshrl.u32 %v4035_v7, %v1279_v42  ;;  %v1280_v9 = vshrl.u32 %v4032_v17, %v1279_v42  ;;  %v1290_v31 = vshll.u32 %v4035_v7, %v1278_v20 }
 0x162   : > { %v1291_v32 = vshrl.u32 %v4036_v21, %v1279_v42  ;;  %v1294_v3 = vshrl.u32 %v4037_v33, %v1279_v42  ;;  %v1215_v34 = vmul.u32 %v4347_v12, %v1199_v4  ;;  %v1293_v38 = vshll.u32 %v4036_v21, %v1278_v20 }
 0x163   : > { %v1289_v35 = vor.u32 %v1288_v27, %v1287_v25  ;;  %vm1296_vm8 = vcmp.lt.s32.totalorder %v4349_v13, 1  ;;  %vm1217_vm9 = vc.u32 %v4379_v18, %v4382_v26  ;;  %v1218_v41 = vadd.s32 1, %v4383_v5  ;;  %v4421_v27 = vpop.f32.mrb[8].mxu1 }
 0x164   : > { %v1292_v45 = vor.u32 %v1291_v32, %v1290_v31  ;;  %vm1297_vm10 = vcmp.lt.s32.totalorder %v4349_v13, 2  ;;  %v1295_v46 = vor.u32 %v1294_v3, %v1293_v38  ;;  %vm1298_vm11 = vcmp.lt.s32.totalorder %v4349_v13, 3 }
 0x165   : > { %vm1299_vm12 = vcmp.lt.s32.totalorder %v4349_v13, 4  ;;  %v1304_v42 = vsel %vm1296_vm8, %v1283_v19, %v1286_v22  ;;  %v1219_v12 = vsel %vm1217_vm9, %v1218_v41, %v4383_v5  ;;  %v1308_v48 = vsel %vm1296_vm8, %v1286_v22, %v1289_v35 }
 0x166   : > { %v1301_v47 = vsel %vm1299_vm12, %v1289_v35, 2102212464  ;;  %v1305_v20 = vsel %vm1299_vm12, %v1292_v45, 920167782  ;;  %v1220_v49 = vadd.s32 %v1219_v12, %v1215_v34  ;;  %v1300_v50 = vsel %vm1296_vm8, %v1280_v9, %v1283_v19 }
 0x167   : > { %v1306_v51 = vsel %vm1298_vm11, %v1289_v35, %v1305_v20  ;;  %v1309_v53 = vsel %vm1299_vm12, %v1295_v46, 1326507024  ;;  %v1302_v57 = vsel %vm1298_vm11, %v1286_v22, %v1301_v47  ;;  %v1378_v62 = vadd.s32 1, %v4355_v23 }
 0x168   : > { %v1307_v60 = vsel %vm1297_vm10, %v1304_v42, %v1306_v51  ;;  %v1310_v61 = vsel %vm1298_vm11, %v1292_v45, %v1309_v53  ;;  %v1221_v63 = vadd.s32 536870912, %v1220_v49  ;;  %v1375_v5 = vand.u32 8388607, %v1368_v15 }
 0x169   : > { %v1311_v0 = vsel %vm1297_vm10, %v1308_v48, %v1310_v61  ;;  %v4408_v4 = vmul.u32.u64.low %v4351_v14, %v1307_v60  ;;  %v4409_v6 = vmul.u32.u64.high %v4351_v14, %v1307_v60, %v4408_v4  ;;  %vm1379_vm13 = vcmp.gt.s32.totalorder %v1378_v62, 0 }
 0x16a   : > { %v4414_v11 = vmul.u32.u64.low %v4351_v14, %v1311_v0  ;;  %v4415_v16 = vmul.u32.u64.high %v4351_v14, %v1311_v0, %v4414_v11  ;;  %v1222_v19 = vshrl.u32 %v1221_v63, 30  ;;  %v1303_v23 = vsel %vm1297_vm10, %v1300_v50, %v1302_v57 }
 0x16b   : > { %v1380_v22 = vsel %vm1379_vm13, %v1378_v62, 0  ;;  %v1322_v31 = vadd.s32 1, %v4409_v6  ;;  %v1319_v32 = vmul.u32 %v4351_v14, %v1303_v23  ;;  %v1376_v3 = vor.u32 8388608, %v1375_v5 }
 0x16c   : > { %v1382_v25 = vand.u32 31, %v1380_v22  ;;  %v1223_v9 = vshll.u32 %v1222_v19, 30  ;;  %vm1321_vm14 = vc.u32 %v4415_v16, %v4408_v4  ;;  %v1475_v38 = vand.u32 2139095040, %v4336_v58 }
 0x16d   : > { %v1323_v13 = vsel %vm1321_vm14, %v1322_v31, %v4409_v6  ;;  %v1246_v45 = vsub.s32 4, %v1222_v19  ;;  %v4439_v46 = vadd.f32 %v4328_v52, %v4304_v28  ;;  %v1216_v42 = vadd.s32 %v4382_v26, %v4379_v18 }
 0x16e   : > { %v1383_v34 = vsub.s32 32, %v1382_v25  ;;  %v4427_v35 = vsub.s32 %v1220_v49, %v1223_v9  ;;  %v1324_v14 = vadd.s32 %v1323_v13, %v1319_v32  ;;  %v1472_v47 = vand.u32 2147483647, %v4336_v58 }
 0x16f   : > { %v4447_v20 = vadd.f32 %v4334_v56, %v4306_v30  ;;  %v4449_v48 = vshrl.u32 %v1380_v22, 5  ;;  %v4452_v50 = vshll.u32 %v1376_v3, 8  ;;  %v1476_v26 = vshrl.u32 %v1475_v38, 23 }
 0x170   : > { %v1226_v12 = vsub.s32 0, %v4427_v35  ;;  %v1325_v40 = vadd.s32 536870912, %v1324_v14  ;;  %v1386_v49 = vshrl.u32 %v4033_v24, %v1383_v34  ;;  %v1389_v51 = vshrl.u32 %v4034_v29, %v1383_v34 }
 0x171   : > { %v1392_v18 = vshrl.u32 %v4035_v7, %v1383_v34  ;;  %v4459_v53 = vsel %vm1162_vm15, %v1246_v45, %v1222_v19  ;;  %v1385_v57 = vshll.u32 %v4032_v17, %v1382_v25  ;;  %v1395_v60 = vshrl.u32 %v4036_v21, %v1383_v34 }
 0x172   : > { %v3464_v52 = vmin.u32 %v1226_v12, %v4427_v35  ;;  %v1326_v56 = vshrl.u32 %v1325_v40, 30  ;;  %v1388_v62 = vshll.u32 %v4033_v24, %v1382_v25  ;;  %v1391_v63 = vshll.u32 %v4034_v29, %v1382_v25 }
 0x173   : > { %v1398_v0 = vshrl.u32 %v4037_v33, %v1383_v34  ;;  %v4467_v6 = vadd.s32 %v4408_v4, %v4415_v16  ;;  %v1387_v5 = vor.u32 %v1386_v49, %v1385_v57  ;;  %v1394_v19 = vshll.u32 %v4035_v7, %v1382_v25 }
 0x174   : > { %v1228_v61 = vclz %v3464_v52  ;;  %v1327_v11 = vshll.u32 %v1326_v56, 30  ;;  %v1390_v22 = vor.u32 %v1389_v51, %v1388_v62  ;;  %v1393_v9 = vor.u32 %v1392_v18, %v1391_v63 }
 0x175   : > { %v1397_v31 = vshll.u32 %v4036_v21, %v1382_v25  ;;  %v1249_v32 = vsel %vm4433_vm0, 0, %v4459_v53  ;;  %v1384_v4 = vshrl.u32 %v4032_v17, %v1383_v34  ;;  %v1396_v16 = vor.u32 %v1395_v60, %v1394_v19 }
 0x176   : > { %v3465_v23 = vadd.s32 4294967294, %v1228_v61  ;;  %v4475_v3 = vsub.s32 %v1324_v14, %v1327_v11  ;;  %v1350_v13 = vsub.s32 4, %v1326_v56  ;;  %vm1400_vm3 = vcmp.lt.s32.totalorder %v4449_v48, 1 }
 0x177   : > { %v1399_v38 = vor.u32 %v1398_v0, %v1397_v31  ;;  %vm1402_vm4 = vcmp.lt.s32.totalorder %v4449_v48, 3  ;;  %vm1403_vm5 = vcmp.lt.s32.totalorder %v4449_v48, 4  ;;  %vm4484_vm6 = vcmp.le.f32.partialorder %v1264_v44, 0.7853982 }
 0x178   : > { %vm3466_vm2 = vcmp.lt.s32.totalorder %v3465_v23, 0  ;;  %v1330_v12 = vsub.s32 0, %v4475_v3  ;;  %v1405_v34 = vsel %vm1403_vm5, %v1393_v9, 2102212464  ;;  %v1408_v49 = vsel %vm1400_vm3, %v1387_v5, %v1390_v22 }
 0x179   : > { %v1231_v45 = vsel %vm3466_vm2, 0, %v3465_v23  ;;  %v1409_v18 = vsel %vm1403_vm5, %v1396_v16, 920167782  ;;  %v1412_v57 = vsel %vm1400_vm3, %v1390_v22, %v1393_v9  ;;  %v1413_v62 = vsel %vm1403_vm5, %v1399_v38, 1326507024 }
 0x17a   : > { %v1232_v25 = vsub.s32 32, %v1231_v45  ;;  %v1236_v40 = vsub.s32 4294967266, %v1231_v45  ;;  %v1233_v52 = vshll.u32 %v4427_v35, %v1231_v45  ;;  %v3468_v51 = vmin.u32 %v1330_v12, %v4475_v3 }
 0x17b   : > { %v1410_v44 = vsel %vm1402_vm4, %v1393_v9, %v1409_v18  ;;  %vm1401_vm7 = vcmp.lt.s32.totalorder %v4449_v48, 2  ;;  %v1404_v0 = vsel %vm1400_vm3, %v1384_v4, %v1387_v5  ;;  %v1406_v35 = vsel %vm1402_vm4, %v1390_v22, %v1405_v34 }
 0x17c   : > { %v1234_v60 = vshrl.u32 %v1216_v42, %v1232_v25  ;;  %v1237_v61 = vadd.s32 127, %v1236_v40  ;;  %v1332_v63 = vclz %v3468_v51  ;;  %v1411_v23 = vsel %vm1401_vm7, %v1408_v49, %v1410_v44  ;;  %v4521_v51 = vpop.f32.mrb[10].mxu0 }
 0x17d   : > { %v1414_v42 = vsel %vm1402_vm4, %v1396_v16, %v1413_v62  ;;  %v4504_v9 = vmul.u32.u64.low %v4452_v50, %v1411_v23  ;;  %v4505_v38 = vmul.u32.u64.high %v4452_v50, %v1411_v23, %v4504_v9  ;;  %v1351_v25 = vsel %vm1266_vm1, %v1350_v13, %v1326_v56 }
 0x17e   : > { %v1235_v11 = vor.u32 %v1234_v60, %v1233_v52  ;;  %v1238_v19 = vshll.u32 %v1237_v61, 23  ;;  %v3469_v31 = vadd.s32 4294967294, %v1332_v63  ;;  %v1415_v45 = vsel %vm1401_vm7, %v1412_v57, %v1414_v42 }
 0x17f   : > { %v4510_v5 = vmul.u32.u64.low %v4452_v50, %v1415_v45  ;;  %v4511_v4 = vmul.u32.u64.high %v4452_v50, %v1415_v45, %v4510_v5  ;;  %v1407_v40 = vsel %vm1401_vm7, %v1404_v0, %v1406_v35  ;;  %v3475_v34 = vadd.s32 4294967169, %v1476_v26  ;;  %v4526_v26 = vpop.f32.mrb[9].mxu1 }
 0x180   : > { %v1239_v12 = vor.u32 4788187, %v1238_v19  ;;  %v1242_v22 = vcvt.s32.f32 %v1235_v11  ;;  %vm3470_vm8 = vcmp.lt.s32.totalorder %v3469_v31, 0  ;;  %v4515_v49 = vadd.f32 %v4439_v46, %v4314_v39 }
 0x181   : > { %v1335_v16 = vsel %vm3470_vm8, 0, %v3469_v31  ;;  %v4519_v52 = vadd.f32 %v4447_v20, %v4318_v43  ;;  %v1353_v18 = vsel %vm4484_vm6, 0, %v1351_v25  ;;  %v1426_v57 = vadd.s32 1, %v4505_v38 }
 0x182   : > { %v1240_v48 = vand.u32 2147483647, %v1239_v12  ;;  %v1336_v56 = vsub.s32 32, %v1335_v16  ;;  %v1340_v13 = vsub.s32 4294967266, %v1335_v16  ;;  %v1423_v61 = vmul.u32 %v4452_v50, %v1407_v40 }
 0x183   : > { %vm1425_vm9 = vc.u32 %v4511_v4, %v4504_v9  ;;  %v1482_v39 = vadd.s32 1, %v3475_v34  ;;  %v1337_v43 = vshll.u32 %v4475_v3, %v1335_v16  ;;  %v1253_v63 = vadd.s32 3, %v1249_v32 }
 0x184   : > { %v1243_v60 = vmul.f32 %v1242_v22, %v1240_v48  ;;  %v1338_v46 = vshrl.u32 %v4467_v6, %v1336_v56  ;;  %v1341_v20 = vadd.s32 127, %v1340_v13  ;;  %v1427_v44 = vsel %vm1425_vm9, %v1426_v57, %v4505_v38 }
 0x185   : > { %v1428_v0 = vadd.s32 %v1427_v44, %v1423_v61  ;;  %vm1483_vm10 = vcmp.gt.s32.totalorder %v1482_v39, 0  ;;  %v1479_v11 = vand.u32 8388607, %v1472_v47  ;;  %v1357_v3 = vadd.s32 3, %v1353_v18 }
 0x186   : > { %v1244_v62 = vxor.u32 2147483648, %v1243_v60  ;;  %v1339_v35 = vor.u32 %v1338_v46, %v1337_v43  ;;  %v1342_v50 = vshll.u32 %v1341_v20, 23  ;;  %v1484_v19 = vsel %vm1483_vm10, %v1482_v39, 0 }
 0x187   : > { %v1429_v23 = vadd.s32 536870912, %v1428_v0  ;;  %v1486_v42 = vand.u32 31, %v1484_v19  ;;  %v4544_v32 = vand.u32 3, %v1253_v63  ;;  %vm1370_vm11 = vcmp.lt.s32.totalorder %v4330_v54, 0 }
 0x188   : > { %v1245_v6 = vsel %vm1162_vm15, %v1244_v62, %v1243_v60  ;;  %v1343_v53 = vor.u32 4788187, %v1342_v50  ;;  %v1346_v25 = vcvt.s32.f32 %v1339_v35  ;;  %v4547_v5 = vand.u32 3, %v1357_v3 }
 0x189   : > { %v1248_v31 = vsel %vm4433_vm0, %v4310_v36, %v1245_v6  ;;  %v1430_v45 = vshrl.u32 %v1429_v23, 30  ;;  %v1487_v38 = vsub.s32 32, %v1486_v42  ;;  %v1480_v40 = vor.u32 8388608, %v1479_v11 }
 0x18a   : > { %3859 = vcosq.f32 %v1248_v31  ;;  %v1344_v12 = vand.u32 2147483647, %v1343_v53  ;;  %v4551_v41 = vadd.s32 %v4504_v9, %v4511_v4  ;;  %vm1259_vm12 = vcmp.eq.s32.totalorder %v4544_v32, 2 }
 0x18b   : > { %3861 = vsinq.f32 %v1248_v31  ;;  %v1431_v22 = vshll.u32 %v1430_v45, 30  ;;  %v1490_v34 = vshrl.u32 %v4033_v24, %v1487_v38  ;;  %v1493_v16 = vshrl.u32 %v4034_v29, %v1487_v38 }
 0x18c   : > { %v1347_v48 = vmul.f32 %v1346_v25, %v1344_v12  ;;  %v1496_v56 = vshrl.u32 %v4035_v7, %v1487_v38  ;;  %v4558_v18 = vshrl.u32 %v1484_v19, 5  ;;  %v1489_v57 = vshll.u32 %v4032_v17, %v1486_v42 }
 0x18d   : > { %v4556_v13 = vsub.s32 %v1428_v0, %v1431_v22  ;;  %v1499_v60 = vshrl.u32 %v4036_v21, %v1487_v38  ;;  %vm1256_vm13 = vcmp.eq.s32.totalorder %v4544_v32, 0  ;;  %v1454_v9 = vsub.s32 4, %v1430_v45 }
 0x18e   : > { %v1348_v61 = vxor.u32 2147483648, %v1347_v48  ;;  %v1492_v4 = vshll.u32 %v4033_v24, %v1486_v42  ;;  %v1495_v39 = vshll.u32 %v4034_v29, %v1486_v42  ;;  %vm1255_vm14 = vcmp.lt.s32.totalorder %v4544_v32, 2 }
 0x18f   : > { %v1434_v43 = vsub.s32 0, %v4556_v13  ;;  %v1491_v46 = vor.u32 %v1490_v34, %v1489_v57  ;;  %v1498_v20 = vshll.u32 %v4035_v7, %v1486_v42  ;;  %v4568_v44 = vshll.u32 %v1480_v40, 8 }
 0x190   : > { %vm1252_vm15 = vweird.f32 %v4310_v36  ;;  %v1349_v62 = vsel %vm1266_vm1, %v1348_v61, %v1347_v48  ;;  %v1494_v63 = vor.u32 %v1493_v16, %v1492_v4  ;;  %v1497_v0 = vor.u32 %v1496_v56, %v1495_v39 }
 0x191   : > { %v1502_v35 = vshrl.u32 %v4037_v33, %v1487_v38  ;;  %v1352_v50 = vsel %vm4484_vm6, %v4312_v37, %v1349_v62  ;;  %v3472_v11 = vmin.u32 %v1434_v43, %v4556_v13  ;;  %v1500_v19 = vor.u32 %v1499_v60, %v1498_v20 }
 0x192   : > { %v1501_v6 = vshll.u32 %v4036_v21, %v1486_v42  ;;  %3863 = vcosq.f32 %v1352_v50  ;;  %v4582_v3 = vsel %vm1370_vm11, %v1454_v9, %v1430_v45  ;;  %v1488_v23 = vshrl.u32 %v4032_v17, %v1487_v38 }
 0x193   : > { %vm1504_vm0 = vcmp.lt.s32.totalorder %v4558_v18, 1  ;;  %3865 = vsinq.f32 %v1352_v50  ;;  %vm4590_vm1 = vcmp.le.f32.partialorder %v1368_v15, 0.7853982  ;;  %v1436_v42 = vclz %v3472_v11 }
 0x194   : > { %v3860_v31 = vpop.eup %3859  ;;  %v1503_v53 = vor.u32 %v1502_v35, %v1501_v6  ;;  %vm1505_vm2 = vcmp.lt.s32.totalorder %v4558_v18, 2  ;;  %vm1506_vm3 = vcmp.lt.s32.totalorder %v4558_v18, 3  ;;  %vm1507_vm4 = vcmp.lt.s32.totalorder %v4558_v18, 4 }
 0x195   : > { %v3862_v45 = vpop.eup %3861  ;;  %v1260_v12 = vxor.u32 2147483648, %v3860_v31  ;;  %v1512_v38 = vsel %vm1504_vm0, %v1491_v46, %v1494_v63  ;;  %v3473_v22 = vadd.s32 4294967294, %v1436_v42  ;;  %v1509_v40 = vsel %vm1507_vm4, %v1497_v0, 2102212464 }
 0x196   : > { %v1257_v25 = vxor.u32 2147483648, %v3862_v45  ;;  %v1513_v15 = vsel %vm1507_vm4, %v1500_v19, 920167782  ;;  %v1508_v48 = vsel %vm1504_vm0, %v1488_v23, %v1491_v46  ;;  %v1516_v56 = vsel %vm1504_vm0, %v1494_v63, %v1497_v0  ;;  %v4617_v46 = vpop.f32.mrb[11].mxu0  ;;  %v4640_v23 = vpop.f32.mrb[10].mxu1 }
 0x197   : > { %v1261_v34 = vsel %vm1259_vm12, %v1260_v12, %v3862_v45  ;;  %v1514_v16 = vsel %vm1506_vm3, %v1497_v0, %v1513_v15  ;;  %vm3474_vm5 = vcmp.lt.s32.totalorder %v3473_v22, 0  ;;  %v1517_v61 = vsel %vm1507_vm4, %v1503_v53, 1326507024 }
 0x198   : > { %v1258_v57 = vsel %vm1256_vm13, %v3860_v31, %v1257_v25  ;;  %v1515_v60 = vsel %vm1505_vm2, %v1512_v38, %v1514_v16  ;;  %vm3241_vm6 = vcmask 474112   ;;  %v1439_v4 = vsel %vm3474_vm5, 0, %v3473_v22 }
 0x199   : > { %v1262_v9 = vsel %vm1255_vm14, %v1258_v57, %v1261_v34  ;;  %v1510_v39 = vsel %vm1506_vm3, %v1494_v63, %v1509_v40  ;;  %v1518_v43 = vsel %vm1506_vm3, %v1500_v19, %v1517_v61  ;;  %vm1356_vm7 = vweird.f32 %v4312_v37 }
 0x19a   : > { %v1263_v20 = vsel %vm1252_vm15, nan, %v1262_v9  ;;  %v1440_v62 = vsub.s32 32, %v1439_v4  ;;  %v1441_v0 = vshll.u32 %v4556_v13, %v1439_v4  ;;  %v1444_v32 = vsub.s32 4294967266, %v1439_v4 }
 0x19b   : > { %3240 = vst [vmem:[%s4624_s6] sm:$0xff] %v1263_v20  ;;  %v1519_v63 = vsel %vm1505_vm2, %v1516_v56, %v1518_v43  ;;  %v4630_v35 = vmul.u32.u64.low %v4568_v44, %v1515_v60  ;;  %v4631_v50 = vmul.u32.u64.high %v4568_v44, %v1515_v60, %v4630_v35  ;;  %v1579_v36 = vand.u32 2139095040, %v4515_v49 }
 0x19c   : > { %v1442_v11 = vshrl.u32 %v4551_v41, %v1440_v62  ;;  %v1445_v19 = vadd.s32 127, %v1444_v32  ;;  %v4637_v13 = vmul.u32.u64.low %v4568_v44, %v1519_v63  ;;  %v4638_v6 = vmul.u32.u64.high %v4568_v44, %v1519_v63, %v4637_v13  ;;  %v3864_v31 = vpop.eup %3863 }
 0x19d   : > { %vm1359_vm8 = vcmp.lt.s32.totalorder %v4547_v5, 2  ;;  %vm1363_vm9 = vcmp.eq.s32.totalorder %v4547_v5, 2  ;;  %v1457_v42 = vsel %vm4590_vm1, 0, %v4582_v3  ;;  %v1580_v53 = vshrl.u32 %v1579_v36, 23  ;;  %v3866_v45 = vpop.eup %3865 }
 0x19e   : > { %v1364_v12 = vxor.u32 2147483648, %v3864_v31  ;;  %v1443_v41 = vor.u32 %v1442_v11, %v1441_v0  ;;  %v1446_v38 = vshll.u32 %v1445_v19, 23  ;;  %v1511_v25 = vsel %vm1505_vm2, %v1508_v48, %v1510_v39 }
 0x19f   : > { %v1361_v22 = vxor.u32 2147483648, %v3866_v45  ;;  %v1530_v40 = vadd.s32 1, %v4631_v50  ;;  %v1576_v15 = vand.u32 2147483647, %v4515_v49  ;;  %v3479_v34 = vadd.s32 4294967169, %v1580_v53 }
 0x1a0   : > { %vm1360_vm10 = vcmp.eq.s32.totalorder %v4547_v5, 0  ;;  %v1365_v16 = vsel %vm1363_vm9, %v1364_v12, %v3866_v45  ;;  %v1447_v56 = vor.u32 4788187, %v1446_v38  ;;  %v1461_v3 = vadd.s32 3, %v1457_v42 }
 0x1a1   : > { %v1362_v57 = vsel %vm1360_vm10, %v3864_v31, %v1361_v22  ;;  %v1527_v60 = vmul.u32 %v4568_v44, %v1511_v25  ;;  %vm1529_vm12 = vc.u32 %v4638_v6, %v4630_v35  ;;  %v1586_v18 = vadd.s32 1, %v3479_v34 }
 0x1a2   : > { %v1366_v48 = vsel %vm1359_vm8, %v1362_v57, %v1365_v16  ;;  %v1448_v61 = vand.u32 2147483647, %v1447_v56  ;;  %v1450_v9 = vcvt.s32.f32 %v1443_v41  ;;  %v1531_v4 = vsel %vm1529_vm12, %v1530_v40, %v4631_v50 }
 0x1a3   : > { %v1367_v39 = vsel %vm1356_vm7, nan, %v1366_v48  ;;  %v1532_v43 = vadd.s32 %v1531_v4, %v1527_v60  ;;  %v1583_v20 = vand.u32 8388607, %v1576_v15  ;;  %vm1587_vm13 = vcmp.gt.s32.totalorder %v1586_v18, 0 }
 0x1a4   : > { %3242 = vst.msk [vmem:[%s4624_s6 + $0x8] sm:$0xff] %vm3241_vm6, %v1367_v39  ;;  %v1451_v44 = vmul.f32 %v1450_v9, %v1448_v61  ;;  %v1588_v62 = vsel %vm1587_vm13, %v1586_v18, 0  ;;  %v4664_v63 = vand.u32 3, %v1461_v3  ;;  %v1680_v37 = vand.u32 2147483647, %v4519_v52 }
 0x1a5   : > { %v1533_v0 = vadd.s32 536870912, %v1532_v43  ;;  %v1590_v32 = vand.u32 31, %v1588_v62  ;;  %v1584_v50 = vor.u32 8388608, %v1583_v20  ;;  %v4671_v13 = vshrl.u32 %v1588_v62, 5 }
 0x1a6   : > { %v1452_v5 = vxor.u32 2147483648, %v1451_v44  ;;  %v1683_v42 = vand.u32 2139095040, %v4519_v52  ;;  %v4690_v16 = vadd.s32 %v4630_v35, %v4638_v6  ;;  %vm1467_vm14 = vcmp.eq.s32.totalorder %v4664_v63, 2 }
 0x1a7   : > { %v4666_v36 = vshrl.u32 %v1533_v0, 30  ;;  %v1591_v11 = vsub.s32 32, %v1590_v32  ;;  %v1593_v31 = vshll.u32 %v4032_v17, %v1590_v32  ;;  %v1596_v12 = vshll.u32 %v4033_v24, %v1590_v32 }
 0x1a8   : > { %v1453_v19 = vsel %vm1370_vm11, %v1452_v5, %v1451_v44  ;;  %v1599_v41 = vshll.u32 %v4034_v29, %v1590_v32  ;;  %v1602_v34 = vshll.u32 %v4035_v7, %v1590_v32  ;;  %v1605_v57 = vshll.u32 %v4036_v21, %v1590_v32 }
 0x1a9   : > { %v1456_v53 = vsel %vm4590_vm1, %v4330_v54, %v1453_v19  ;;  %v1535_v45 = vshll.u32 %v4666_v36, 30  ;;  %v1594_v38 = vshrl.u32 %v4033_v24, %v1591_v11  ;;  %v1597_v25 = vshrl.u32 %v4034_v29, %v1591_v11 }
 0x1aa   : > { %3867 = vcosq.f32 %v1456_v53  ;;  %v1600_v22 = vshrl.u32 %v4035_v7, %v1591_v11  ;;  %v1603_v14 = vshrl.u32 %v4036_v21, %v1591_v11  ;;  %vm1474_vm11 = vcmp.lt.s32.totalorder %v4336_v58, 0 }
 0x1ab   : > { %3869 = vsinq.f32 %v1456_v53  ;;  %v4684_v40 = vsub.s32 %v1532_v43, %v1535_v45  ;;  %v1595_v56 = vor.u32 %v1594_v38, %v1593_v31  ;;  %v1598_v3 = vor.u32 %v1597_v25, %v1596_v12 }
 0x1ac   : > { %v1601_v18 = vor.u32 %v1600_v22, %v1599_v41  ;;  %v1604_v48 = vor.u32 %v1603_v14, %v1602_v34  ;;  %v1606_v61 = vshrl.u32 %v4037_v33, %v1591_v11  ;;  %v4697_v9 = vshll.u32 %v1584_v50, 8  ;;  %v4725_v41 = vpop.f32.mrb[11].mxu1 }
 0x1ad   : > { %v1538_v60 = vsub.s32 0, %v4684_v40  ;;  %v1684_v4 = vshrl.u32 %v1683_v42, 23  ;;  %v4701_v35 = vand.u32 8388607, %v1680_v37  ;;  %v3573_v6 = vadd.f32 %v4341_v1, %v4304_v28  ;;  %v4719_v42 = vpop.f32.mrb[12].mxu0 }
 0x1ae   : > { %vm1464_vm15 = vcmp.eq.s32.totalorder %v4664_v63, 0  ;;  %v1607_v43 = vor.u32 %v1606_v61, %v1605_v57  ;;  %vm1608_vm0 = vcmp.lt.s32.totalorder %v4671_v13, 1  ;;  %vm1611_vm1 = vcmp.lt.s32.totalorder %v4671_v13, 4 }
 0x1af   : > { %v3476_v39 = vmin.u32 %v1538_v60, %v4684_v40  ;;  %vm1463_vm2 = vcmp.lt.s32.totalorder %v4664_v63, 2  ;;  %v1558_v20 = vsub.s32 4, %v4666_v36  ;;  %v1592_v44 = vshrl.u32 %v4032_v17, %v1591_v11 }
 0x1b0   : > { %v1616_v62 = vsel %vm1608_vm0, %v1595_v56, %v1598_v3  ;;  %v1617_v0 = vsel %vm1611_vm1, %v1604_v48, 920167782  ;;  %vm1460_vm3 = vweird.f32 %v4330_v54  ;;  %vm1610_vm4 = vcmp.lt.s32.totalorder %v4671_v13, 3 }
 0x1b1   : > { %v1540_v1 = vclz %v3476_v39  ;;  %v1613_v32 = vsel %vm1611_vm1, %v1601_v18, 2102212464  ;;  %v1620_v5 = vsel %vm1608_vm0, %v1598_v3, %v1601_v18  ;;  %vm1609_vm5 = vcmp.lt.s32.totalorder %v4671_v13, 2 }
 0x1b2   : > { %v1618_v50 = vsel %vm1610_vm4, %v1601_v18, %v1617_v0  ;;  %v1621_v19 = vsel %vm1611_vm1, %v1607_v43, 1326507024  ;;  %v3483_v31 = vadd.s32 4294967169, %v1684_v4  ;;  %v1612_v53 = vsel %vm1608_vm0, %v1592_v44, %v1595_v56 }
 0x1b3   : > { %v3477_v11 = vadd.s32 4294967294, %v1540_v1  ;;  %v1619_v45 = vsel %vm1609_vm5, %v1616_v62, %v1618_v50  ;;  %v1622_v12 = vsel %vm1610_vm4, %v1604_v48, %v1621_v19  ;;  %v1614_v25 = vsel %vm1610_vm4, %v1598_v3, %v1613_v32 }
 0x1b4   : > { %v3868_v38 = vpop.eup %3867  ;;  %v1623_v22 = vsel %vm1609_vm5, %v1620_v5, %v1622_v12  ;;  %v4730_v34 = vmul.u32.u64.low %v4697_v9, %v1619_v45  ;;  %v4731_v14 = vmul.u32.u64.high %v4697_v9, %v1619_v45, %v4730_v34  ;;  %v1559_v3 = vsel %vm1474_vm11, %v1558_v20, %v4666_v36 }
 0x1b5   : > { %v3870_v57 = vpop.eup %3869  ;;  %v1468_v60 = vxor.u32 2147483648, %v3868_v38  ;;  %vm3478_vm7 = vcmp.lt.s32.totalorder %v3477_v11, 0  ;;  %v4735_v56 = vmul.u32.u64.low %v4697_v9, %v1623_v22  ;;  %v4736_v18 = vmul.u32.u64.high %v4697_v9, %v1623_v22, %v4735_v56 }
 0x1b6   : > { %v1465_v48 = vxor.u32 2147483648, %v3870_v57  ;;  %v1543_v61 = vsel %vm3478_vm7, 0, %v3477_v11  ;;  %v1690_v4 = vadd.s32 1, %v3483_v31  ;;  %v1615_v62 = vsel %vm1609_vm5, %v1612_v53, %v1614_v25 }
 0x1b7   : > { %v1469_v39 = vsel %vm1467_vm14, %v1468_v60, %v3870_v57  ;;  %v1544_v43 = vsub.s32 32, %v1543_v61  ;;  %v1548_v44 = vsub.s32 4294967266, %v1543_v61  ;;  %v1634_v1 = vadd.s32 1, %v4731_v14 }
 0x1b8   : > { %v1466_v0 = vsel %vm1464_vm15, %v3868_v38, %v1465_v48  ;;  %vm1691_vm8 = vcmp.gt.s32.totalorder %v1690_v4, 0  ;;  %v4749_v32 = vadd.f32 %v3573_v6, %v4332_v55  ;;  %v1545_v20 = vshll.u32 %v4684_v40, %v1543_v61  ;;  %v4803_v40 = vpop.f32.mrb[13].mxu0 }
 0x1b9   : > { %v1470_v36 = vsel %vm1463_vm2, %v1466_v0, %v1469_v39  ;;  %v1546_v5 = vshrl.u32 %v4690_v16, %v1544_v43  ;;  %v1549_v50 = vadd.s32 127, %v1548_v44  ;;  %v1631_v19 = vmul.u32 %v4697_v9, %v1615_v62 }
 0x1ba   : > { %v1471_v13 = vsel %vm1460_vm3, nan, %v1470_v36  ;;  %vm1633_vm9 = vc.u32 %v4736_v18, %v4730_v34  ;;  %v1692_v31 = vsel %vm1691_vm8, %v1690_v4, 0  ;;  %vm4764_vm10 = vcmp.le.f32.partialorder %v1472_v47, 0.7853982 }
 0x1bb   : > { %3243 = vst [vmem:[%s4624_s6 + $0x10] sm:$0xff] %v1471_v13  ;;  %v1547_v55 = vor.u32 %v1546_v5, %v1545_v20  ;;  %v1550_v6 = vshll.u32 %v1549_v50, 23  ;;  %v1635_v63 = vsel %vm1633_vm9, %v1634_v1, %v4731_v14  ;;  %v1694_v54 = vand.u32 31, %v1692_v31 }
 0x1bc   : > { %v1636_v16 = vadd.s32 %v1635_v63, %v1631_v19  ;;  %v1561_v9 = vsel %vm4764_vm10, 0, %v1559_v3  ;;  %v1688_v53 = vor.u32 8388608, %v4701_v35  ;;  %v4773_v45 = vadd.f32 %v4345_v8, %v4306_v30 }
 0x1bd   : > { %v1551_v11 = vor.u32 4788187, %v1550_v6  ;;  %v1554_v12 = vcvt.s32.f32 %v1547_v55  ;;  %v1693_v25 = vshrl.u32 %v1692_v31, 5  ;;  %v1695_v22 = vsub.s32 32, %v1694_v54 }
 0x1be   : > { %v1637_v38 = vadd.s32 536870912, %v1636_v16  ;;  %v1697_v14 = vshll.u32 %v4032_v17, %v1694_v54  ;;  %v1700_v57 = vshll.u32 %v4033_v24, %v1694_v54  ;;  %v1703_v60 = vshll.u32 %v4034_v29, %v1694_v54 }
 0x1bf   : > { %v1552_v47 = vand.u32 2147483647, %v1551_v11  ;;  %v1698_v48 = vshrl.u32 %v4033_v24, %v1695_v22  ;;  %v1701_v35 = vshrl.u32 %v4034_v29, %v1695_v22  ;;  %v1706_v61 = vshll.u32 %v4035_v7, %v1694_v54 }
 0x1c0   : > { %v1638_v56 = vshrl.u32 %v1637_v38, 30  ;;  %v1704_v3 = vshrl.u32 %v4035_v7, %v1695_v22  ;;  %v1707_v4 = vshrl.u32 %v4036_v21, %v1695_v22  ;;  %v1710_v39 = vshrl.u32 %v4037_v33, %v1695_v22 }
 0x1c1   : > { %v1555_v8 = vmul.f32 %v1554_v12, %v1552_v47  ;;  %v1565_v43 = vadd.s32 3, %v1561_v9  ;;  %v1699_v62 = vor.u32 %v1698_v48, %v1697_v14  ;;  %v1709_v0 = vshll.u32 %v4036_v21, %v1694_v54 }
 0x1c2   : > { %v1639_v44 = vshll.u32 %v1638_v56, 30  ;;  %vm1578_vm12 = vcmp.lt.s32.totalorder %v4515_v49, 0  ;;  %v1702_v36 = vor.u32 %v1701_v35, %v1700_v57  ;;  %v1705_v20 = vor.u32 %v1704_v3, %v1703_v60 }
 0x1c3   : > { %v1556_v1 = vxor.u32 2147483648, %v1555_v8  ;;  %v1708_v5 = vor.u32 %v1707_v4, %v1706_v61  ;;  %vm1712_vm13 = vcmp.lt.s32.totalorder %v1693_v25, 1  ;;  %vm1713_vm14 = vcmp.lt.s32.totalorder %v1693_v25, 2 }
 0x1c4   : > { %v4786_v50 = vsub.s32 %v1636_v16, %v1639_v44  ;;  %v4788_v13 = vshll.u32 %v1688_v53, 8  ;;  %v1696_v31 = vshrl.u32 %v4032_v17, %v1695_v22  ;;  %v1711_v55 = vor.u32 %v1710_v39, %v1709_v0  ;;  %v4823_v44 = vpop.f32.mrb[12].mxu1 }
 0x1c5   : > { %v1557_v19 = vsel %vm1474_vm11, %v1556_v1, %v1555_v8  ;;  %vm1715_vm15 = vcmp.lt.s32.totalorder %v1693_v25, 4  ;;  %v1662_v54 = vsub.s32 4, %v1638_v56  ;;  %vm1714_vm0 = vcmp.lt.s32.totalorder %v1693_v25, 3 }
 0x1c6   : > { %v1560_v6 = vsel %vm4764_vm10, %v4336_v58, %v1557_v19  ;;  %v1642_v63 = vsub.s32 0, %v4786_v50  ;;  %v1717_v16 = vsel %vm1715_vm15, %v1705_v20, 2102212464  ;;  %v1720_v11 = vsel %vm1712_vm13, %v1699_v62, %v1702_v36 }
 0x1c7   : > { %3871 = vcosq.f32 %v1560_v6  ;;  %v1721_v9 = vsel %vm1715_vm15, %v1708_v5, 920167782  ;;  %v1716_v12 = vsel %vm1712_vm13, %v1696_v31, %v1699_v62  ;;  %v1718_v22 = vsel %vm1714_vm0, %v1702_v36, %v1717_v16 }
 0x1c8   : > { %3873 = vsinq.f32 %v1560_v6  ;;  %v3480_v53 = vmin.u32 %v1642_v63, %v4786_v50  ;;  %v1722_v38 = vsel %vm1714_vm0, %v1705_v20, %v1721_v9  ;;  %v1724_v14 = vsel %vm1712_vm13, %v1702_v36, %v1705_v20 }
 0x1c9   : > { %v1723_v47 = vsel %vm1713_vm14, %v1720_v11, %v1722_v38  ;;  %v1725_v57 = vsel %vm1715_vm15, %v1711_v55, 1326507024  ;;  %v1566_v60 = vand.u32 3, %v1565_v43  ;;  %vm4811_vm11 = vcmp.le.f32.partialorder %v1576_v15, 0.7853982 }
 0x1ca   : > { %v1644_v35 = vclz %v3480_v53  ;;  %v1784_v61 = vand.u32 2147483647, %v4749_v32  ;;  %v1726_v8 = vsel %vm1714_vm0, %v1708_v5, %v1725_v57  ;;  %v1787_v39 = vand.u32 2139095040, %v4749_v32 }
 0x1cb   : > { %v4818_v3 = vmul.u32.u64.low %v4788_v13, %v1723_v47  ;;  %v4819_v4 = vmul.u32.u64.high %v4788_v13, %v1723_v47, %v4818_v3  ;;  %v1663_v15 = vsel %vm1578_vm12, %v1662_v54, %v1638_v56  ;;  %v1719_v62 = vsel %vm1713_vm14, %v1716_v12, %v1718_v22 }
 0x1cc   : > { %v3481_v43 = vadd.s32 4294967294, %v1644_v35  ;;  %v1727_v0 = vsel %vm1713_vm14, %v1724_v14, %v1726_v8  ;;  %v1788_v20 = vshrl.u32 %v1787_v39, 23  ;;  %v4835_v5 = vadd.f32 %v4773_v45, %v4338_v59 }
 0x1cd   : > { %v4830_v1 = vmul.u32.u64.low %v4788_v13, %v1727_v0  ;;  %v4831_v36 = vmul.u32.u64.high %v4788_v13, %v1727_v0, %v4830_v1  ;;  %vm1567_vm1 = vcmp.lt.s32.totalorder %v1566_v60, 2  ;;  %vm1568_vm2 = vcmp.eq.s32.totalorder %v1566_v60, 0 }
 0x1ce   : > { %vm1571_vm3 = vcmp.eq.s32.totalorder %v1566_v60, 2  ;;  %vm3482_vm4 = vcmp.lt.s32.totalorder %v3481_v43, 0  ;;  %v1632_v56 = vadd.s32 %v4730_v34, %v4736_v18  ;;  %v1738_v25 = vadd.s32 1, %v4819_v4 }
 0x1cf   : > { %v1647_v19 = vsel %vm3482_vm4, 0, %v3481_v43  ;;  %v3487_v31 = vadd.s32 4294967169, %v1788_v20  ;;  %v1665_v63 = vsel %vm4811_vm11, 0, %v1663_v15  ;;  %v1735_v54 = vmul.u32 %v4788_v13, %v1719_v62 }
 0x1d0   : > { %v1648_v55 = vsub.s32 32, %v1647_v19  ;;  %v1652_v6 = vsub.s32 4294967266, %v1647_v19  ;;  %v1649_v45 = vshll.u32 %v4786_v50, %v1647_v19  ;;  %vm1737_vm5 = vc.u32 %v4831_v36, %v4818_v3 }
 0x1d1   : > { %v3872_v59 = vpop.eup %3871  ;;  %v1791_v34 = vand.u32 8388607, %v1784_v61  ;;  %v1794_v18 = vadd.s32 1, %v3487_v31  ;;  %v1739_v12 = vsel %vm1737_vm5, %v1738_v25, %v4819_v4  ;;  %v1669_v22 = vadd.s32 3, %v1665_v63 }
 0x1d2   : > { %v3874_v16 = vpop.eup %3873  ;;  %v1572_v11 = vxor.u32 2147483648, %v3872_v59  ;;  %v1650_v9 = vshrl.u32 %v1632_v56, %v1648_v55  ;;  %v1653_v53 = vadd.s32 127, %v1652_v6  ;;  %v1740_v47 = vadd.s32 %v1739_v12, %v1735_v54 }
 0x1d3   : > { %v1569_v38 = vxor.u32 2147483648, %v3874_v16  ;;  %vm1795_vm7 = vcmp.gt.s32.totalorder %v1794_v18, 0  ;;  %v1792_v39 = vor.u32 8388608, %v1791_v34  ;;  %vm1564_vm8 = vweird.f32 %v4336_v58 }
 0x1d4   : > { %v1573_v50 = vsel %vm1571_vm3, %v1572_v11, %v3874_v16  ;;  %v1651_v13 = vor.u32 %v1650_v9, %v1649_v45  ;;  %v1654_v14 = vshll.u32 %v1653_v53, 23  ;;  %v1796_v57 = vsel %vm1795_vm7, %v1794_v18, 0 }
 0x1d5   : > { %v1570_v35 = vsel %vm1568_vm2, %v3872_v59, %v1569_v38  ;;  %v1741_v8 = vadd.s32 536870912, %v1740_v47  ;;  %v1798_v43 = vand.u32 31, %v1796_v57  ;;  %v4853_v0 = vand.u32 3, %v1669_v22 }
 0x1d6   : > { %v1574_v15 = vsel %vm1567_vm1, %v1570_v35, %v1573_v50  ;;  %v1655_v4 = vor.u32 4788187, %v1654_v14  ;;  %v1658_v19 = vcvt.s32.f32 %v1651_v13  ;;  %v4861_v25 = vadd.f32 %v4421_v27, %v4304_v28 }
 0x1d7   : > { %v1575_v62 = vsel %vm1564_vm8, nan, %v1574_v15  ;;  %v4855_v1 = vshrl.u32 %v1741_v8, 30  ;;  %v1799_v20 = vsub.s32 32, %v1798_v43  ;;  %v4865_v58 = vadd.f32 %v4526_v26, %v4306_v30 }
 0x1d8   : > { %3244 = vst.msk [vmem:[%s4624_s6 + $0x18] sm:$0xff] %vm3241_vm6, %v1575_v62  ;;  %v1656_v56 = vand.u32 2147483647, %v1655_v4  ;;  %v1801_v31 = vshll.u32 %v4032_v17, %v1798_v43  ;;  %v4870_v6 = vshll.u32 %v1792_v39, 8  ;;  %v1736_v45 = vadd.s32 %v4818_v3, %v4831_v36 }
 0x1d9   : > { %v1743_v60 = vshll.u32 %v4855_v1, 30  ;;  %v1802_v55 = vshrl.u32 %v4033_v24, %v1799_v20  ;;  %v1805_v54 = vshrl.u32 %v4034_v29, %v1799_v20  ;;  %v1808_v59 = vshrl.u32 %v4035_v7, %v1799_v20 }
 0x1da   : > { %v1659_v63 = vmul.f32 %v1658_v19, %v1656_v56  ;;  %v1811_v27 = vshrl.u32 %v4036_v21, %v1799_v20  ;;  %v1797_v34 = vshrl.u32 %v1796_v57, 5  ;;  %v1804_v18 = vshll.u32 %v4033_v24, %v1798_v43 }
 0x1db   : > { %v4877_v26 = vsub.s32 %v1740_v47, %v1743_v60  ;;  %v1803_v11 = vor.u32 %v1802_v55, %v1801_v31  ;;  %v1807_v9 = vshll.u32 %v4034_v29, %v1798_v43  ;;  %v1810_v53 = vshll.u32 %v4035_v7, %v1798_v43 }
 0x1dc   : > { %v1660_v16 = vxor.u32 2147483648, %v1659_v63  ;;  %vm1682_vm9 = vcmp.lt.s32.totalorder %v4519_v52, 0  ;;  %v1806_v38 = vor.u32 %v1805_v54, %v1804_v18  ;;  %v1813_v22 = vshll.u32 %v4036_v21, %v1798_v43 }
 0x1dd   : > { %v1746_v12 = vsub.s32 0, %v4877_v26  ;;  %v1814_v3 = vshrl.u32 %v4037_v33, %v1799_v20  ;;  %v1809_v47 = vor.u32 %v1808_v59, %v1807_v9  ;;  %v1812_v50 = vor.u32 %v1811_v27, %v1810_v53 }
 0x1de   : > { %v1661_v36 = vsel %vm1578_vm12, %v1660_v16, %v1659_v63  ;;  %v1891_v13 = vand.u32 2139095040, %v4835_v5  ;;  %v1766_v35 = vsub.s32 4, %v4855_v1  ;;  %v1800_v39 = vshrl.u32 %v4032_v17, %v1799_v20 }
 0x1df   : > { %v1664_v14 = vsel %vm4811_vm11, %v4515_v49, %v1661_v36  ;;  %v3484_v57 = vmin.u32 %v1746_v12, %v4877_v26  ;;  %v1815_v8 = vor.u32 %v1814_v3, %v1813_v22  ;;  %vm1816_vm10 = vcmp.lt.s32.totalorder %v1797_v34, 1  ;;  %v4916_v12 = vpop.f32.mrb[14].mxu0 }
 0x1e0   : > { %3875 = vcosq.f32 %v1664_v14  ;;  %vm1817_vm13 = vcmp.lt.s32.totalorder %v1797_v34, 2  ;;  %vm4897_vm12 = vcmp.le.f32.partialorder %v1680_v37, 0.7853982  ;;  %vm1819_vm14 = vcmp.lt.s32.totalorder %v1797_v34, 4 }
 0x1e1   : > { %3877 = vsinq.f32 %v1664_v14  ;;  %v1748_v15 = vclz %v3484_v57  ;;  %v1824_v48 = vsel %vm1816_vm10, %v1803_v11, %v1806_v38  ;;  %vm1818_vm15 = vcmp.lt.s32.totalorder %v1797_v34, 3 }
 0x1e2   : > { %v1821_v4 = vsel %vm1819_vm14, %v1809_v47, 2102212464  ;;  %v1825_v62 = vsel %vm1819_vm14, %v1812_v50, 920167782  ;;  %v1828_v56 = vsel %vm1816_vm10, %v1806_v38, %v1809_v47  ;;  %v1820_v60 = vsel %vm1816_vm10, %v1800_v39, %v1803_v11 }
 0x1e3   : > { %v3485_v19 = vadd.s32 4294967294, %v1748_v15  ;;  %v1826_v31 = vsel %vm1818_vm15, %v1809_v47, %v1825_v62  ;;  %v1829_v20 = vsel %vm1819_vm14, %v1815_v8, 1326507024  ;;  %v1822_v55 = vsel %vm1818_vm15, %v1806_v38, %v1821_v4  ;;  %v4919_v47 = vpop.f32.mrb[13].mxu1 }
 0x1e4   : > { %v1827_v63 = vsel %vm1817_vm13, %v1824_v48, %v1826_v31  ;;  %v1830_v54 = vsel %vm1818_vm15, %v1812_v50, %v1829_v20  ;;  %v1892_v59 = vshrl.u32 %v1891_v13, 23  ;;  %vm1672_vm0 = vcmp.eq.s32.totalorder %v4853_v0, 0 }
 0x1e5   : > { %vm3486_vm11 = vcmp.lt.s32.totalorder %v3485_v19, 0  ;;  %v1831_v37 = vsel %vm1817_vm13, %v1828_v56, %v1830_v54  ;;  %v4905_v27 = vmul.u32.u64.low %v4870_v6, %v1827_v63  ;;  %v4906_v18 = vmul.u32.u64.high %v4870_v6, %v1827_v63, %v4905_v27 }
 0x1e6   : > { %v1751_v16 = vsel %vm3486_vm11, 0, %v3485_v19  ;;  %v1767_v11 = vsel %vm1682_vm9, %v1766_v35, %v4855_v1  ;;  %v4913_v9 = vmul.u32.u64.low %v4870_v6, %v1831_v37  ;;  %v4914_v53 = vmul.u32.u64.high %v4870_v6, %v1831_v37, %v4913_v9 }
 0x1e7   : > { %v1752_v38 = vsub.s32 32, %v1751_v16  ;;  %v1756_v22 = vsub.s32 4294967266, %v1751_v16  ;;  %v1823_v3 = vsel %vm1817_vm13, %v1820_v60, %v1822_v55  ;;  %v3491_v36 = vadd.s32 4294967169, %v1892_v59 }
 0x1e8   : > { %v1753_v50 = vshll.u32 %v4877_v26, %v1751_v16  ;;  %v1888_v13 = vand.u32 2147483647, %v4835_v5  ;;  %v4925_v1 = vadd.f32 %v4861_v25, %v4343_v2  ;;  %v4929_v14 = vadd.f32 %v4865_v58, %v4411_v10 }
 0x1e9   : > { %v1754_v57 = vshrl.u32 %v1736_v45, %v1752_v38  ;;  %v1757_v35 = vadd.s32 127, %v1756_v22  ;;  %v1842_v34 = vadd.s32 1, %v4906_v18  ;;  %v1898_v8 = vadd.s32 1, %v3491_v36 }
 0x1ea   : > { %v3876_v39 = vpop.eup %3875  ;;  %vm1675_vm1 = vcmp.eq.s32.totalorder %v4853_v0, 2  ;;  %v1769_v26 = vsel %vm4897_vm12, 0, %v1767_v11  ;;  %v1839_v15 = vmul.u32 %v4870_v6, %v1823_v3  ;;  %vm1841_vm2 = vc.u32 %v4914_v53, %v4905_v27 }
 0x1eb   : > { %v3878_v2 = vpop.eup %3877  ;;  %v1676_v25 = vxor.u32 2147483648, %v3876_v39  ;;  %v1755_v10 = vor.u32 %v1754_v57, %v1753_v50  ;;  %v1758_v58 = vshll.u32 %v1757_v35, 23  ;;  %v1843_v45 = vsel %vm1841_vm2, %v1842_v34, %v4906_v18 }
 0x1ec   : > { %v1673_v48 = vxor.u32 2147483648, %v3878_v2  ;;  %v1844_v4 = vadd.s32 %v1843_v45, %v1839_v15  ;;  %v1895_v62 = vand.u32 8388607, %v1888_v13  ;;  %vm1899_vm3 = vcmp.gt.s32.totalorder %v1898_v8, 0 }
 0x1ed   : > { %v1677_v56 = vsel %vm1675_vm1, %v1676_v25, %v3878_v2  ;;  %v1759_v19 = vor.u32 4788187, %v1758_v58  ;;  %v1773_v60 = vadd.s32 3, %v1769_v26  ;;  %v1900_v6 = vsel %vm1899_vm3, %v1898_v8, 0 }
 0x1ee   : > { %vm1671_vm4 = vcmp.lt.s32.totalorder %v4853_v0, 2  ;;  %v1674_v31 = vsel %vm1672_vm0, %v3876_v39, %v1673_v48  ;;  %v1845_v20 = vadd.s32 536870912, %v1844_v4  ;;  %v1902_v55 = vand.u32 31, %v1900_v6 }
 0x1ef   : > { %vm1668_vm5 = vweird.f32 %v4515_v49  ;;  %v1678_v63 = vsel %vm1671_vm4, %v1674_v31, %v1677_v56  ;;  %v1760_v54 = vand.u32 2147483647, %v1759_v19  ;;  %v1762_v59 = vcvt.s32.f32 %v1755_v10 }
 0x1f0   : > { %v1679_v37 = vsel %vm1668_vm5, nan, %v1678_v63  ;;  %v1846_v18 = vshrl.u32 %v1845_v20, 30  ;;  %v1896_v16 = vor.u32 8388608, %v1895_v62  ;;  %v1903_v11 = vsub.s32 32, %v1902_v55 }
 0x1f1   : > { %3245 = vst [vmem:[%s4624_s6 + $0x20] sm:$0xff] %v1679_v37  ;;  %v1763_v9 = vmul.f32 %v1762_v59, %v1760_v54  ;;  %v4946_v38 = vand.u32 3, %v1773_v60  ;;  %v1905_v3 = vshll.u32 %v4032_v17, %v1902_v55  ;;  %v1992_v36 = vand.u32 2147483647, %v4925_v1 }
 0x1f2   : > { %v1847_v22 = vshll.u32 %v1846_v18, 30  ;;  %v1906_v0 = vshrl.u32 %v4033_v24, %v1903_v11  ;;  %v1909_v49 = vshrl.u32 %v4034_v29, %v1903_v11  ;;  %v1912_v57 = vshrl.u32 %v4035_v7, %v1903_v11 }
 0x1f3   : > { %v1764_v50 = vxor.u32 2147483648, %v1763_v9  ;;  %v1915_v35 = vshrl.u32 %v4036_v21, %v1903_v11  ;;  %vm1786_vm7 = vcmp.lt.s32.totalorder %v4749_v32, 0  ;;  %v1901_v8 = vshrl.u32 %v1900_v6, 5 }
 0x1f4   : > { %v4955_v34 = vsub.s32 %v1844_v4, %v1847_v22  ;;  %v1908_v39 = vshll.u32 %v4033_v24, %v1902_v55  ;;  %v4958_v26 = vshll.u32 %v1896_v16, 8  ;;  %v1907_v2 = vor.u32 %v1906_v0, %v1905_v3 }
 0x1f5   : > { %v1765_v15 = vsel %vm1682_vm9, %v1764_v50, %v1763_v9  ;;  %v1911_v25 = vshll.u32 %v4034_v29, %v1902_v55  ;;  %v1914_v10 = vshll.u32 %v4035_v7, %v1902_v55  ;;  %v1917_v4 = vshll.u32 %v4036_v21, %v1902_v55 }
 0x1f6   : > { %v1768_v58 = vsel %vm4897_vm12, %v4519_v52, %v1765_v15  ;;  %v1850_v45 = vsub.s32 0, %v4955_v34  ;;  %v1910_v48 = vor.u32 %v1909_v49, %v1908_v39  ;;  %v1918_v19 = vshrl.u32 %v4037_v33, %v1903_v11 }
 0x1f7   : > { %3879 = vcosq.f32 %v1768_v58  ;;  %v1913_v62 = vor.u32 %v1912_v57, %v1911_v25  ;;  %v1916_v56 = vor.u32 %v1915_v35, %v1914_v10  ;;  %vm4972_vm8 = vcmp.le.f32.partialorder %v1784_v61, 0.7853982  ;;  %v4983_v35 = vpop.f32.mrb[15].mxu0 }
 0x1f8   : > { %3881 = vsinq.f32 %v1768_v58  ;;  %v3488_v43 = vmin.u32 %v1850_v45, %v4955_v34  ;;  %v1870_v6 = vsub.s32 4, %v1846_v18  ;;  %v1904_v31 = vshrl.u32 %v4032_v17, %v1903_v11 }
 0x1f9   : > { %v1919_v20 = vor.u32 %v1918_v19, %v1917_v4  ;;  %vm1920_vm9 = vcmp.lt.s32.totalorder %v1901_v8, 1  ;;  %vm1921_vm10 = vcmp.lt.s32.totalorder %v1901_v8, 2  ;;  %vm1922_vm13 = vcmp.lt.s32.totalorder %v1901_v8, 3 }
 0x1fa   : > { %v1852_v55 = vclz %v3488_v43  ;;  %vm1923_vm12 = vcmp.lt.s32.totalorder %v1901_v8, 4  ;;  %v1924_v63 = vsel %vm1920_vm9, %v1904_v31, %v1907_v2  ;;  %v1928_v54 = vsel %vm1920_vm9, %v1907_v2, %v1910_v48 }
 0x1fb   : > { %v1925_v59 = vsel %vm1923_vm12, %v1913_v62, 2102212464  ;;  %v1929_v37 = vsel %vm1923_vm12, %v1916_v56, 920167782  ;;  %v1932_v16 = vsel %vm1920_vm9, %v1910_v48, %v1913_v62  ;;  %v1933_v61 = vsel %vm1923_vm12, %v1919_v20, 1326507024 }
 0x1fc   : > { %v3489_v9 = vadd.s32 4294967294, %v1852_v55  ;;  %v1926_v22 = vsel %vm1922_vm13, %v1910_v48, %v1925_v59  ;;  %v1930_v3 = vsel %vm1922_vm13, %v1913_v62, %v1929_v37  ;;  %v1934_v0 = vsel %vm1922_vm13, %v1916_v56, %v1933_v61  ;;  %v4997_v62 = vpop.f32.mrb[14].mxu1 }
 0x1fd   : > { %v1871_v50 = vsel %vm1786_vm7, %v1870_v6, %v1846_v18  ;;  %v1931_v11 = vsel %vm1921_vm10, %v1928_v54, %v1930_v3  ;;  %v1935_v49 = vsel %vm1921_vm10, %v1932_v16, %v1934_v0  ;;  %v1995_v57 = vand.u32 2139095040, %v4925_v1 }
 0x1fe   : > { %vm3490_vm14 = vcmp.lt.s32.totalorder %v3489_v9, 0  ;;  %v1927_v39 = vsel %vm1921_vm10, %v1924_v63, %v1926_v22  ;;  %v4987_v15 = vmul.u32.u64.low %v4958_v26, %v1935_v49  ;;  %v4988_v2 = vmul.u32.u64.high %v4958_v26, %v1935_v49, %v4987_v15 }
 0x1ff   : > { %v1855_v25 = vsel %vm3490_vm14, 0, %v3489_v9  ;;  %v4991_v10 = vmul.u32.u64.low %v4958_v26, %v1931_v11  ;;  %v4992_v58 = vmul.u32.u64.high %v4958_v26, %v1931_v11, %v4991_v10  ;;  %v1996_v18 = vshrl.u32 %v1995_v57, 23 }
 0x200   : > { %vm1776_vm15 = vcmp.eq.s32.totalorder %v4946_v38, 0  ;;  %v1840_v45 = vadd.s32 %v4905_v27, %v4914_v53  ;;  %v1856_v48 = vsub.s32 32, %v1855_v25  ;;  %v1860_v4 = vsub.s32 4294967266, %v1855_v25 }
 0x201   : > { %v3880_v8 = vpop.eup %3879  ;;  %vm1779_vm0 = vcmp.eq.s32.totalorder %v4946_v38, 2  ;;  %v1873_v56 = vsel %vm4972_vm8, 0, %v1871_v50  ;;  %v1943_v19 = vmul.u32 %v4958_v26, %v1927_v39  ;;  %v3495_v43 = vadd.s32 4294967169, %v1996_v18 }
 0x202   : > { %v3882_v6 = vpop.eup %3881  ;;  %v1780_v31 = vxor.u32 2147483648, %v3880_v8  ;;  %v1857_v20 = vshll.u32 %v4955_v34, %v1855_v25  ;;  %v1858_v55 = vshrl.u32 %v1840_v45, %v1856_v48  ;;  %v1861_v63 = vadd.s32 127, %v1860_v4 }
 0x203   : > { %v1777_v27 = vxor.u32 2147483648, %v3882_v6  ;;  %vm1945_vm11 = vc.u32 %v4988_v2, %v4991_v10  ;;  %v1946_v53 = vadd.s32 1, %v4992_v58  ;;  %v1999_v54 = vand.u32 8388607, %v1992_v36 }
 0x204   : > { %v1781_v59 = vsel %vm1779_vm0, %v1780_v31, %v3882_v6  ;;  %v1859_v37 = vor.u32 %v1858_v55, %v1857_v20  ;;  %v1862_v16 = vshll.u32 %v1861_v63, 23  ;;  %v2002_v26 = vadd.s32 1, %v3495_v43 }
 0x205   : > { %vm1772_vm1 = vweird.f32 %v4519_v52  ;;  %vm1775_vm2 = vcmp.lt.s32.totalorder %v4946_v38, 2  ;;  %v1778_v34 = vsel %vm1776_vm15, %v3880_v8, %v1777_v27  ;;  %v1947_v61 = vsel %vm1945_vm11, %v1946_v53, %v4992_v58 }
 0x206   : > { %v1782_v9 = vsel %vm1775_vm2, %v1778_v34, %v1781_v59  ;;  %v1863_v22 = vor.u32 4788187, %v1862_v16  ;;  %v1877_v3 = vadd.s32 3, %v1873_v56  ;;  %v1948_v0 = vadd.s32 %v1947_v61, %v1943_v19 }
 0x207   : > { %v1783_v50 = vsel %vm1772_vm1, nan, %v1782_v9  ;;  %v2000_v11 = vor.u32 8388608, %v1999_v54  ;;  %vm2003_vm3 = vcmp.gt.s32.totalorder %v2002_v26, 0  ;;  %v1866_v57 = vcvt.s32.f32 %v1859_v37 }
 0x208   : > { %3246 = vst.msk [vmem:[%s4624_s6 + $0x28] sm:$0xff] %vm3241_vm6, %v1783_v50  ;;  %v1864_v49 = vand.u32 2147483647, %v1863_v22  ;;  %v1949_v39 = vadd.s32 536870912, %v1948_v0  ;;  %v2004_v52 = vsel %vm2003_vm3, %v2002_v26, 0  ;;  %v5015_v18 = vand.u32 3, %v1877_v3 }
 0x209   : > { %v2006_v15 = vand.u32 31, %v2004_v52  ;;  %v5020_v58 = vadd.s32 %v4991_v10, %v4988_v2  ;;  %v5022_v48 = vshll.u32 %v2000_v11, 8  ;;  %v2096_v4 = vand.u32 2147483647, %v4929_v14 }
 0x20a   : > { %v1867_v25 = vmul.f32 %v1866_v57, %v1864_v49  ;;  %v5017_v38 = vshrl.u32 %v1949_v39, 30  ;;  %v2099_v43 = vand.u32 2139095040, %v4929_v14  ;;  %v2005_v54 = vshrl.u32 %v2004_v52, 5 }
 0x20b   : > { %v2007_v45 = vsub.s32 32, %v2006_v15  ;;  %v2009_v19 = vshll.u32 %v4032_v17, %v2006_v15  ;;  %v2012_v31 = vshll.u32 %v4033_v24, %v2006_v15  ;;  %v2015_v63 = vshll.u32 %v4034_v29, %v2006_v15 }
 0x20c   : > { %v1868_v8 = vxor.u32 2147483648, %v1867_v25  ;;  %v1951_v56 = vshll.u32 %v5017_v38, 30  ;;  %v2018_v37 = vshll.u32 %v4035_v7, %v2006_v15  ;;  %vm1890_vm4 = vcmp.lt.s32.totalorder %v4835_v5, 0 }
 0x20d   : > { %v2010_v6 = vshrl.u32 %v4033_v24, %v2007_v45  ;;  %v2013_v20 = vshrl.u32 %v4034_v29, %v2007_v45  ;;  %v2016_v2 = vshrl.u32 %v4035_v7, %v2007_v45  ;;  %v2019_v27 = vshrl.u32 %v4036_v21, %v2007_v45 }
 0x20e   : > { %v1869_v10 = vsel %vm1786_vm7, %v1868_v8, %v1867_v25  ;;  %v5034_v55 = vsub.s32 %v1948_v0, %v1951_v56  ;;  %v2021_v9 = vshll.u32 %v4036_v21, %v2006_v15  ;;  %v2022_v22 = vshrl.u32 %v4037_v33, %v2007_v45 }
 0x20f   : > { %v1872_v53 = vsel %vm4972_vm8, %v4749_v32, %v1869_v10  ;;  %v2011_v59 = vor.u32 %v2010_v6, %v2009_v19  ;;  %v2014_v26 = vor.u32 %v2013_v20, %v2012_v31  ;;  %v2017_v34 = vor.u32 %v2016_v2, %v2015_v63 }
 0x210   : > { %3883 = vcosq.f32 %v1872_v53  ;;  %v1954_v16 = vsub.s32 0, %v5034_v55  ;;  %v2020_v61 = vor.u32 %v2019_v27, %v2018_v37  ;;  %v2100_v3 = vshrl.u32 %v2099_v43, 23  ;;  %v5071_v37 = vpop.f32.mrb[16].mxu0 }
 0x211   : > { %3885 = vsinq.f32 %v1872_v53  ;;  %v3581_v0 = vadd.f32 %v4640_v23, %v4304_v28  ;;  %v3583_v50 = vadd.f32 %v4725_v41, %v4306_v30  ;;  %v1974_v11 = vsub.s32 4, %v5017_v38 }
 0x212   : > { %v3492_v60 = vmin.u32 %v1954_v16, %v5034_v55  ;;  %v2008_v49 = vshrl.u32 %v4032_v17, %v2007_v45  ;;  %v2023_v57 = vor.u32 %v2022_v22, %v2021_v9  ;;  %vm2024_vm5 = vcmp.lt.s32.totalorder %v2005_v54, 1  ;;  %v5074_v22 = vpop.f32.mrb[15].mxu1 }
 0x213   : > { %vm1883_vm7 = vcmp.eq.s32.totalorder %v5015_v18, 2  ;;  %vm2025_vm8 = vcmp.lt.s32.totalorder %v2005_v54, 2  ;;  %vm2026_vm9 = vcmp.lt.s32.totalorder %v2005_v54, 3  ;;  %vm2027_vm10 = vcmp.lt.s32.totalorder %v2005_v54, 4 }
 0x214   : > { %v1956_v39 = vclz %v3492_v60  ;;  %vm1880_vm13 = vcmp.eq.s32.totalorder %v5015_v18, 0  ;;  %v2029_v52 = vsel %vm2027_vm10, %v2017_v34, 2102212464  ;;  %v2032_v15 = vsel %vm2024_vm5, %v2011_v59, %v2014_v26 }
 0x215   : > { %v2033_v23 = vsel %vm2027_vm10, %v2020_v61, 920167782  ;;  %v2036_v25 = vsel %vm2024_vm5, %v2014_v26, %v2017_v34  ;;  %vm1879_vm12 = vcmp.lt.s32.totalorder %v5015_v18, 2  ;;  %v2028_v8 = vsel %vm2024_vm5, %v2008_v49, %v2011_v59 }
 0x216   : > { %v3493_v41 = vadd.s32 4294967294, %v1956_v39  ;;  %v2034_v56 = vsel %vm2026_vm9, %v2017_v34, %v2033_v23  ;;  %v2037_v45 = vsel %vm2027_vm10, %v2023_v57, 1326507024  ;;  %vm1876_vm14 = vweird.f32 %v4749_v32 }
 0x217   : > { %v2030_v19 = vsel %vm2026_vm9, %v2014_v26, %v2029_v52  ;;  %v2035_v43 = vsel %vm2025_vm8, %v2032_v15, %v2034_v56  ;;  %v2038_v6 = vsel %vm2026_vm9, %v2020_v61, %v2037_v45  ;;  %v3499_v31 = vadd.s32 4294967169, %v2100_v3 }
 0x218   : > { %vm3494_vm15 = vcmp.lt.s32.totalorder %v3493_v41, 0  ;;  %v2039_v20 = vsel %vm2025_vm8, %v2036_v25, %v2038_v6  ;;  %v5060_v2 = vmul.u32.u64.low %v5022_v48, %v2035_v43  ;;  %v5061_v10 = vmul.u32.u64.high %v5022_v48, %v2035_v43, %v5060_v2 }
 0x219   : > { %v1959_v63 = vsel %vm3494_vm15, 0, %v3493_v41  ;;  %v1975_v27 = vsel %vm1890_vm4, %v1974_v11, %v5017_v38  ;;  %v5068_v53 = vmul.u32.u64.low %v5022_v48, %v2039_v20  ;;  %v5069_v59 = vmul.u32.u64.high %v5022_v48, %v2039_v20, %v5068_v53 }
 0x21a   : > { %v3884_v16 = vpop.eup %3883  ;;  %v1960_v26 = vsub.s32 32, %v1959_v63  ;;  %v1964_v34 = vsub.s32 4294967266, %v1959_v63  ;;  %v2031_v61 = vsel %vm2025_vm8, %v2028_v8, %v2030_v19  ;;  %v2106_v9 = vadd.s32 1, %v3499_v31 }
 0x21b   : > { %v3886_v60 = vpop.eup %3885  ;;  %v1884_v3 = vxor.u32 2147483648, %v3884_v16  ;;  %v1961_v49 = vshll.u32 %v5034_v55, %v1959_v63  ;;  %v5078_v38 = vadd.f32 %v3581_v0, %v4521_v51  ;;  %v5081_v11 = vadd.f32 %v3583_v50, %v4617_v46 }
 0x21c   : > { %v1881_v57 = vxor.u32 2147483648, %v3886_v60  ;;  %v1962_v39 = vshrl.u32 %v5020_v58, %v1960_v26  ;;  %v1965_v52 = vadd.s32 127, %v1964_v34  ;;  %v2050_v54 = vadd.s32 1, %v5061_v10 }
 0x21d   : > { %v1885_v15 = vsel %vm1883_vm7, %v1884_v3, %v3886_v60  ;;  %v2047_v23 = vmul.u32 %v5022_v48, %v2031_v61  ;;  %vm2049_vm0 = vc.u32 %v5069_v59, %v5060_v2  ;;  %vm2107_vm11 = vcmp.gt.s32.totalorder %v2106_v9, 0 }
 0x21e   : > { %v1882_v51 = vsel %vm1880_vm13, %v3884_v16, %v1881_v57  ;;  %v1963_v46 = vor.u32 %v1962_v39, %v1961_v49  ;;  %v1966_v55 = vshll.u32 %v1965_v52, 23  ;;  %v2051_v58 = vsel %vm2049_vm0, %v2050_v54, %v5061_v10 }
 0x21f   : > { %v1886_v0 = vsel %vm1879_vm12, %v1882_v51, %v1885_v15  ;;  %v2052_v50 = vadd.s32 %v2051_v58, %v2047_v23  ;;  %v2103_v25 = vand.u32 8388607, %v2096_v4  ;;  %v2108_v41 = vsel %vm2107_vm11, %v2106_v9, 0 }
 0x220   : > { %v1887_v48 = vsel %vm1876_vm14, nan, %v1886_v0  ;;  %vm5101_vm1 = vcmp.le.f32.partialorder %v1888_v13, 0.7853982  ;;  %v1967_v56 = vor.u32 4788187, %v1966_v55  ;;  %v2110_v19 = vand.u32 31, %v2108_v41 }
 0x221   : > { %3247 = vst [vmem:[%s4624_s6 + $0x30] sm:$0xff] %v1887_v48  ;;  %v1977_v18 = vsel %vm5101_vm1, 0, %v1975_v27  ;;  %v2053_v45 = vadd.s32 536870912, %v2052_v50  ;;  %v1970_v6 = vcvt.s32.f32 %v1963_v46  ;;  %v2104_v20 = vor.u32 8388608, %v2103_v25 }
 0x222   : > { %v1968_v43 = vand.u32 2147483647, %v1967_v56  ;;  %v2111_v10 = vsub.s32 32, %v2110_v19  ;;  %v1981_v63 = vadd.s32 3, %v1977_v18  ;;  %v5108_v53 = vshrl.u32 %v2108_v41, 5 }
 0x223   : > { %v2054_v31 = vshrl.u32 %v2053_v45, 30  ;;  %v2113_v13 = vshll.u32 %v4032_v17, %v2110_v19  ;;  %v2116_v34 = vshll.u32 %v4033_v24, %v2110_v19  ;;  %v2119_v27 = vshll.u32 %v4034_v29, %v2110_v19 }
 0x224   : > { %v1971_v32 = vmul.f32 %v1970_v6, %v1968_v43  ;;  %v2114_v26 = vshrl.u32 %v4033_v24, %v2111_v10  ;;  %v2117_v9 = vshrl.u32 %v4034_v29, %v2111_v10  ;;  %v2120_v60 = vshrl.u32 %v4035_v7, %v2111_v10 }
 0x225   : > { %v2055_v16 = vshll.u32 %v2054_v31, 30  ;;  %v2123_v3 = vshrl.u32 %v4036_v21, %v2111_v10  ;;  %v2122_v57 = vshll.u32 %v4035_v7, %v2110_v19  ;;  %v2125_v39 = vshll.u32 %v4036_v21, %v2110_v19 }
 0x226   : > { %v1972_v61 = vxor.u32 2147483648, %v1971_v32  ;;  %v2126_v52 = vshrl.u32 %v4037_v33, %v2111_v10  ;;  %vm1994_vm2 = vcmp.lt.s32.totalorder %v4925_v1, 0  ;;  %v2115_v15 = vor.u32 %v2114_v26, %v2113_v13 }
 0x227   : > { %v5117_v49 = vsub.s32 %v2052_v50, %v2055_v16  ;;  %v2118_v23 = vor.u32 %v2117_v9, %v2116_v34  ;;  %v2121_v51 = vor.u32 %v2120_v60, %v2119_v27  ;;  %v5128_v55 = vand.u32 3, %v1981_v63 }
 0x228   : > { %v1973_v54 = vsel %vm1890_vm4, %v1972_v61, %v1971_v32  ;;  %v2124_v0 = vor.u32 %v2123_v3, %v2122_v57  ;;  %v2127_v50 = vor.u32 %v2126_v52, %v2125_v39  ;;  %vm2128_vm3 = vcmp.lt.s32.totalorder %v5108_v53, 1 }
 0x229   : > { %v1976_v46 = vsel %vm5101_vm1, %v4835_v5, %v1973_v54  ;;  %v2058_v58 = vsub.s32 0, %v5117_v49  ;;  %v2144_v25 = vshll.u32 %v2104_v20, 8  ;;  %vm5134_vm4 = vcmp.le.f32.partialorder %v1992_v36, 0.7853982 }
 0x22a   : > { %3887 = vcosq.f32 %v1976_v46  ;;  %vm2129_vm5 = vcmp.lt.s32.totalorder %v5108_v53, 2  ;;  %vm2131_vm7 = vcmp.lt.s32.totalorder %v5108_v53, 4  ;;  %v2112_v8 = vshrl.u32 %v4032_v17, %v2111_v10  ;;  %v5146_v10 = vpop.f32.mrb[17].mxu0 }
 0x22b   : > { %3889 = vsinq.f32 %v1976_v46  ;;  %v3496_v48 = vmin.u32 %v2058_v58, %v5117_v49  ;;  %v2133_v56 = vsel %vm2131_vm7, %v2121_v51, 2102212464  ;;  %v2136_v18 = vsel %vm2128_vm3, %v2115_v15, %v2118_v23 }
 0x22c   : > { %v2137_v45 = vsel %vm2131_vm7, %v2124_v0, 920167782  ;;  %v2078_v43 = vsub.s32 4, %v2054_v31  ;;  %vm2130_vm8 = vcmp.lt.s32.totalorder %v5108_v53, 3  ;;  %v2140_v6 = vsel %vm2128_vm3, %v2118_v23, %v2121_v51 }
 0x22d   : > { %v2060_v19 = vclz %v3496_v48  ;;  %v2132_v36 = vsel %vm2128_vm3, %v2112_v8, %v2115_v15  ;;  %v2138_v20 = vsel %vm2130_vm8, %v2121_v51, %v2137_v45  ;;  %v2141_v32 = vsel %vm2131_vm7, %v2127_v50, 1326507024  ;;  %v5162_v15 = vpop.f32.mrb[16].mxu1 }
 0x22e   : > { %v2203_v63 = vand.u32 2139095040, %v5078_v38  ;;  %v2134_v16 = vsel %vm2130_vm8, %v2118_v23, %v2133_v56  ;;  %v2139_v26 = vsel %vm2129_vm5, %v2136_v18, %v2138_v20  ;;  %v2142_v34 = vsel %vm2130_vm8, %v2124_v0, %v2141_v32 }
 0x22f   : > { %v3497_v13 = vadd.s32 4294967294, %v2060_v19  ;;  %vm1983_vm9 = vcmp.lt.s32.totalorder %v5128_v55, 2  ;;  %v2143_v27 = vsel %vm2129_vm5, %v2140_v6, %v2142_v34  ;;  %v2079_v3 = vsel %vm1994_vm2, %v2078_v43, %v2054_v31 }
 0x230   : > { %v5151_v61 = vmul.u32.u64.low %v2144_v25, %v2139_v26  ;;  %v5152_v9 = vmul.u32.u64.high %v2144_v25, %v2139_v26, %v5151_v61  ;;  %v2204_v60 = vshrl.u32 %v2203_v63, 23  ;;  %vm1984_vm13 = vcmp.eq.s32.totalorder %v5128_v55, 0 }
 0x231   : > { %vm3498_vm10 = vcmp.lt.s32.totalorder %v3497_v13, 0  ;;  %v5157_v57 = vmul.u32.u64.low %v2144_v25, %v2143_v27  ;;  %v5158_v39 = vmul.u32.u64.high %v2144_v25, %v2143_v27, %v5157_v57  ;;  %vm1987_vm12 = vcmp.eq.s32.totalorder %v5128_v55, 2 }
 0x232   : > { %v2063_v52 = vsel %vm3498_vm10, 0, %v3497_v13  ;;  %v3503_v54 = vadd.s32 4294967169, %v2204_v60  ;;  %v2048_v23 = vadd.s32 %v5060_v2, %v5069_v59  ;;  %v2135_v58 = vsel %vm2129_vm5, %v2132_v36, %v2134_v16 }
 0x233   : > { %v2064_v51 = vsub.s32 32, %v2063_v52  ;;  %v2068_v46 = vsub.s32 4294967266, %v2063_v52  ;;  %v2081_v0 = vsel %vm5134_vm4, 0, %v2079_v3  ;;  %v2154_v50 = vadd.s32 1, %v5152_v9 }
 0x234   : > { %v3888_v31 = vpop.eup %3887  ;;  %v2200_v48 = vand.u32 2147483647, %v5078_v38  ;;  %v2210_v8 = vadd.s32 1, %v3503_v54  ;;  %v2065_v45 = vshll.u32 %v5117_v49, %v2063_v52  ;;  %v2151_v43 = vmul.u32 %v2144_v25, %v2135_v58 }
 0x235   : > { %v3890_v56 = vpop.eup %3889  ;;  %v1988_v18 = vxor.u32 2147483648, %v3888_v31  ;;  %v2066_v19 = vshrl.u32 %v2048_v23, %v2064_v51  ;;  %v2069_v2 = vadd.s32 127, %v2068_v46  ;;  %vm2153_vm14 = vc.u32 %v5158_v39, %v5151_v61 }
 0x236   : > { %v1985_v59 = vxor.u32 2147483648, %v3890_v56  ;;  %vm2211_vm15 = vcmp.gt.s32.totalorder %v2210_v8, 0  ;;  %v2155_v20 = vsel %vm2153_vm14, %v2154_v50, %v5152_v9  ;;  %v2085_v49 = vadd.s32 3, %v2081_v0 }
 0x237   : > { %v1989_v53 = vsel %vm1987_vm12, %v1988_v18, %v3890_v56  ;;  %v2067_v6 = vor.u32 %v2066_v19, %v2065_v45  ;;  %v2070_v36 = vshll.u32 %v2069_v2, 23  ;;  %v2156_v63 = vadd.s32 %v2155_v20, %v2151_v43 }
 0x238   : > { %v1986_v32 = vsel %vm1984_vm13, %v3888_v31, %v1985_v59  ;;  %v2212_v13 = vsel %vm2211_vm15, %v2210_v8, 0  ;;  %vm1980_vm0 = vweird.f32 %v4835_v5  ;;  %v2207_v26 = vand.u32 8388607, %v2200_v48 }
 0x239   : > { %v1990_v25 = vsel %vm1983_vm9, %v1986_v32, %v1989_v53  ;;  %v2071_v16 = vor.u32 4788187, %v2070_v36  ;;  %v2157_v27 = vadd.s32 536870912, %v2156_v63  ;;  %v2214_v60 = vand.u32 31, %v2212_v13 }
 0x23a   : > { %v1991_v34 = vsel %vm1980_vm0, nan, %v1990_v25  ;;  %v2074_v3 = vcvt.s32.f32 %v2067_v6  ;;  %v5187_v57 = vand.u32 3, %v2085_v49  ;;  %v2208_v23 = vor.u32 8388608, %v2207_v26 }
 0x23b   : > { %3248 = vst.msk [vmem:[%s4624_s6 + $0x38] sm:$0xff] %vm3241_vm6, %v1991_v34  ;;  %v2072_v9 = vand.u32 2147483647, %v2071_v16  ;;  %v5189_v52 = vshrl.u32 %v2157_v27, 30  ;;  %v2215_v54 = vsub.s32 32, %v2214_v60  ;;  %v5191_v55 = vshrl.u32 %v2212_v13, 5 }
 0x23c   : > { %v2307_v51 = vand.u32 2139095040, %v5081_v11  ;;  %v2217_v58 = vshll.u32 %v4032_v17, %v2214_v60  ;;  %v2220_v0 = vshll.u32 %v4033_v24, %v2214_v60  ;;  %v2223_v19 = vshll.u32 %v4034_v29, %v2214_v60 }
 0x23d   : > { %v2075_v5 = vmul.f32 %v2074_v3, %v2072_v9  ;;  %v2159_v46 = vshll.u32 %v5189_v52, 30  ;;  %v2218_v31 = vshrl.u32 %v4033_v24, %v2215_v54  ;;  %v2221_v8 = vshrl.u32 %v4034_v29, %v2215_v54 }
 0x23e   : > { %v2224_v56 = vshrl.u32 %v4035_v7, %v2215_v54  ;;  %v2227_v18 = vshrl.u32 %v4036_v21, %v2215_v54  ;;  %v2226_v2 = vshll.u32 %v4035_v7, %v2214_v60  ;;  %v2230_v59 = vshrl.u32 %v4037_v33, %v2215_v54 }
 0x23f   : > { %v2076_v50 = vxor.u32 2147483648, %v2075_v5  ;;  %v5201_v45 = vsub.s32 %v2156_v63, %v2159_v46  ;;  %v2219_v53 = vor.u32 %v2218_v31, %v2217_v58  ;;  %v2222_v6 = vor.u32 %v2221_v8, %v2220_v0  ;;  %v5230_v58 = vpop.f32.mrb[18].mxu0  ;;  %v5239_v8 = vpop.f32.mrb[17].mxu1 }
 0x240   : > { %v2229_v36 = vshll.u32 %v4036_v21, %v2214_v60  ;;  %v2225_v49 = vor.u32 %v2224_v56, %v2223_v19  ;;  %v2228_v63 = vor.u32 %v2227_v18, %v2226_v2  ;;  %v5213_v25 = vshll.u32 %v2208_v23, 8 }
 0x241   : > { %v2077_v43 = vsel %vm1994_vm2, %v2076_v50, %v2075_v5  ;;  %v2162_v32 = vsub.s32 0, %v5201_v45  ;;  %v2308_v16 = vshrl.u32 %v2307_v51, 23  ;;  %vm2098_vm11 = vcmp.lt.s32.totalorder %v4929_v14, 0 }
 0x242   : > { %v2080_v20 = vsel %vm5134_vm4, %v4925_v1, %v2077_v43  ;;  %v2231_v13 = vor.u32 %v2230_v59, %v2229_v36  ;;  %vm2232_vm1 = vcmp.lt.s32.totalorder %v5191_v55, 1  ;;  %vm2235_vm2 = vcmp.lt.s32.totalorder %v5191_v55, 4 }
 0x243   : > { %3891 = vcosq.f32 %v2080_v20  ;;  %v3500_v26 = vmin.u32 %v2162_v32, %v5201_v45  ;;  %vm2233_vm3 = vcmp.lt.s32.totalorder %v5191_v55, 2  ;;  %vm2234_vm4 = vcmp.lt.s32.totalorder %v5191_v55, 3 }
 0x244   : > { %3893 = vsinq.f32 %v2080_v20  ;;  %v2240_v41 = vsel %vm2232_vm1, %v2219_v53, %v2222_v6  ;;  %v2241_v34 = vsel %vm2235_vm2, %v2228_v63, 920167782  ;;  %v2216_v60 = vshrl.u32 %v4032_v17, %v2215_v54 }
 0x245   : > { %v2164_v27 = vclz %v3500_v26  ;;  %v2237_v9 = vsel %vm2235_vm2, %v2225_v49, 2102212464  ;;  %v2244_v3 = vsel %vm2232_vm1, %v2222_v6, %v2225_v49  ;;  %vm2091_vm5 = vcmp.eq.s32.totalorder %v5187_v57, 2 }
 0x246   : > { %v2182_v5 = vsub.s32 4, %v5189_v52  ;;  %v2242_v23 = vsel %vm2234_vm4, %v2225_v49, %v2241_v34  ;;  %v2245_v51 = vsel %vm2235_vm2, %v2231_v13, 1326507024  ;;  %v3507_v46 = vadd.s32 4294967169, %v2308_v16 }
 0x247   : > { %vm2088_vm7 = vcmp.eq.s32.totalorder %v5187_v57, 0  ;;  %v3501_v31 = vadd.s32 4294967294, %v2164_v27  ;;  %v2236_v54 = vsel %vm2232_vm1, %v2216_v60, %v2219_v53  ;;  %v2243_v0 = vsel %vm2233_vm3, %v2240_v41, %v2242_v23 }
 0x248   : > { %v2246_v50 = vsel %vm2234_vm4, %v2228_v63, %v2245_v51  ;;  %vm5243_vm8 = vcmp.le.f32.partialorder %v2096_v4, 0.7853982  ;;  %v2238_v18 = vsel %vm2234_vm4, %v2222_v6, %v2237_v9  ;;  %v2314_v4 = vadd.s32 1, %v3507_v46 }
 0x249   : > { %v2247_v19 = vsel %vm2233_vm3, %v2244_v3, %v2246_v50  ;;  %v5252_v2 = vmul.u32.u64.low %v5213_v25, %v2243_v0  ;;  %v5253_v59 = vmul.u32.u64.high %v5213_v25, %v2243_v0, %v5252_v2  ;;  %vm3502_vm9 = vcmp.lt.s32.totalorder %v3501_v31, 0 }
 0x24a   : > { %v5257_v43 = vmul.u32.u64.low %v5213_v25, %v2247_v19  ;;  %v5258_v53 = vmul.u32.u64.high %v5213_v25, %v2247_v19, %v5257_v43  ;;  %v2152_v36 = vadd.s32 %v5151_v61, %v5158_v39  ;;  %v2167_v20 = vsel %vm3502_vm9, 0, %v3501_v31 }
 0x24b   : > { %v2304_v6 = vand.u32 2147483647, %v5081_v11  ;;  %v3585_v32 = vadd.f32 %v4823_v44, %v4304_v28  ;;  %v2168_v49 = vsub.s32 32, %v2167_v20  ;;  %v2172_v63 = vsub.s32 4294967266, %v2167_v20 }
 0x24c   : > { %v2239_v13 = vsel %vm2233_vm3, %v2236_v54, %v2238_v18  ;;  %vm2315_vm10 = vcmp.gt.s32.totalorder %v2314_v4, 0  ;;  %v2183_v26 = vsel %vm2098_vm11, %v2182_v5, %v5189_v52  ;;  %v2258_v41 = vadd.s32 1, %v5253_v59 }
 0x24d   : > { %v3892_v16 = vpop.eup %3891  ;;  %v2316_v61 = vsel %vm2315_vm10, %v2314_v4, 0  ;;  %v5272_v39 = vadd.f32 %v3585_v32, %v4719_v42  ;;  %v2169_v44 = vshll.u32 %v5201_v45, %v2167_v20  ;;  %v2170_v60 = vshrl.u32 %v2152_v36, %v2168_v49 }
 0x24e   : > { %v3894_v34 = vpop.eup %3893  ;;  %v2092_v27 = vxor.u32 2147483648, %v3892_v16  ;;  %v2173_v9 = vadd.s32 127, %v2172_v63  ;;  %v2255_v3 = vmul.u32 %v5213_v25, %v2239_v13  ;;  %vm2257_vm13 = vc.u32 %v5258_v53, %v5252_v2 }
 0x24f   : > { %v2089_v55 = vxor.u32 2147483648, %v3894_v34  ;;  %v2318_v23 = vand.u32 31, %v2316_v61  ;;  %v2171_v5 = vor.u32 %v2170_v60, %v2169_v44  ;;  %v2259_v51 = vsel %vm2257_vm13, %v2258_v41, %v5253_v59 }
 0x250   : > { %v2093_v52 = vsel %vm2091_vm5, %v2092_v27, %v3894_v34  ;;  %v2174_v42 = vshll.u32 %v2173_v9, 23  ;;  %vm2087_vm12 = vcmp.lt.s32.totalorder %v5187_v57, 2  ;;  %v2260_v46 = vadd.s32 %v2259_v51, %v2255_v3 }
 0x251   : > { %v2090_v45 = vsel %vm2088_vm7, %v3892_v16, %v2089_v55  ;;  %v2319_v31 = vsub.s32 32, %v2318_v23  ;;  %vm2084_vm14 = vweird.f32 %v4925_v1  ;;  %v2185_v0 = vsel %vm5243_vm8, 0, %v2183_v26 }
 0x252   : > { %v2094_v25 = vsel %vm2087_vm12, %v2090_v45, %v2093_v52  ;;  %v2175_v54 = vor.u32 4788187, %v2174_v42  ;;  %v2261_v18 = vadd.s32 536870912, %v2260_v46  ;;  %v2311_v19 = vand.u32 8388607, %v2304_v6 }
 0x253   : > { %v2095_v50 = vsel %vm2084_vm14, nan, %v2094_v25  ;;  %v2322_v59 = vshrl.u32 %v4033_v24, %v2319_v31  ;;  %v2178_v57 = vcvt.s32.f32 %v2171_v5  ;;  %v2325_v4 = vshrl.u32 %v4034_v29, %v2319_v31 }
 0x254   : > { %3249 = vst [vmem:[%s4624_s6 + $0x40] sm:$0xff] %v2095_v50  ;;  %v2176_v43 = vand.u32 2147483647, %v2175_v54  ;;  %v2328_v36 = vshrl.u32 %v4035_v7, %v2319_v31  ;;  %v2262_v1 = vshrl.u32 %v2261_v18, 30  ;;  %v2321_v20 = vshll.u32 %v4032_v17, %v2318_v23 }
 0x255   : > { %v2324_v32 = vshll.u32 %v4033_v24, %v2318_v23  ;;  %v2331_v49 = vshrl.u32 %v4036_v21, %v2319_v31  ;;  %v2317_v13 = vshrl.u32 %v2316_v61, 5  ;;  %v2327_v16 = vshll.u32 %v4034_v29, %v2318_v23 }
 0x256   : > { %v2179_v63 = vmul.f32 %v2178_v57, %v2176_v43  ;;  %v2330_v26 = vshll.u32 %v4035_v7, %v2318_v23  ;;  %v2263_v41 = vshll.u32 %v2262_v1, 30  ;;  %v2323_v34 = vor.u32 %v2322_v59, %v2321_v20 }
 0x257   : > { %v2326_v27 = vor.u32 %v2325_v4, %v2324_v32  ;;  %v2334_v44 = vshrl.u32 %v4037_v33, %v2319_v31  ;;  %v2329_v9 = vor.u32 %v2328_v36, %v2327_v16  ;;  %v2333_v3 = vshll.u32 %v4036_v21, %v2318_v23 }
 0x258   : > { %v2180_v60 = vxor.u32 2147483648, %v2179_v63  ;;  %v2332_v55 = vor.u32 %v2331_v49, %v2330_v26  ;;  %v2189_v52 = vadd.s32 3, %v2185_v0  ;;  %v5300_v5 = vsub.s32 %v2260_v46, %v2263_v41 }
 0x259   : > { %v2312_v42 = vor.u32 8388608, %v2311_v19  ;;  %v2320_v61 = vshrl.u32 %v4032_v17, %v2319_v31  ;;  %v2286_v45 = vsub.s32 4, %v2262_v1  ;;  %v2335_v25 = vor.u32 %v2334_v44, %v2333_v3 }
 0x25a   : > { %v2181_v51 = vsel %vm2098_vm11, %v2180_v60, %v2179_v63  ;;  %vm2336_vm15 = vcmp.lt.s32.totalorder %v2317_v13, 1  ;;  %v2266_v50 = vsub.s32 0, %v5300_v5  ;;  %vm2338_vm0 = vcmp.lt.s32.totalorder %v2317_v13, 3 }
 0x25b   : > { %v2184_v54 = vsel %vm5243_vm8, %v4929_v14, %v2181_v51  ;;  %vm2339_vm1 = vcmp.lt.s32.totalorder %v2317_v13, 4  ;;  %v2344_v46 = vsel %vm2336_vm15, %v2323_v34, %v2326_v27  ;;  %vm2337_vm11 = vcmp.lt.s32.totalorder %v2317_v13, 2 }
 0x25c   : > { %3895 = vcosq.f32 %v2184_v54  ;;  %v2341_v23 = vsel %vm2339_vm1, %v2329_v9, 2102212464  ;;  %v2345_v0 = vsel %vm2339_vm1, %v2332_v55, 920167782  ;;  %v3504_v31 = vmin.u32 %v2266_v50, %v5300_v5 }
 0x25d   : > { %3897 = vsinq.f32 %v2184_v54  ;;  %v2346_v18 = vsel %vm2338_vm0, %v2329_v9, %v2345_v0  ;;  %v2348_v56 = vsel %vm2336_vm15, %v2326_v27, %v2329_v9  ;;  %v2349_v59 = vsel %vm2339_vm1, %v2335_v25, 1326507024 }
 0x25e   : > { %v2347_v19 = vsel %vm2337_vm11, %v2344_v46, %v2346_v18  ;;  %v2352_v43 = vshll.u32 %v2312_v42, 8  ;;  %v2190_v57 = vand.u32 3, %v2189_v52  ;;  %v2268_v4 = vclz %v3504_v31  ;;  %v5344_v42 = vpop.f32.mrb[19].mxu0  ;;  %v5354_v18 = vpop.f32.mrb[18].mxu1 }
 0x25f   : > { %v2340_v36 = vsel %vm2336_vm15, %v2320_v61, %v2323_v34  ;;  %v2342_v20 = vsel %vm2338_vm0, %v2326_v27, %v2341_v23  ;;  %vm2202_vm2 = vcmp.lt.s32.totalorder %v5078_v38, 0  ;;  %v2350_v32 = vsel %vm2338_vm0, %v2332_v55, %v2349_v59 }
 0x260   : > { %v5318_v49 = vmul.u32.u64.low %v2352_v43, %v2347_v19  ;;  %v5319_v63 = vmul.u32.u64.high %v2352_v43, %v2347_v19, %v5318_v49  ;;  %v3505_v16 = vadd.s32 4294967294, %v2268_v4  ;;  %v2287_v26 = vsel %vm2202_vm2, %v2286_v45, %v2262_v1 }
 0x261   : > { %v2351_v41 = vsel %vm2337_vm11, %v2348_v56, %v2350_v32  ;;  %v2411_v44 = vand.u32 2139095040, %v5272_v39  ;;  %vm5328_vm3 = vcmp.le.f32.partialorder %v2200_v48, 0.7853982  ;;  %v2343_v27 = vsel %vm2337_vm11, %v2340_v36, %v2342_v20 }
 0x262   : > { %v5333_v60 = vmul.u32.u64.low %v2352_v43, %v2351_v41  ;;  %v5334_v9 = vmul.u32.u64.high %v2352_v43, %v2351_v41, %v5333_v60  ;;  %vm2188_vm4 = vweird.f32 %v4929_v14  ;;  %vm2191_vm5 = vcmp.lt.s32.totalorder %v2190_v57, 2 }
 0x263   : > { %vm3506_vm7 = vcmp.lt.s32.totalorder %v3505_v16, 0  ;;  %v2412_v1 = vshrl.u32 %v2411_v44, 23  ;;  %v3587_v55 = vadd.f32 %v4919_v47, %v4306_v30  ;;  %v2256_v3 = vadd.s32 %v5252_v2, %v5258_v53 }
 0x264   : > { %v2271_v48 = vsel %vm3506_vm7, 0, %v3505_v16  ;;  %v2289_v52 = vsel %vm5328_vm3, 0, %v2287_v26  ;;  %v2362_v13 = vadd.s32 1, %v5319_v63  ;;  %v2359_v45 = vmul.u32 %v2352_v43, %v2343_v27 }
 0x265   : > { %v2272_v61 = vsub.s32 32, %v2271_v48  ;;  %v2276_v51 = vsub.s32 4294967266, %v2271_v48  ;;  %v3511_v25 = vadd.s32 4294967169, %v2412_v1  ;;  %v2273_v50 = vshll.u32 %v5300_v5, %v2271_v48 }
 0x266   : > { %v3896_v54 = vpop.eup %3895  ;;  %vm2361_vm8 = vc.u32 %v5334_v9, %v5318_v49  ;;  %v2408_v47 = vand.u32 2147483647, %v5272_v39  ;;  %v5351_v2 = vadd.f32 %v3587_v55, %v4803_v40  ;;  %vm2195_vm9 = vcmp.eq.s32.totalorder %v2190_v57, 2 }
 0x267   : > { %v3898_v53 = vpop.eup %3897  ;;  %v2196_v23 = vxor.u32 2147483648, %v3896_v54  ;;  %v2274_v46 = vshrl.u32 %v2256_v3, %v2272_v61  ;;  %v2277_v0 = vadd.s32 127, %v2276_v51  ;;  %v2363_v31 = vsel %vm2361_vm8, %v2362_v13, %v5319_v63 }
 0x268   : > { %v2193_v19 = vxor.u32 2147483648, %v3898_v53  ;;  %v2364_v56 = vadd.s32 %v2363_v31, %v2359_v45  ;;  %v2418_v5 = vadd.s32 1, %v3511_v25  ;;  %vm2192_vm10 = vcmp.eq.s32.totalorder %v2190_v57, 0 }
 0x269   : > { %v2197_v59 = vsel %vm2195_vm9, %v2196_v23, %v3898_v53  ;;  %v2275_v43 = vor.u32 %v2274_v46, %v2273_v50  ;;  %v2278_v4 = vshll.u32 %v2277_v0, 23  ;;  %v2293_v40 = vadd.s32 3, %v2289_v52 }
 0x26a   : > { %v2194_v36 = vsel %vm2192_vm10, %v3896_v54, %v2193_v19  ;;  %v2365_v20 = vadd.s32 536870912, %v2364_v56  ;;  %vm2419_vm13 = vcmp.gt.s32.totalorder %v2418_v5, 0  ;;  %v2415_v63 = vand.u32 8388607, %v2408_v47 }
 0x26b   : > { %v2198_v32 = vsel %vm2191_vm5, %v2194_v36, %v2197_v59  ;;  %v2279_v16 = vor.u32 4788187, %v2278_v4  ;;  %v2420_v26 = vsel %vm2419_vm13, %v2418_v5, 0  ;;  %v2282_v1 = vcvt.s32.f32 %v2275_v43 }
 0x26c   : > { %v2199_v41 = vsel %vm2188_vm4, nan, %v2198_v32  ;;  %v2366_v44 = vshrl.u32 %v2365_v20, 30  ;;  %v2422_v27 = vand.u32 31, %v2420_v26  ;;  %vm2306_vm12 = vcmp.lt.s32.totalorder %v5081_v11, 0 }
 0x26d   : > { %3250 = vst.msk [vmem:[%s4624_s6 + $0x48] sm:$0xff] %vm3241_vm6, %v2199_v41  ;;  %v2280_v60 = vand.u32 2147483647, %v2279_v16  ;;  %v5364_v48 = vand.u32 3, %v2293_v40  ;;  %v2416_v52 = vor.u32 8388608, %v2415_v63  ;;  %v5368_v13 = vadd.f32 %v4997_v62, %v4304_v28 }
 0x26e   : > { %v2367_v55 = vshll.u32 %v2366_v44, 30  ;;  %v2423_v3 = vsub.s32 32, %v2422_v27  ;;  %v2360_v14 = vadd.s32 %v5318_v49, %v5334_v9  ;;  %v5374_v51 = vshrl.u32 %v2420_v26, 5 }
 0x26f   : > { %v2283_v57 = vmul.f32 %v2282_v1, %v2280_v60  ;;  %v2425_v54 = vshll.u32 %v4032_v17, %v2422_v27  ;;  %v2428_v62 = vshll.u32 %v4033_v24, %v2422_v27  ;;  %v2431_v46 = vshll.u32 %v4034_v29, %v2422_v27 }
 0x270   : > { %v5372_v61 = vsub.s32 %v2364_v56, %v2367_v55  ;;  %v2426_v45 = vshrl.u32 %v4033_v24, %v2423_v3  ;;  %v2429_v50 = vshrl.u32 %v4034_v29, %v2423_v3  ;;  %v2432_v53 = vshrl.u32 %v4035_v7, %v2423_v3 }
 0x271   : > { %v2284_v25 = vxor.u32 2147483648, %v2283_v57  ;;  %v2435_v49 = vshrl.u32 %v4036_v21, %v2423_v3  ;;  %v2390_v0 = vsub.s32 4, %v2366_v44  ;;  %v2434_v19 = vshll.u32 %v4035_v7, %v2422_v27 }
 0x272   : > { %v2370_v23 = vsub.s32 0, %v5372_v61  ;;  %v2427_v31 = vor.u32 %v2426_v45, %v2425_v54  ;;  %v2430_v59 = vor.u32 %v2429_v50, %v2428_v62  ;;  %v2433_v43 = vor.u32 %v2432_v53, %v2431_v46 }
 0x273   : > { %v2285_v9 = vsel %vm2202_vm2, %v2284_v25, %v2283_v57  ;;  %v2436_v4 = vor.u32 %v2435_v49, %v2434_v19  ;;  %v2437_v36 = vshll.u32 %v4036_v21, %v2422_v27  ;;  %v2438_v40 = vshrl.u32 %v4037_v33, %v2423_v3 }
 0x274   : > { %v2288_v56 = vsel %vm5328_vm3, %v5078_v38, %v2285_v9  ;;  %v3508_v5 = vmin.u32 %v2370_v23, %v5372_v61  ;;  %vm5395_vm14 = vcmp.le.f32.partialorder %v2304_v6, 0.7853982  ;;  %v5399_v34 = vshll.u32 %v2416_v52, 8 }
 0x275   : > { %3899 = vcosq.f32 %v2288_v56  ;;  %v2515_v16 = vand.u32 2139095040, %v5351_v2  ;;  %v2391_v63 = vsel %vm2306_vm12, %v2390_v0, %v2366_v44  ;;  %v2439_v26 = vor.u32 %v2438_v40, %v2437_v36  ;;  %v5412_v44 = vpop.f32.mrb[19].mxu1 }
 0x276   : > { %3901 = vsinq.f32 %v2288_v56  ;;  %v2372_v32 = vclz %v3508_v5  ;;  %vm2440_vm15 = vcmp.lt.s32.totalorder %v5374_v51, 1  ;;  %vm2443_vm0 = vcmp.lt.s32.totalorder %v5374_v51, 4 }
 0x277   : > { %v2424_v27 = vshrl.u32 %v4032_v17, %v2423_v3  ;;  %v2445_v6 = vsel %vm2443_vm0, %v2433_v43, 2102212464  ;;  %v2448_v60 = vsel %vm2440_vm15, %v2427_v31, %v2430_v59  ;;  %vm2442_vm1 = vcmp.lt.s32.totalorder %v5374_v51, 3 }
 0x278   : > { %v3509_v41 = vadd.s32 4294967294, %v2372_v32  ;;  %v2449_v1 = vsel %vm2443_vm0, %v2436_v4, 920167782  ;;  %v2452_v55 = vsel %vm2440_vm15, %v2430_v59, %v2433_v43  ;;  %v2453_v57 = vsel %vm2443_vm0, %v2439_v26, 1326507024 }
 0x279   : > { %vm2296_vm11 = vcmp.eq.s32.totalorder %v5364_v48, 0  ;;  %vm2441_vm3 = vcmp.lt.s32.totalorder %v5374_v51, 2  ;;  %v2450_v3 = vsel %vm2442_vm1, %v2433_v43, %v2449_v1  ;;  %v2454_v52 = vsel %vm2442_vm1, %v2436_v4, %v2453_v57 }
 0x27a   : > { %vm3510_vm2 = vcmp.lt.s32.totalorder %v3509_v41, 0  ;;  %vm2295_vm4 = vcmp.lt.s32.totalorder %v5364_v48, 2  ;;  %v2444_v25 = vsel %vm2440_vm15, %v2424_v27, %v2427_v31  ;;  %v2451_v54 = vsel %vm2441_vm3, %v2448_v60, %v2450_v3 }
 0x27b   : > { %v2375_v45 = vsel %vm3510_vm2, 0, %v3509_v41  ;;  %v2455_v50 = vsel %vm2441_vm3, %v2452_v55, %v2454_v52  ;;  %vm2292_vm5 = vweird.f32 %v5078_v38  ;;  %v2446_v62 = vsel %vm2442_vm1, %v2430_v59, %v2445_v6 }
 0x27c   : > { %v2376_v53 = vsub.s32 32, %v2375_v45  ;;  %v2380_v23 = vsub.s32 4294967266, %v2375_v45  ;;  %v2516_v46 = vshrl.u32 %v2515_v16, 23  ;;  %v2377_v19 = vshll.u32 %v5372_v61, %v2375_v45 }
 0x27d   : > { %v5431_v49 = vmul.u32.u64.low %v5399_v34, %v2455_v50  ;;  %v5432_v9 = vmul.u32.u64.high %v5399_v34, %v2455_v50, %v5431_v49  ;;  %v5435_v0 = vmul.u32.u64.low %v5399_v34, %v2451_v54  ;;  %v5436_v31 = vmul.u32.u64.high %v5399_v34, %v2451_v54, %v5435_v0 }
 0x27e   : > { %v2378_v56 = vshrl.u32 %v2360_v14, %v2376_v53  ;;  %v2381_v5 = vadd.s32 127, %v2380_v23  ;;  %v3515_v43 = vadd.s32 4294967169, %v2516_v46  ;;  %vm2299_vm7 = vcmp.eq.s32.totalorder %v5364_v48, 2 }
 0x27f   : > { %v3900_v4 = vpop.eup %3899  ;;  %v2393_v59 = vsel %vm5395_vm14, 0, %v2391_v63  ;;  %v2447_v36 = vsel %vm2441_vm3, %v2444_v25, %v2446_v62  ;;  %v5447_v40 = vadd.f32 %v5368_v13, %v4916_v12  ;;  %vm2465_vm8 = vc.u32 %v5432_v9, %v5435_v0 }
 0x280   : > { %v3902_v32 = vpop.eup %3901  ;;  %v2300_v16 = vxor.u32 2147483648, %v3900_v4  ;;  %v2379_v26 = vor.u32 %v2378_v56, %v2377_v19  ;;  %v2382_v61 = vshll.u32 %v2381_v5, 23  ;;  %v2522_v14 = vadd.s32 1, %v3515_v43 }
 0x281   : > { %v2297_v41 = vxor.u32 2147483648, %v3902_v32  ;;  %v2466_v27 = vadd.s32 1, %v5436_v31  ;;  %v2512_v63 = vand.u32 2147483647, %v5351_v2  ;;  %v2463_v60 = vmul.u32 %v5399_v34, %v2447_v36 }
 0x282   : > { %v2301_v51 = vsel %vm2299_vm7, %v2300_v16, %v3902_v32  ;;  %v2383_v6 = vor.u32 4788187, %v2382_v61  ;;  %vm2523_vm9 = vcmp.gt.s32.totalorder %v2522_v14, 0  ;;  %v2397_v13 = vadd.s32 3, %v2393_v59 }
 0x283   : > { %v2298_v12 = vsel %vm2296_vm11, %v3900_v4, %v2297_v41  ;;  %v2467_v1 = vsel %vm2465_vm8, %v2466_v27, %v5436_v31  ;;  %v2524_v55 = vsel %vm2523_vm9, %v2522_v14, 0  ;;  %v2386_v52 = vcvt.s32.f32 %v2379_v26 }
 0x284   : > { %v2302_v57 = vsel %vm2295_vm4, %v2298_v12, %v2301_v51  ;;  %v2384_v3 = vand.u32 2147483647, %v2383_v6  ;;  %v2468_v45 = vadd.s32 %v2467_v1, %v2463_v60  ;;  %v2526_v54 = vand.u32 31, %v2524_v55 }
 0x285   : > { %v2303_v25 = vsel %vm2292_vm5, nan, %v2302_v57  ;;  %v5462_v53 = vand.u32 3, %v2397_v13  ;;  %v2519_v23 = vand.u32 8388607, %v2512_v63  ;;  %v2525_v62 = vshrl.u32 %v2524_v55, 5 }
 0x286   : > { %3251 = vst [vmem:[%s4624_s6 + $0x50] sm:$0xff] %v2303_v25  ;;  %v2387_v34 = vmul.f32 %v2386_v52, %v2384_v3  ;;  %v2469_v50 = vadd.s32 536870912, %v2468_v45  ;;  %v2527_v46 = vsub.s32 32, %v2526_v54  ;;  %v2529_v31 = vshll.u32 %v4032_v17, %v2526_v54 }
 0x287   : > { %v2532_v19 = vshll.u32 %v4033_v24, %v2526_v54  ;;  %v2535_v5 = vshll.u32 %v4034_v29, %v2526_v54  ;;  %v2538_v36 = vshll.u32 %v4035_v7, %v2526_v54  ;;  %v2520_v27 = vor.u32 8388608, %v2519_v23 }
 0x288   : > { %v2388_v49 = vxor.u32 2147483648, %v2387_v34  ;;  %v5466_v48 = vshrl.u32 %v2469_v50, 30  ;;  %v2530_v38 = vshrl.u32 %v4033_v24, %v2527_v46  ;;  %v2533_v56 = vshrl.u32 %v4034_v29, %v2527_v46 }
 0x289   : > { %v2536_v43 = vshrl.u32 %v4035_v7, %v2527_v46  ;;  %v2539_v32 = vshrl.u32 %v4036_v21, %v2527_v46  ;;  %v2541_v6 = vshll.u32 %v4036_v21, %v2526_v54  ;;  %v2542_v60 = vshrl.u32 %v4037_v33, %v2527_v46 }
 0x28a   : > { %v2389_v4 = vsel %vm2306_vm12, %v2388_v49, %v2387_v34  ;;  %v2471_v59 = vshll.u32 %v5466_v48, 30  ;;  %v2531_v26 = vor.u32 %v2530_v38, %v2529_v31  ;;  %v2534_v61 = vor.u32 %v2533_v56, %v2532_v19 }
 0x28b   : > { %v2392_v16 = vsel %vm5395_vm14, %v5081_v11, %v2389_v4  ;;  %v2537_v14 = vor.u32 %v2536_v43, %v2535_v5  ;;  %v2540_v51 = vor.u32 %v2539_v32, %v2538_v36  ;;  %v3591_v12 = vadd.f32 %v5074_v22, %v4306_v30 }
 0x28c   : > { %3903 = vcosq.f32 %v2392_v16  ;;  %v5482_v41 = vsub.s32 %v2468_v45, %v2471_v59  ;;  %vm2410_vm10 = vcmp.lt.s32.totalorder %v5272_v39, 0  ;;  %vm2544_vm13 = vcmp.lt.s32.totalorder %v2525_v62, 1 }
 0x28d   : > { %3905 = vsinq.f32 %v2392_v16  ;;  %vm2546_vm12 = vcmp.lt.s32.totalorder %v2525_v62, 3  ;;  %vm2547_vm14 = vcmp.lt.s32.totalorder %v2525_v62, 4  ;;  %v2543_v13 = vor.u32 %v2542_v60, %v2541_v6 }
 0x28e   : > { %v2474_v20 = vsub.s32 0, %v5482_v41  ;;  %v2549_v1 = vsel %vm2547_vm14, %v2537_v14, 2102212464  ;;  %v2552_v55 = vsel %vm2544_vm13, %v2531_v26, %v2534_v61  ;;  %v2553_v57 = vsel %vm2547_vm14, %v2540_v51, 920167782 }
 0x28f   : > { %vm2403_vm15 = vcmp.eq.s32.totalorder %v5462_v53, 2  ;;  %v2528_v52 = vshrl.u32 %v4032_v17, %v2527_v46  ;;  %vm2545_vm0 = vcmp.lt.s32.totalorder %v2525_v62, 2  ;;  %v2554_v22 = vsel %vm2546_vm12, %v2537_v14, %v2553_v57 }
 0x290   : > { %v3512_v3 = vmin.u32 %v2474_v20, %v5482_v41  ;;  %vm2400_vm1 = vcmp.eq.s32.totalorder %v5462_v53, 0  ;;  %v2555_v45 = vsel %vm2545_vm0, %v2552_v55, %v2554_v22  ;;  %v2556_v25 = vsel %vm2544_vm13, %v2534_v61, %v2537_v14 }
 0x291   : > { %v2557_v54 = vsel %vm2547_vm14, %v2543_v13, 1326507024  ;;  %v2560_v34 = vshll.u32 %v2520_v27, 8  ;;  %vm2399_vm11 = vcmp.lt.s32.totalorder %v5462_v53, 2  ;;  %vm5501_vm2 = vcmp.le.f32.partialorder %v2408_v47, 0.7853982 }
 0x292   : > { %v2476_v23 = vclz %v3512_v3  ;;  %v2548_v46 = vsel %vm2544_vm13, %v2528_v52, %v2531_v26  ;;  %v2550_v49 = vsel %vm2546_vm12, %v2534_v61, %v2549_v1  ;;  %v3593_v31 = vadd.f32 %v5162_v15, %v4304_v28 }
 0x293   : > { %vm2396_vm3 = vweird.f32 %v5081_v11  ;;  %v2494_v19 = vsub.s32 4, %v5466_v48  ;;  %v2558_v38 = vsel %vm2546_vm12, %v2540_v51, %v2557_v54  ;;  %v2464_v47 = vadd.s32 %v5435_v0, %v5432_v9 }
 0x294   : > { %v5512_v56 = vmul.u32.u64.low %v2560_v34, %v2555_v45  ;;  %v5513_v5 = vmul.u32.u64.high %v2560_v34, %v2555_v45, %v5512_v56  ;;  %v3513_v43 = vadd.s32 4294967294, %v2476_v23  ;;  %v2559_v4 = vsel %vm2545_vm0, %v2556_v25, %v2558_v38 }
 0x295   : > { %v2619_v59 = vand.u32 2139095040, %v5447_v40  ;;  %v2551_v36 = vsel %vm2545_vm0, %v2548_v46, %v2550_v49  ;;  %v5520_v15 = vmul.u32.u64.low %v2560_v34, %v2559_v4  ;;  %v5521_v32 = vmul.u32.u64.high %v2560_v34, %v2559_v4, %v5520_v15 }
 0x296   : > { %v2616_v16 = vand.u32 2147483647, %v5447_v40  ;;  %v3904_v26 = vpop.eup %3903  ;;  %vm3514_vm4 = vcmp.lt.s32.totalorder %v3513_v43, 0  ;;  %v5525_v14 = vadd.f32 %v3591_v12, %v4983_v35  ;;  %v5528_v9 = vadd.f32 %v3593_v31, %v5071_v37 }
 0x297   : > { %v2620_v61 = vshrl.u32 %v2619_v59, 23  ;;  %v3906_v0 = vpop.eup %3905  ;;  %v2404_v27 = vxor.u32 2147483648, %v3904_v26  ;;  %v2479_v51 = vsel %vm3514_vm4, 0, %v3513_v43  ;;  %v2495_v62 = vsel %vm2410_vm10, %v2494_v19, %v5466_v48 }
 0x298   : > { %v2570_v6 = vadd.s32 1, %v5513_v5  ;;  %v2401_v60 = vxor.u32 2147483648, %v3906_v0  ;;  %v2480_v20 = vsub.s32 32, %v2479_v51  ;;  %v2484_v13 = vsub.s32 4294967266, %v2479_v51 }
 0x299   : > { %v2567_v1 = vmul.u32 %v2560_v34, %v2551_v36  ;;  %v2405_v35 = vsel %vm2403_vm15, %v2404_v27, %v3906_v0  ;;  %v2481_v37 = vshll.u32 %v5482_v41, %v2479_v51  ;;  %vm2569_vm5 = vc.u32 %v5521_v32, %v5512_v56 }
 0x29a   : > { %v3519_v12 = vadd.s32 4294967169, %v2620_v61  ;;  %v2402_v55 = vsel %vm2400_vm1, %v3904_v26, %v2401_v60  ;;  %v2482_v57 = vshrl.u32 %v2464_v47, %v2480_v20  ;;  %v2485_v48 = vadd.s32 127, %v2484_v13 }
 0x29b   : > { %v2571_v3 = vsel %vm2569_vm5, %v2570_v6, %v5513_v5  ;;  %v2406_v52 = vsel %vm2399_vm11, %v2402_v55, %v2405_v35  ;;  %v2497_v22 = vsel %vm5501_vm2, 0, %v2495_v62  ;;  %v2623_v53 = vand.u32 8388607, %v2616_v16 }
 0x29c   : > { %v2572_v45 = vadd.s32 %v2571_v3, %v2567_v1  ;;  %v2626_v25 = vadd.s32 1, %v3519_v12  ;;  %v2407_v41 = vsel %vm2396_vm3, nan, %v2406_v52  ;;  %v2483_v54 = vor.u32 %v2482_v57, %v2481_v37 }
 0x29d   : > { %v2486_v34 = vshll.u32 %v2485_v48, 23  ;;  %3252 = vst.msk [vmem:[%s4624_s6 + $0x58] sm:$0xff] %vm3241_vm6, %v2407_v41  ;;  %v2501_v49 = vadd.s32 3, %v2497_v22  ;;  %v2624_v36 = vor.u32 8388608, %v2623_v53  ;;  %v2568_v15 = vadd.s32 %v5512_v56, %v5521_v32 }
 0x29e   : > { %v2573_v23 = vadd.s32 536870912, %v2572_v45  ;;  %vm2627_vm7 = vcmp.gt.s32.totalorder %v2626_v25, 0  ;;  %v2490_v47 = vcvt.s32.f32 %v2483_v54  ;;  %v2723_v0 = vand.u32 2139095040, %v5525_v14 }
 0x29f   : > { %v2487_v46 = vor.u32 4788187, %v2486_v34  ;;  %v2628_v31 = vsel %vm2627_vm7, %v2626_v25, 0  ;;  %v5554_v59 = vand.u32 3, %v2501_v49  ;;  %vm2514_vm8 = vcmp.lt.s32.totalorder %v5351_v2, 0 }
 0x2a0   : > { %v5551_v19 = vshrl.u32 %v2573_v23, 30  ;;  %v2630_v38 = vand.u32 31, %v2628_v31  ;;  %v2629_v1 = vshrl.u32 %v2628_v31, 5  ;;  %v5578_v25 = vshll.u32 %v2624_v36, 8 }
 0x2a1   : > { %v2488_v5 = vand.u32 2147483647, %v2487_v46  ;;  %v2724_v41 = vshrl.u32 %v2723_v0, 23  ;;  %vm5586_vm12 = vcmp.le.f32.partialorder %v2512_v63, 0.7853982  ;;  %vm2503_vm0 = vcmp.lt.s32.totalorder %v5554_v59, 2 }
 0x2a2   : > { %v2575_v11 = vshll.u32 %v5551_v19, 30  ;;  %v2631_v43 = vsub.s32 32, %v2630_v38  ;;  %v2633_v51 = vshll.u32 %v4032_v17, %v2630_v38  ;;  %v2636_v20 = vshll.u32 %v4033_v24, %v2630_v38 }
 0x2a3   : > { %v2491_v4 = vmul.f32 %v2490_v47, %v2488_v5  ;;  %v2639_v13 = vshll.u32 %v4034_v29, %v2630_v38  ;;  %v2642_v37 = vshll.u32 %v4035_v7, %v2630_v38  ;;  %v2645_v52 = vshll.u32 %v4036_v21, %v2630_v38 }
 0x2a4   : > { %v5557_v26 = vsub.s32 %v2572_v45, %v2575_v11  ;;  %v2634_v61 = vshrl.u32 %v4033_v24, %v2631_v43  ;;  %v2637_v62 = vshrl.u32 %v4034_v29, %v2631_v43  ;;  %v2640_v6 = vshrl.u32 %v4035_v7, %v2631_v43 }
 0x2a5   : > { %v2492_v27 = vxor.u32 2147483648, %v2491_v4  ;;  %v2643_v56 = vshrl.u32 %v4036_v21, %v2631_v43  ;;  %v2646_v22 = vshrl.u32 %v4037_v33, %v2631_v43  ;;  %v2598_v50 = vsub.s32 4, %v5551_v19 }
 0x2a6   : > { %v2578_v60 = vsub.s32 0, %v5557_v26  ;;  %v2635_v35 = vor.u32 %v2634_v61, %v2633_v51  ;;  %v2638_v57 = vor.u32 %v2637_v62, %v2636_v20  ;;  %v2641_v48 = vor.u32 %v2640_v6, %v2639_v13 }
 0x2a7   : > { %v2493_v32 = vsel %vm2410_vm10, %v2492_v27, %v2491_v4  ;;  %v2644_v3 = vor.u32 %v2643_v56, %v2642_v37  ;;  %v2632_v54 = vshrl.u32 %v4032_v17, %v2631_v43  ;;  %v2647_v34 = vor.u32 %v2646_v22, %v2645_v52 }
 0x2a8   : > { %v2496_v12 = vsel %vm5501_vm2, %v5272_v39, %v2493_v32  ;;  %v3516_v55 = vmin.u32 %v2578_v60, %v5557_v26  ;;  %vm2648_vm9 = vcmp.lt.s32.totalorder %v2629_v1, 1  ;;  %vm2650_vm10 = vcmp.lt.s32.totalorder %v2629_v1, 3 }
 0x2a9   : > { %3907 = vcosq.f32 %v2496_v12  ;;  %vm2651_vm13 = vcmp.lt.s32.totalorder %v2629_v1, 4  ;;  %v2656_v46 = vsel %vm2648_vm9, %v2635_v35, %v2638_v57  ;;  %v2660_v31 = vsel %vm2648_vm9, %v2638_v57, %v2641_v48 }
 0x2aa   : > { %3909 = vsinq.f32 %v2496_v12  ;;  %v2580_v45 = vclz %v3516_v55  ;;  %v2653_v49 = vsel %vm2651_vm13, %v2641_v48, 2102212464  ;;  %v2657_v53 = vsel %vm2651_vm13, %v2644_v3, 920167782 }
 0x2ab   : > { %v2661_v38 = vsel %vm2651_vm13, %v2647_v34, 1326507024  ;;  %vm2649_vm15 = vcmp.lt.s32.totalorder %v2629_v1, 2  ;;  %v2658_v47 = vsel %vm2650_vm10, %v2641_v48, %v2657_v53  ;;  %v2652_v4 = vsel %vm2648_vm9, %v2632_v54, %v2635_v35 }
 0x2ac   : > { %v3517_v23 = vadd.s32 4294967294, %v2580_v45  ;;  %v2662_v11 = vsel %vm2650_vm10, %v2644_v3, %v2661_v38  ;;  %v2659_v36 = vsel %vm2649_vm15, %v2656_v46, %v2658_v47  ;;  %vm2500_vm1 = vweird.f32 %v5272_v39 }
 0x2ad   : > { %v2663_v61 = vsel %vm2649_vm15, %v2660_v31, %v2662_v11  ;;  %v2654_v27 = vsel %vm2650_vm10, %v2638_v57, %v2653_v49  ;;  %v3523_v51 = vadd.s32 4294967169, %v2724_v41  ;;  %vm2504_vm11 = vcmp.eq.s32.totalorder %v5554_v59, 0 }
 0x2ae   : > { %vm3518_vm14 = vcmp.lt.s32.totalorder %v3517_v23, 0  ;;  %v5599_v62 = vmul.u32.u64.low %v5578_v25, %v2663_v61  ;;  %v5600_v6 = vmul.u32.u64.high %v5578_v25, %v2663_v61, %v5599_v62  ;;  %vm2507_vm2 = vcmp.eq.s32.totalorder %v5554_v59, 2 }
 0x2af   : > { %v2583_v43 = vsel %vm3518_vm14, 0, %v3517_v23  ;;  %v5603_v60 = vmul.u32.u64.low %v5578_v25, %v2659_v36  ;;  %v5604_v20 = vmul.u32.u64.high %v5578_v25, %v2659_v36, %v5603_v60  ;;  %v2730_v35 = vadd.s32 1, %v3523_v51 }
 0x2b0   : > { %v2584_v63 = vsub.s32 32, %v2583_v43  ;;  %v2588_v0 = vsub.s32 4294967266, %v2583_v43  ;;  %v2585_v13 = vshll.u32 %v5557_v26, %v2583_v43  ;;  %v2599_v12 = vsel %vm2514_vm8, %v2598_v50, %v5551_v19 }
 0x2b1   : > { %v2655_v55 = vsel %vm2649_vm15, %v2652_v4, %v2654_v27  ;;  %vm2731_vm3 = vcmp.gt.s32.totalorder %v2730_v35, 0  ;;  %vm2673_vm4 = vc.u32 %v5600_v6, %v5603_v60  ;;  %v2720_v22 = vand.u32 2147483647, %v5525_v14 }
 0x2b2   : > { %v2586_v56 = vshrl.u32 %v2568_v15, %v2584_v63  ;;  %v2589_v32 = vadd.s32 127, %v2588_v0  ;;  %v2674_v15 = vadd.s32 1, %v5604_v20  ;;  %v2671_v19 = vmul.u32 %v5578_v25, %v2655_v55 }
 0x2b3   : > { %v3908_v37 = vpop.eup %3907  ;;  %v2732_v1 = vsel %vm2731_vm3, %v2730_v35, 0  ;;  %v2601_v54 = vsel %vm5586_vm12, 0, %v2599_v12  ;;  %v2727_v25 = vand.u32 8388607, %v2720_v22  ;;  %v5632_v11 = vadd.f32 %v5239_v8, %v4306_v30 }
 0x2b4   : > { %v3910_v57 = vpop.eup %3909  ;;  %v2508_v48 = vxor.u32 2147483648, %v3908_v37  ;;  %v2587_v3 = vor.u32 %v2586_v56, %v2585_v13  ;;  %v2590_v52 = vshll.u32 %v2589_v32, 23  ;;  %v2675_v34 = vsel %vm2673_vm4, %v2674_v15, %v5604_v20 }
 0x2b5   : > { %v2505_v26 = vxor.u32 2147483648, %v3910_v57  ;;  %v2734_v23 = vand.u32 31, %v2732_v1  ;;  %v2676_v31 = vadd.s32 %v2675_v34, %v2671_v19  ;;  %v2605_v4 = vadd.s32 3, %v2601_v54 }
 0x2b6   : > { %v2509_v45 = vsel %vm2507_vm2, %v2508_v48, %v3910_v57  ;;  %v2591_v41 = vor.u32 4788187, %v2590_v52  ;;  %v2594_v53 = vcvt.s32.f32 %v2587_v3  ;;  %v2733_v59 = vshrl.u32 %v2732_v1, 5 }
 0x2b7   : > { %v2506_v50 = vsel %vm2504_vm11, %v3908_v37, %v2505_v26  ;;  %v2735_v47 = vsub.s32 32, %v2734_v23  ;;  %v2677_v36 = vadd.s32 536870912, %v2676_v31  ;;  %v2737_v61 = vshll.u32 %v4032_v17, %v2734_v23 }
 0x2b8   : > { %v2510_v46 = vsel %vm2503_vm0, %v2506_v50, %v2509_v45  ;;  %v2592_v49 = vand.u32 2147483647, %v2591_v41  ;;  %v2740_v62 = vshll.u32 %v4033_v24, %v2734_v23  ;;  %v2743_v20 = vshll.u32 %v4034_v29, %v2734_v23 }
 0x2b9   : > { %v2511_v38 = vsel %vm2500_vm1, nan, %v2510_v46  ;;  %v2738_v63 = vshrl.u32 %v4033_v24, %v2735_v47  ;;  %v2741_v39 = vshrl.u32 %v4034_v29, %v2735_v47  ;;  %v2744_v0 = vshrl.u32 %v4035_v7, %v2735_v47 }
 0x2ba   : > { %3253 = vst [vmem:[%s4624_s6 + $0x60] sm:$0xff] %v2511_v38  ;;  %v2595_v43 = vmul.f32 %v2594_v53, %v2592_v49  ;;  %v5639_v51 = vshrl.u32 %v2677_v36, 30  ;;  %v2747_v8 = vshrl.u32 %v4036_v21, %v2735_v47  ;;  %v2746_v13 = vshll.u32 %v4035_v7, %v2734_v23 }
 0x2bb   : > { %v2749_v56 = vshll.u32 %v4036_v21, %v2734_v23  ;;  %v2750_v32 = vshrl.u32 %v4037_v33, %v2735_v47  ;;  %v2739_v12 = vor.u32 %v2738_v63, %v2737_v61  ;;  %v2742_v55 = vor.u32 %v2741_v39, %v2740_v62 }
 0x2bc   : > { %v2596_v27 = vxor.u32 2147483648, %v2595_v43  ;;  %v2679_v37 = vshll.u32 %v5639_v51, 30  ;;  %v2745_v48 = vor.u32 %v2744_v0, %v2743_v20  ;;  %v2748_v3 = vor.u32 %v2747_v8, %v2746_v13 }
 0x2bd   : > { %v2751_v52 = vor.u32 %v2750_v32, %v2749_v56  ;;  %v5653_v26 = vand.u32 3, %v2605_v4  ;;  %v2824_v45 = vand.u32 2147483647, %v5528_v9  ;;  %v2728_v41 = vor.u32 8388608, %v2727_v25 }
 0x2be   : > { %v2597_v35 = vsel %vm2514_vm8, %v2596_v27, %v2595_v43  ;;  %v5655_v15 = vsub.s32 %v2676_v31, %v2679_v37  ;;  %vm2752_vm5 = vcmp.lt.s32.totalorder %v2733_v59, 1  ;;  %v2827_v19 = vand.u32 2139095040, %v5528_v9 }
 0x2bf   : > { %v2600_v57 = vsel %vm5586_vm12, %v5351_v2, %v2597_v35  ;;  %vm2754_vm7 = vcmp.lt.s32.totalorder %v2733_v59, 3  ;;  %vm2755_vm8 = vcmp.lt.s32.totalorder %v2733_v59, 4  ;;  %v2760_v5 = vsel %vm2752_vm5, %v2739_v12, %v2742_v55 }
 0x2c0   : > { %3911 = vcosq.f32 %v2600_v57  ;;  %v2682_v1 = vsub.s32 0, %v5655_v15  ;;  %v2736_v50 = vshrl.u32 %v4032_v17, %v2735_v47  ;;  %v2757_v54 = vsel %vm2755_vm8, %v2745_v48, 2102212464 }
 0x2c1   : > { %3913 = vsinq.f32 %v2600_v57  ;;  %v2761_v34 = vsel %vm2755_vm8, %v2748_v3, 920167782  ;;  %v2765_v23 = vsel %vm2755_vm8, %v2751_v52, 1326507024  ;;  %vm2753_vm9 = vcmp.lt.s32.totalorder %v2733_v59, 2 }
 0x2c2   : > { %v3520_v46 = vmin.u32 %v2682_v1, %v5655_v15  ;;  %v2762_v49 = vsel %vm2754_vm7, %v2745_v48, %v2761_v34  ;;  %v2764_v53 = vsel %vm2752_vm5, %v2742_v55, %v2745_v48  ;;  %v2766_v38 = vsel %vm2754_vm7, %v2748_v3, %v2765_v23 }
 0x2c3   : > { %v2763_v31 = vsel %vm2753_vm9, %v2760_v5, %v2762_v49  ;;  %v2768_v25 = vshll.u32 %v2728_v41, 8  ;;  %v2828_v43 = vshrl.u32 %v2827_v19, 23  ;;  %vm2607_vm10 = vcmp.lt.s32.totalorder %v5653_v26, 2 }
 0x2c4   : > { %vm2618_vm13 = vcmp.lt.s32.totalorder %v5447_v40, 0  ;;  %v2684_v47 = vclz %v3520_v46  ;;  %v2756_v4 = vsel %vm2752_vm5, %v2736_v50, %v2739_v12  ;;  %v2758_v36 = vsel %vm2754_vm7, %v2742_v55, %v2757_v54 }
 0x2c5   : > { %vm2604_vm12 = vweird.f32 %v5351_v2  ;;  %v2767_v61 = vsel %vm2753_vm9, %v2764_v53, %v2766_v38  ;;  %v5673_v63 = vmul.u32.u64.low %v2768_v25, %v2763_v31  ;;  %v5674_v39 = vmul.u32.u64.high %v2768_v25, %v2763_v31, %v5673_v63 }
 0x2c6   : > { %v3527_v0 = vadd.s32 4294967169, %v2828_v43  ;;  %vm2608_vm14 = vcmp.eq.s32.totalorder %v5653_v26, 0  ;;  %v3521_v27 = vadd.s32 4294967294, %v2684_v47  ;;  %vm2611_vm15 = vcmp.eq.s32.totalorder %v5653_v26, 2 }
 0x2c7   : > { %v5678_v62 = vmul.u32.u64.low %v2768_v25, %v2767_v61  ;;  %v5679_v8 = vmul.u32.u64.high %v2768_v25, %v2767_v61, %v5678_v62  ;;  %v2759_v20 = vsel %vm2753_vm9, %v2756_v4, %v2758_v36  ;;  %v5685_v56 = vadd.f32 %v5632_v11, %v5146_v10 }
 0x2c8   : > { %v2834_v13 = vadd.s32 1, %v3527_v0  ;;  %v2672_v35 = vadd.s32 %v5603_v60, %v5600_v6  ;;  %vm3522_vm0 = vcmp.lt.s32.totalorder %v3521_v27, 0  ;;  %v2702_v37 = vsub.s32 4, %v5639_v51 }
 0x2c9   : > { %v2831_v12 = vand.u32 8388607, %v2824_v45  ;;  %v2687_v48 = vsel %vm3522_vm0, 0, %v3521_v27  ;;  %v2778_v59 = vadd.s32 1, %v5674_v39  ;;  %v2775_v11 = vmul.u32 %v2768_v25, %v2759_v20 }
 0x2ca   : > { %v3912_v32 = vpop.eup %3911  ;;  %vm2835_vm1 = vcmp.gt.s32.totalorder %v2834_v13, 0  ;;  %v2688_v52 = vsub.s32 32, %v2687_v48  ;;  %v2692_v10 = vsub.s32 4294967266, %v2687_v48  ;;  %v2689_v60 = vshll.u32 %v5655_v15, %v2687_v48 }
 0x2cb   : > { %v3914_v55 = vpop.eup %3913  ;;  %v2612_v57 = vxor.u32 2147483648, %v3912_v32  ;;  %vm2777_vm11 = vc.u32 %v5679_v8, %v5673_v63  ;;  %v2836_v41 = vsel %vm2835_vm1, %v2834_v13, 0  ;;  %v2703_v34 = vsel %vm2618_vm13, %v2702_v37, %v5639_v51 }
 0x2cc   : > { %v2609_v3 = vxor.u32 2147483648, %v3914_v55  ;;  %v2690_v1 = vshrl.u32 %v2672_v35, %v2688_v52  ;;  %v2693_v5 = vadd.s32 127, %v2692_v10  ;;  %v2779_v50 = vsel %vm2777_vm11, %v2778_v59, %v5674_v39 }
 0x2cd   : > { %v2613_v6 = vsel %vm2611_vm15, %v2612_v57, %v3914_v55  ;;  %v2780_v23 = vadd.s32 %v2779_v50, %v2775_v11  ;;  %v2838_v15 = vand.u32 31, %v2836_v41  ;;  %vm5712_vm2 = vcmp.le.f32.partialorder %v2616_v16, 0.7853982 }
 0x2ce   : > { %v2610_v19 = vsel %vm2608_vm14, %v3912_v32, %v2609_v3  ;;  %v2691_v49 = vor.u32 %v2690_v1, %v2689_v60  ;;  %v2694_v53 = vshll.u32 %v2693_v5, 23  ;;  %v2705_v51 = vsel %vm5712_vm2, 0, %v2703_v34 }
 0x2cf   : > { %v2614_v54 = vsel %vm2607_vm10, %v2610_v19, %v2613_v6  ;;  %v2781_v26 = vadd.s32 536870912, %v2780_v23  ;;  %v2839_v38 = vsub.s32 32, %v2838_v15  ;;  %v2832_v43 = vor.u32 8388608, %v2831_v12 }
 0x2d0   : > { %v2615_v46 = vsel %vm2604_vm12, nan, %v2614_v54  ;;  %v2695_v25 = vor.u32 4788187, %v2694_v53  ;;  %v2837_v47 = vshrl.u32 %v2836_v41, 5  ;;  %v2698_v2 = vcvt.s32.f32 %v2691_v49 }
 0x2d1   : > { %3254 = vst.msk [vmem:[%s4624_s6 + $0x68] sm:$0xff] %vm3241_vm6, %v2615_v46  ;;  %v5718_v4 = vshrl.u32 %v2781_v26, 30  ;;  %v2842_v36 = vshrl.u32 %v4033_v24, %v2839_v38  ;;  %v2845_v61 = vshrl.u32 %v4034_v29, %v2839_v38  ;;  %v2848_v16 = vshrl.u32 %v4035_v7, %v2839_v38 }
 0x2d2   : > { %v2696_v39 = vand.u32 2147483647, %v2695_v25  ;;  %v2850_v0 = vshll.u32 %v4035_v7, %v2838_v15  ;;  %v2851_v27 = vshrl.u32 %v4036_v21, %v2839_v38  ;;  %v2841_v20 = vshll.u32 %v4032_v17, %v2838_v15 }
 0x2d3   : > { %v2783_v62 = vshll.u32 %v5718_v4, 30  ;;  %v2844_v13 = vshll.u32 %v4033_v24, %v2838_v15  ;;  %v2847_v32 = vshll.u32 %v4034_v29, %v2838_v15  ;;  %v2854_v12 = vshrl.u32 %v4037_v33, %v2839_v38 }
 0x2d4   : > { %v2699_v35 = vmul.f32 %v2698_v2, %v2696_v39  ;;  %v2852_v37 = vor.u32 %v2851_v27, %v2850_v0  ;;  %v2843_v57 = vor.u32 %v2842_v36, %v2841_v20  ;;  %v2709_v52 = vadd.s32 3, %v2705_v51 }
 0x2d5   : > { %v5730_v55 = vsub.s32 %v2780_v23, %v2783_v62  ;;  %v2846_v48 = vor.u32 %v2845_v61, %v2844_v13  ;;  %v2849_v59 = vor.u32 %v2848_v16, %v2847_v32  ;;  %v2853_v10 = vshll.u32 %v4036_v21, %v2838_v15 }
 0x2d6   : > { %v2700_v3 = vxor.u32 2147483648, %v2699_v35  ;;  %v3597_v11 = vadd.f32 %v5354_v18, %v4304_v28  ;;  %vm2856_vm3 = vcmp.lt.s32.totalorder %v2837_v47, 1  ;;  %vm2859_vm4 = vcmp.lt.s32.totalorder %v2837_v47, 4 }
 0x2d7   : > { %v2786_v6 = vsub.s32 0, %v5730_v55  ;;  %v2872_v60 = vshll.u32 %v2832_v43, 8  ;;  %v2855_v19 = vor.u32 %v2854_v12, %v2853_v10  ;;  %vm2858_vm5 = vcmp.lt.s32.totalorder %v2837_v47, 3 }
 0x2d8   : > { %v2701_v41 = vsel %vm2618_vm13, %v2700_v3, %v2699_v35  ;;  %v2865_v1 = vsel %vm2859_vm4, %v2852_v37, 920167782  ;;  %v2861_v28 = vsel %vm2859_vm4, %v2849_v59, 2102212464  ;;  %v2864_v18 = vsel %vm2856_vm3, %v2843_v57, %v2846_v48 }
 0x2d9   : > { %v2704_v5 = vsel %vm5712_vm2, %v5447_v40, %v2701_v41  ;;  %v3524_v50 = vmin.u32 %v2786_v6, %v5730_v55  ;;  %v2806_v54 = vsub.s32 4, %v5718_v4  ;;  %v2840_v34 = vshrl.u32 %v4032_v17, %v2839_v38 }
 0x2da   : > { %3915 = vcosq.f32 %v2704_v5  ;;  %v2866_v23 = vsel %vm2858_vm5, %v2849_v59, %v2865_v1  ;;  %vm2857_vm7 = vcmp.lt.s32.totalorder %v2837_v47, 2  ;;  %v2868_v46 = vsel %vm2856_vm3, %v2846_v48, %v2849_v59 }
 0x2db   : > { %3917 = vsinq.f32 %v2704_v5  ;;  %v2788_v15 = vclz %v3524_v50  ;;  %v2860_v49 = vsel %vm2856_vm3, %v2840_v34, %v2843_v57  ;;  %v2862_v53 = vsel %vm2858_vm5, %v2846_v48, %v2861_v28 }
 0x2dc   : > { %v2867_v31 = vsel %vm2857_vm7, %v2864_v18, %v2866_v23  ;;  %v2869_v26 = vsel %vm2859_vm4, %v2855_v19, 1326507024  ;;  %v2710_v38 = vand.u32 3, %v2709_v52  ;;  %vm2722_vm8 = vcmp.lt.s32.totalorder %v5525_v14, 0 }
 0x2dd   : > { %v3525_v25 = vadd.s32 4294967294, %v2788_v15  ;;  %v2870_v51 = vsel %vm2858_vm5, %v2852_v37, %v2869_v26  ;;  %v5753_v43 = vmul.u32.u64.low %v2872_v60, %v2867_v31  ;;  %v5754_v2 = vmul.u32.u64.high %v2872_v60, %v2867_v31, %v5753_v43 }
 0x2de   : > { %v2871_v36 = vsel %vm2857_vm7, %v2868_v46, %v2870_v51  ;;  %v2931_v61 = vand.u32 2139095040, %v5685_v56  ;;  %v2863_v39 = vsel %vm2857_vm7, %v2860_v49, %v2862_v53  ;;  %v2776_v27 = vadd.s32 %v5673_v63, %v5679_v8 }
 0x2df   : > { %vm3526_vm9 = vcmp.lt.s32.totalorder %v3525_v25, 0  ;;  %v5759_v16 = vmul.u32.u64.low %v2872_v60, %v2871_v36  ;;  %v5760_v0 = vmul.u32.u64.high %v2872_v60, %v2871_v36, %v5759_v16  ;;  %v5765_v20 = vadd.f32 %v3597_v11, %v5230_v58 }
 0x2e0   : > { %v2791_v47 = vsel %vm3526_vm9, 0, %v3525_v25  ;;  %v2932_v62 = vshrl.u32 %v2931_v61, 23  ;;  %vm2708_vm10 = vweird.f32 %v5447_v40  ;;  %v2807_v35 = vsel %vm2722_vm8, %v2806_v54, %v5718_v4 }
 0x2e1   : > { %v2792_v13 = vsub.s32 32, %v2791_v47  ;;  %v2796_v32 = vsub.s32 4294967266, %v2791_v47  ;;  %v2882_v37 = vadd.s32 1, %v5754_v2  ;;  %vm2711_vm13 = vcmp.lt.s32.totalorder %v2710_v38, 2 }
 0x2e2   : > { %vm5774_vm12 = vcmp.le.f32.partialorder %v2720_v22, 0.7853982  ;;  %v2879_v8 = vmul.u32 %v2872_v60, %v2863_v39  ;;  %v3531_v58 = vadd.s32 4294967169, %v2932_v62  ;;  %v2793_v12 = vshll.u32 %v5730_v55, %v2791_v47 }
 0x2e3   : > { %v2794_v57 = vshrl.u32 %v2776_v27, %v2792_v13  ;;  %v2797_v48 = vadd.s32 127, %v2796_v32  ;;  %vm2881_vm14 = vc.u32 %v5760_v0, %v5753_v43  ;;  %v2809_v4 = vsel %vm5774_vm12, 0, %v2807_v35 }
 0x2e4   : > { %v3916_v59 = vpop.eup %3915  ;;  %v2883_v3 = vsel %vm2881_vm14, %v2882_v37, %v5754_v2  ;;  %v2928_v22 = vand.u32 2147483647, %v5685_v56  ;;  %v2938_v52 = vadd.s32 1, %v3531_v58  ;;  %vm2712_vm15 = vcmp.eq.s32.totalorder %v2710_v38, 0 }
 0x2e5   : > { %v3918_v10 = vpop.eup %3917  ;;  %v2716_v11 = vxor.u32 2147483648, %v3916_v59  ;;  %v2795_v6 = vor.u32 %v2794_v57, %v2793_v12  ;;  %v2798_v60 = vshll.u32 %v2797_v48, 23  ;;  %v2884_v41 = vadd.s32 %v2883_v3, %v2879_v8 }
 0x2e6   : > { %v2713_v55 = vxor.u32 2147483648, %v3918_v10  ;;  %vm2715_vm0 = vcmp.eq.s32.totalorder %v2710_v38, 2  ;;  %vm2939_vm1 = vcmp.gt.s32.totalorder %v2938_v52, 0  ;;  %v2813_v5 = vadd.s32 3, %v2809_v4 }
 0x2e7   : > { %v2717_v19 = vsel %vm2715_vm0, %v2716_v11, %v3918_v10  ;;  %v2799_v1 = vor.u32 4788187, %v2798_v60  ;;  %v2885_v50 = vadd.s32 536870912, %v2884_v41  ;;  %v2935_v18 = vand.u32 8388607, %v2928_v22 }
 0x2e8   : > { %v2714_v28 = vsel %vm2712_vm15, %v3916_v59, %v2713_v55  ;;  %v2940_v54 = vsel %vm2939_vm1, %v2938_v52, 0  ;;  %v3035_v34 = vand.u32 2139095040, %v5765_v20  ;;  %v2802_v46 = vcvt.s32.f32 %v2795_v6 }
 0x2e9   : > { %v2718_v23 = vsel %vm2711_vm13, %v2714_v28, %v2717_v19  ;;  %v2800_v15 = vand.u32 2147483647, %v2799_v1  ;;  %v5789_v49 = vshrl.u32 %v2885_v50, 30  ;;  %v2942_v31 = vand.u32 31, %v2940_v54 }
 0x2ea   : > { %v2719_v53 = vsel %vm2708_vm10, nan, %v2718_v23  ;;  %v5797_v51 = vadd.f32 %v5412_v44, %v4306_v30  ;;  %v5799_v2 = vand.u32 3, %v2813_v5  ;;  %v2936_v38 = vor.u32 8388608, %v2935_v18 }
 0x2eb   : > { %3255 = vst [vmem:[%s4624_s6 + $0x70] sm:$0xff] %v2719_v53  ;;  %v2803_v26 = vmul.f32 %v2802_v46, %v2800_v15  ;;  %v2887_v25 = vshll.u32 %v5789_v49, 30  ;;  %v2943_v36 = vsub.s32 32, %v2942_v31  ;;  %v3032_v61 = vand.u32 2147483647, %v5765_v20 }
 0x2ec   : > { %v5804_v40 = vshrl.u32 %v2940_v54, 5  ;;  %v3036_v27 = vshrl.u32 %v3035_v34, 23  ;;  %v2945_v47 = vshll.u32 %v4032_v17, %v2942_v31  ;;  %v2948_v13 = vshll.u32 %v4033_v24, %v2942_v31 }
 0x2ed   : > { %v2804_v39 = vxor.u32 2147483648, %v2803_v26  ;;  %v5802_v16 = vsub.s32 %v2884_v41, %v2887_v25  ;;  %v2946_v62 = vshrl.u32 %v4033_v24, %v2943_v36  ;;  %v2949_v30 = vshrl.u32 %v4034_v29, %v2943_v36 }
 0x2ee   : > { %v2951_v35 = vshll.u32 %v4034_v29, %v2942_v31  ;;  %v2952_v37 = vshrl.u32 %v4035_v7, %v2943_v36  ;;  %v2954_v12 = vshll.u32 %v4035_v7, %v2942_v31  ;;  %v2955_v57 = vshrl.u32 %v4036_v21, %v2943_v36 }
 0x2ef   : > { %v2805_v44 = vsel %vm2722_vm8, %v2804_v39, %v2803_v26  ;;  %v2890_v32 = vsub.s32 0, %v5802_v16  ;;  %v2947_v58 = vor.u32 %v2946_v62, %v2945_v47  ;;  %v2950_v59 = vor.u32 %v2949_v30, %v2948_v13 }
 0x2f0   : > { %v2808_v8 = vsel %vm5774_vm12, %v5525_v14, %v2805_v44  ;;  %v2953_v4 = vor.u32 %v2952_v37, %v2951_v35  ;;  %v2956_v3 = vor.u32 %v2955_v57, %v2954_v12  ;;  %v2957_v52 = vshll.u32 %v4036_v21, %v2942_v31 }
 0x2f1   : > { %3919 = vcosq.f32 %v2808_v8  ;;  %v3528_v48 = vmin.u32 %v2890_v32, %v5802_v16  ;;  %v2958_v10 = vshrl.u32 %v4037_v33, %v2943_v36  ;;  %v2880_v63 = vadd.s32 %v5753_v43, %v5760_v0 }
 0x2f2   : > { %3921 = vsinq.f32 %v2808_v8  ;;  %v5825_v6 = vshll.u32 %v2936_v38, 8  ;;  %v3535_v60 = vadd.s32 4294967169, %v3036_v27  ;;  %v2910_v41 = vsub.s32 4, %v5789_v49 }
 0x2f3   : > { %v2892_v11 = vclz %v3528_v48  ;;  %v2944_v55 = vshrl.u32 %v4032_v17, %v2943_v36  ;;  %v2959_v19 = vor.u32 %v2958_v10, %v2957_v52  ;;  %vm2960_vm11 = vcmp.lt.s32.totalorder %v5804_v40, 1 }
 0x2f4   : > { %vm2826_vm2 = vcmp.lt.s32.totalorder %v5528_v9, 0  ;;  %vm2962_vm3 = vcmp.lt.s32.totalorder %v5804_v40, 3  ;;  %vm2963_vm4 = vcmp.lt.s32.totalorder %v5804_v40, 4  ;;  %v2968_v43 = vsel %vm2960_vm11, %v2947_v58, %v2950_v59 }
 0x2f5   : > { %v3529_v1 = vadd.s32 4294967294, %v2892_v11  ;;  %vm2816_vm5 = vcmp.eq.s32.totalorder %v5799_v2, 0  ;;  %v2965_v0 = vsel %vm2963_vm4, %v2953_v4, 2102212464  ;;  %v2969_v5 = vsel %vm2963_vm4, %v2956_v3, 920167782 }
 0x2f6   : > { %v2972_v50 = vsel %vm2960_vm11, %v2950_v59, %v2953_v4  ;;  %v2973_v28 = vsel %vm2963_vm4, %v2959_v19, 1326507024  ;;  %vm2815_vm7 = vcmp.lt.s32.totalorder %v5799_v2, 2  ;;  %vm2961_vm9 = vcmp.lt.s32.totalorder %v5804_v40, 2 }
 0x2f7   : > { %vm3530_vm8 = vcmp.lt.s32.totalorder %v3529_v1, 0  ;;  %v2970_v18 = vsel %vm2962_vm3, %v2953_v4, %v2969_v5  ;;  %v2974_v54 = vsel %vm2962_vm3, %v2956_v3, %v2973_v28  ;;  %vm2812_vm10 = vweird.f32 %v5525_v14 }
 0x2f8   : > { %v2895_v34 = vsel %vm3530_vm8, 0, %v3529_v1  ;;  %v2964_v23 = vsel %vm2960_vm11, %v2944_v55, %v2947_v58  ;;  %v2971_v15 = vsel %vm2961_vm9, %v2968_v43, %v2970_v18  ;;  %v2975_v46 = vsel %vm2961_vm9, %v2972_v50, %v2974_v54 }
 0x2f9   : > { %vm5853_vm13 = vcmp.le.f32.partialorder %v2824_v45, 0.7853982  ;;  %v2896_v31 = vsub.s32 32, %v2895_v34  ;;  %v2900_v26 = vsub.s32 4294967266, %v2895_v34  ;;  %v2966_v25 = vsel %vm2962_vm3, %v2950_v59, %v2965_v0 }
 0x2fa   : > { %v3042_v38 = vadd.s32 1, %v3535_v60  ;;  %v5860_v36 = vmul.u32.u64.low %v5825_v6, %v2975_v46  ;;  %v5861_v39 = vmul.u32.u64.high %v5825_v6, %v2975_v46, %v5860_v36  ;;  %v2897_v45 = vshll.u32 %v5802_v16, %v2895_v34 }
 0x2fb   : > { %v5864_v27 = vmul.u32.u64.low %v5825_v6, %v2971_v15  ;;  %v5865_v47 = vmul.u32.u64.high %v5825_v6, %v2971_v15, %v5864_v27  ;;  %v3920_v62 = vpop.eup %3919  ;;  %v2898_v13 = vshrl.u32 %v2880_v63, %v2896_v31  ;;  %v2901_v30 = vadd.s32 127, %v2900_v26 }
 0x2fc   : > { %vm3043_vm12 = vcmp.gt.s32.totalorder %v3042_v38, 0  ;;  %v3922_v44 = vpop.eup %3921  ;;  %v2820_v32 = vxor.u32 2147483648, %v3920_v62  ;;  %v2967_v35 = vsel %vm2961_vm9, %v2964_v23, %v2966_v25  ;;  %v5873_v8 = vadd.f32 %v5797_v51, %v5344_v42 }
 0x2fd   : > { %v3044_v37 = vsel %vm3043_vm12, %v3042_v38, 0  ;;  %v2817_v58 = vxor.u32 2147483648, %v3922_v44  ;;  %vm2819_vm14 = vcmp.eq.s32.totalorder %v5799_v2, 2  ;;  %v2899_v12 = vor.u32 %v2898_v13, %v2897_v45 }
 0x2fe   : > { %v2902_v57 = vshll.u32 %v2901_v30, 23  ;;  %v2821_v48 = vsel %vm2819_vm14, %v2820_v32, %v3922_v44  ;;  %v2911_v16 = vsel %vm2826_vm2, %v2910_v41, %v5789_v49  ;;  %vm2985_vm15 = vc.u32 %v5861_v39, %v5864_v27 }
 0x2ff   : > { %v2986_v40 = vadd.s32 1, %v5865_v47  ;;  %v2818_v42 = vsel %vm2816_vm5, %v3920_v62, %v2817_v58  ;;  %v2983_v59 = vmul.u32 %v5825_v6, %v2967_v35  ;;  %v3046_v4 = vand.u32 31, %v3044_v37 }
 0x300   : > { %v2903_v51 = vor.u32 4788187, %v2902_v57  ;;  %v2822_v3 = vsel %vm2815_vm7, %v2818_v42, %v2821_v48  ;;  %v2906_v52 = vcvt.s32.f32 %v2899_v12  ;;  %v3039_v49 = vand.u32 8388607, %v3032_v61 }
 0x301   : > { %v2987_v10 = vsel %vm2985_vm15, %v2986_v40, %v5865_v47  ;;  %v2823_v63 = vsel %vm2812_vm10, nan, %v2822_v3  ;;  %v3047_v41 = vsub.s32 32, %v3046_v4  ;;  %v2913_v6 = vsel %vm5853_vm13, 0, %v2911_v16 }
 0x302   : > { %v2904_v11 = vand.u32 2147483647, %v2903_v51  ;;  %v2988_v60 = vadd.s32 %v2987_v10, %v2983_v59  ;;  %3256 = vst.msk [vmem:[%s4624_s6 + $0x78] sm:$0xff] %vm3241_vm6, %v2823_v63  ;;  %v3045_v55 = vshrl.u32 %v3044_v37, 5  ;;  %v3049_v2 = vshll.u32 %v4032_v17, %v3046_v4 }
 0x303   : > { %v3052_v19 = vshll.u32 %v4033_v24, %v3046_v4  ;;  %v3050_v0 = vshrl.u32 %v4033_v24, %v3047_v41  ;;  %v3055_v14 = vshll.u32 %v4034_v29, %v3046_v4  ;;  %v3053_v5 = vshrl.u32 %v4034_v29, %v3047_v41 }
 0x304   : > { %v2907_v1 = vmul.f32 %v2906_v52, %v2904_v11  ;;  %v2989_v43 = vadd.s32 536870912, %v2988_v60  ;;  %v3056_v50 = vshrl.u32 %v4035_v7, %v3047_v41  ;;  %v3058_v28 = vshll.u32 %v4035_v7, %v3046_v4 }
 0x305   : > { %v3059_v18 = vshrl.u32 %v4036_v21, %v3047_v41  ;;  %v3051_v23 = vor.u32 %v3050_v0, %v3049_v2  ;;  %v3062_v15 = vshrl.u32 %v4037_v33, %v3047_v41  ;;  %v3054_v46 = vor.u32 %v3053_v5, %v3052_v19 }
 0x306   : > { %v2908_v54 = vxor.u32 2147483648, %v2907_v1  ;;  %v5904_v34 = vshrl.u32 %v2989_v43, 30  ;;  %v3061_v26 = vshll.u32 %v4036_v21, %v3046_v4  ;;  %v3040_v36 = vor.u32 8388608, %v3039_v49 }
 0x307   : > { %v3060_v31 = vor.u32 %v3059_v18, %v3058_v28  ;;  %v3057_v47 = vor.u32 %v3056_v50, %v3055_v14  ;;  %v2917_v45 = vadd.s32 3, %v2913_v6  ;;  %vm3064_vm0 = vcmp.lt.s32.totalorder %v3045_v55, 1 }
 0x308   : > { %v2909_v25 = vsel %vm2826_vm2, %v2908_v54, %v2907_v1  ;;  %v2991_v38 = vshll.u32 %v5904_v34, 30  ;;  %v3063_v13 = vor.u32 %v3062_v15, %v3061_v26  ;;  %vm3067_vm1 = vcmp.lt.s32.totalorder %v3045_v55, 4 }
 0x309   : > { %v2912_v62 = vsel %vm5853_vm13, %v5528_v9, %v2909_v25  ;;  %v3072_v44 = vsel %vm3064_vm0, %v3051_v23, %v3054_v46  ;;  %vm3065_vm11 = vcmp.lt.s32.totalorder %v3045_v55, 2  ;;  %vm3066_vm3 = vcmp.lt.s32.totalorder %v3045_v55, 3 }
 0x30a   : > { %3923 = vcosq.f32 %v2912_v62  ;;  %v2992_v30 = vsub.s32 %v2988_v60, %v2991_v38  ;;  %v3073_v32 = vsel %vm3067_vm1, %v3060_v31, 920167782  ;;  %v3048_v37 = vshrl.u32 %v4032_v17, %v3047_v41 }
 0x30b   : > { %3925 = vsinq.f32 %v2912_v62  ;;  %v3069_v58 = vsel %vm3067_vm1, %v3057_v47, 2102212464  ;;  %v3074_v12 = vsel %vm3066_vm3, %v3057_v47, %v3073_v32  ;;  %v3076_v57 = vsel %vm3064_vm0, %v3054_v46, %v3057_v47 }
 0x30c   : > { %v2994_v35 = vsub.s32 0, %v2992_v30  ;;  %v3075_v53 = vsel %vm3065_vm11, %v3072_v44, %v3074_v12  ;;  %v3077_v48 = vsel %vm3067_vm1, %v3063_v13, 1326507024  ;;  %v3080_v16 = vshll.u32 %v3040_v36, 8 }
 0x30d   : > { %v2918_v40 = vand.u32 3, %v2917_v45  ;;  %v3068_v51 = vsel %vm3064_vm0, %v3048_v37, %v3051_v23  ;;  %v3078_v59 = vsel %vm3066_vm3, %v3060_v31, %v3077_v48  ;;  %v3070_v4 = vsel %vm3066_vm3, %v3054_v46, %v3069_v58 }
 0x30e   : > { %v3532_v42 = vmin.u32 %v2994_v35, %v2992_v30  ;;  %v3079_v3 = vsel %vm3065_vm11, %v3076_v57, %v3078_v59  ;;  %v5920_v52 = vmul.u32.u64.low %v3080_v16, %v3075_v53  ;;  %v5921_v10 = vmul.u32.u64.high %v3080_v16, %v3075_v53, %v5920_v52 }
 0x30f   : > { %v5924_v63 = vmul.u32.u64.low %v3080_v16, %v3079_v3  ;;  %v5925_v11 = vmul.u32.u64.high %v3080_v16, %v3079_v3, %v5924_v63  ;;  %v3139_v60 = vand.u32 2139095040, %v5873_v8  ;;  %v3071_v6 = vsel %vm3065_vm11, %v3068_v51, %v3070_v4 }
 0x310   : > { %v2996_v49 = vclz %v3532_v42  ;;  %vm2919_vm2 = vcmp.lt.s32.totalorder %v2918_v40, 2  ;;  %v3090_v2 = vadd.s32 1, %v5921_v10  ;;  %vm2920_vm4 = vcmp.eq.s32.totalorder %v2918_v40, 0 }
 0x311   : > { %v3140_v19 = vshrl.u32 %v3139_v60, 23  ;;  %vm2923_vm5 = vcmp.eq.s32.totalorder %v2918_v40, 2  ;;  %v2984_v43 = vadd.s32 %v5864_v27, %v5861_v39  ;;  %v3087_v50 = vmul.u32 %v3080_v16, %v3071_v6 }
 0x312   : > { %v3533_v41 = vadd.s32 4294967294, %v2996_v49  ;;  %vm3089_vm8 = vc.u32 %v5925_v11, %v5920_v52  ;;  %v3136_v54 = vand.u32 2147483647, %v5873_v8  ;;  %vm2916_vm9 = vweird.f32 %v5528_v9 }
 0x313   : > { %v3091_v46 = vsel %vm3089_vm8, %v3090_v2, %v5921_v10  ;;  %v3539_v31 = vadd.s32 4294967169, %v3140_v19  ;;  %v3014_v36 = vsub.s32 4, %v5904_v34  ;;  %vm2930_vm10 = vcmp.lt.s32.totalorder %v5685_v56, 0 }
 0x314   : > { %v3924_v1 = vpop.eup %3923  ;;  %vm3534_vm7 = vcmp.lt.s32.totalorder %v3533_v41, 0  ;;  %v3092_v25 = vadd.s32 %v3091_v46, %v3087_v50  ;;  %v3143_v35 = vand.u32 8388607, %v3136_v54  ;;  %vm5952_vm12 = vcmp.le.f32.partialorder %v2928_v22, 0.7853982 }
 0x315   : > { %v3926_v0 = vpop.eup %3925  ;;  %v2924_v14 = vxor.u32 2147483648, %v3924_v1  ;;  %v2999_v5 = vsel %vm3534_vm7, 0, %v3533_v41  ;;  %v3146_v47 = vadd.s32 1, %v3539_v31  ;;  %v3015_v37 = vsel %vm2930_vm10, %v3014_v36, %v5904_v34 }
 0x316   : > { %v2921_v55 = vxor.u32 2147483648, %v3926_v0  ;;  %v3000_v28 = vsub.s32 32, %v2999_v5  ;;  %v3004_v18 = vsub.s32 4294967266, %v2999_v5  ;;  %v3001_v15 = vshll.u32 %v2992_v30, %v2999_v5 }
 0x317   : > { %v2925_v23 = vsel %vm2923_vm5, %v2924_v14, %v3926_v0  ;;  %v3093_v44 = vadd.s32 536870912, %v3092_v25  ;;  %vm3147_vm13 = vcmp.gt.s32.totalorder %v3146_v47, 0  ;;  %v3017_v42 = vsel %vm5952_vm12, 0, %v3015_v37 }
 0x318   : > { %v2922_v39 = vsel %vm2920_vm4, %v3924_v1, %v2921_v55  ;;  %v3002_v27 = vshrl.u32 %v2984_v43, %v3000_v28  ;;  %v3005_v26 = vadd.s32 127, %v3004_v18  ;;  %v3148_v9 = vsel %vm3147_vm13, %v3146_v47, 0 }
 0x319   : > { %v2926_v38 = vsel %vm2919_vm2, %v2922_v39, %v2925_v23  ;;  %v5942_v32 = vshrl.u32 %v3093_v44, 30  ;;  %v3150_v58 = vand.u32 31, %v3148_v9  ;;  %v3144_v59 = vor.u32 8388608, %v3143_v35 }
 0x31a   : > { %v2927_v62 = vsel %vm2916_vm9, nan, %v2926_v38  ;;  %v3003_v45 = vor.u32 %v3002_v27, %v3001_v15  ;;  %v3006_v13 = vshll.u32 %v3005_v26, 23  ;;  %v3149_v4 = vshrl.u32 %v3148_v9, 5 }
 0x31b   : > { %3257 = vst [vmem:[%s4624_s6 + $0x80] sm:$0xff] %v2927_v62  ;;  %v3095_v57 = vshll.u32 %v5942_v32, 30  ;;  %v3151_v16 = vsub.s32 32, %v3150_v58  ;;  %v3153_v34 = vshll.u32 %v4032_v17, %v3150_v58  ;;  %v3156_v22 = vshll.u32 %v4033_v24, %v3150_v58 }
 0x31c   : > { %v3007_v30 = vor.u32 4788187, %v3006_v13  ;;  %v3010_v53 = vcvt.s32.f32 %v3003_v45  ;;  %v3159_v6 = vshll.u32 %v4034_v29, %v3150_v58  ;;  %v3162_v2 = vshll.u32 %v4035_v7, %v3150_v58 }
 0x31d   : > { %v3096_v51 = vsub.s32 %v3092_v25, %v3095_v57  ;;  %v3154_v3 = vshrl.u32 %v4033_v24, %v3151_v16  ;;  %v3157_v10 = vshrl.u32 %v4034_v29, %v3151_v16  ;;  %v3160_v60 = vshrl.u32 %v4035_v7, %v3151_v16 }
 0x31e   : > { %v3008_v12 = vand.u32 2147483647, %v3007_v30  ;;  %v3163_v19 = vshrl.u32 %v4036_v21, %v3151_v16  ;;  %v3165_v14 = vshll.u32 %v4036_v21, %v3150_v58  ;;  %v3166_v55 = vshrl.u32 %v4037_v33, %v3151_v16 }
 0x31f   : > { %v3098_v63 = vsub.s32 0, %v3096_v51  ;;  %v3155_v41 = vor.u32 %v3154_v3, %v3153_v34  ;;  %v3158_v0 = vor.u32 %v3157_v10, %v3156_v22  ;;  %v3161_v5 = vor.u32 %v3160_v60, %v3159_v6 }
 0x320   : > { %v3011_v40 = vmul.f32 %v3010_v53, %v3008_v12  ;;  %v3164_v50 = vor.u32 %v3163_v19, %v3162_v2  ;;  %v3021_v29 = vadd.s32 3, %v3017_v42  ;;  %v3088_v7 = vadd.s32 %v5920_v52, %v5925_v11 }
 0x321   : > { %v3536_v43 = vmin.u32 %v3098_v63, %v3096_v51  ;;  %v3152_v18 = vshrl.u32 %v4032_v17, %v3151_v16  ;;  %v3167_v23 = vor.u32 %v3166_v55, %v3165_v14  ;;  %v3184_v15 = vshll.u32 %v3144_v59, 8 }
 0x322   : > { %v3012_v49 = vxor.u32 2147483648, %v3011_v40  ;;  %vm3168_vm14 = vcmp.lt.s32.totalorder %v3149_v4, 1  ;;  %vm3170_vm15 = vcmp.lt.s32.totalorder %v3149_v4, 3  ;;  %vm3171_vm0 = vcmp.lt.s32.totalorder %v3149_v4, 4 }
 0x323   : > { %v3100_v28 = vclz %v3536_v43  ;;  %v3173_v46 = vsel %vm3171_vm0, %v3161_v5, 2102212464  ;;  %v3176_v31 = vsel %vm3168_vm14, %v3155_v41, %v3158_v0  ;;  %v3177_v39 = vsel %vm3171_vm0, %v3164_v50, 920167782 }
 0x324   : > { %v3013_v1 = vsel %vm2930_vm10, %v3012_v49, %v3011_v40  ;;  %v3180_v27 = vsel %vm3168_vm14, %v3158_v0, %v3161_v5  ;;  %vm3169_vm11 = vcmp.lt.s32.totalorder %v3149_v4, 2  ;;  %v3178_v33 = vsel %vm3170_vm15, %v3161_v5, %v3177_v39 }
 0x325   : > { %v3016_v24 = vsel %vm5952_vm12, %v5685_v56, %v3013_v1  ;;  %v3537_v21 = vadd.s32 4294967294, %v3100_v28  ;;  %v3181_v26 = vsel %vm3171_vm0, %v3167_v23, 1326507024  ;;  %v3172_v11 = vsel %vm3168_vm14, %v3152_v18, %v3155_v41 }
 0x326   : > { %3927 = vcosq.f32 %v3016_v24  ;;  %v3179_v25 = vsel %vm3169_vm11, %v3176_v31, %v3178_v33  ;;  %v3182_v17 = vsel %vm3170_vm15, %v3164_v50, %v3181_v26  ;;  %v3174_v47 = vsel %vm3170_vm15, %v3158_v0, %v3173_v46 }
 0x327   : > { %3929 = vsinq.f32 %v3016_v24  ;;  %vm3538_vm1 = vcmp.lt.s32.totalorder %v3537_v21, 0  ;;  %v3183_v62 = vsel %vm3169_vm11, %v3180_v27, %v3182_v17  ;;  %v3022_v35 = vand.u32 3, %v3021_v29 }
 0x328   : > { %v3103_v52 = vsel %vm3538_vm1, 0, %v3537_v21  ;;  %v5981_v45 = vmul.u32.u64.low %v3184_v15, %v3183_v62  ;;  %v5982_v13 = vmul.u32.u64.high %v3184_v15, %v3183_v62, %v5981_v45  ;;  %v3175_v12 = vsel %vm3169_vm11, %v3172_v11, %v3174_v47 }
 0x329   : > { %v3104_v38 = vsub.s32 32, %v3103_v52  ;;  %v3108_v36 = vsub.s32 4294967266, %v3103_v52  ;;  %v5984_v44 = vmul.u32.u64.low %v3184_v15, %v3179_v25  ;;  %v5985_v30 = vmul.u32.u64.high %v3184_v15, %v3179_v25, %v5984_v44 }
 0x32a   : > { %v3105_v9 = vshll.u32 %v3096_v51, %v3103_v52  ;;  %vm3027_vm2 = vcmp.eq.s32.totalorder %v3022_v35, 2  ;;  %v3191_v3 = vmul.u32 %v3184_v15, %v3175_v12  ;;  %vm3023_vm4 = vcmp.lt.s32.totalorder %v3022_v35, 2 }
 0x32b   : > { %v3106_v37 = vshrl.u32 %v3088_v7, %v3104_v38  ;;  %v3109_v58 = vadd.s32 127, %v3108_v36  ;;  %vm3193_vm3 = vc.u32 %v5982_v13, %v5984_v44  ;;  %v3194_v42 = vadd.s32 1, %v5985_v30 }
 0x32c   : > { %vm3024_vm5 = vcmp.eq.s32.totalorder %v3022_v35, 0  ;;  %vm3020_vm7 = vweird.f32 %v5685_v56  ;;  %v3118_v41 = vsub.s32 4, %v5942_v32  ;;  %vm3034_vm8 = vcmp.lt.s32.totalorder %v5765_v20, 0 }
 0x32d   : > { %v3107_v57 = vor.u32 %v3106_v37, %v3105_v9  ;;  %v3110_v48 = vshll.u32 %v3109_v58, 23  ;;  %v3195_v4 = vsel %vm3193_vm3, %v3194_v42, %v5985_v30  ;;  %vm3033_vm9 = vcmp.le.f32.partialorder %v3032_v61, 0.7853982 }
 0x32e   : > { %v3196_v22 = vadd.s32 %v3195_v4, %v3191_v3  ;;  %v3119_v0 = vsel %vm3034_vm8, %v3118_v41, %v5942_v32  ;;  %v3192_v31 = vadd.s32 %v5984_v44, %v5982_v13  ;;  %vm3124_vm15 = vweird.f32 %v5765_v20 }
 0x32f   : > { %v3111_v34 = vor.u32 4788187, %v3110_v48  ;;  %v3114_v63 = vcvt.s32.f32 %v3107_v57  ;;  %v3121_v5 = vsel %vm3033_vm9, 0, %v3119_v0  ;;  %vm3138_vm0 = vcmp.lt.s32.totalorder %v5873_v8, 0 }
 0x330   : > { %v3928_v53 = vpop.eup %3927  ;;  %v3197_v19 = vadd.s32 536870912, %v3196_v22  ;;  %v3125_v29 = vadd.s32 3, %v3121_v5  ;;  %vm3137_vm1 = vcmp.le.f32.partialorder %v3136_v54, 0.7853982 }
 0x331   : > { %v3930_v16 = vpop.eup %3929  ;;  %v3028_v40 = vxor.u32 2147483648, %v3928_v53  ;;  %v3112_v49 = vand.u32 2147483647, %v3111_v34 }
 0x332   : > { %v3025_v59 = vxor.u32 2147483648, %v3930_v16  ;;  %v3198_v43 = vshrl.u32 %v3197_v19, 30  ;;  %v3126_v18 = vand.u32 3, %v3125_v29 }
 0x333   : > { %v3029_v51 = vsel %vm3027_vm2, %v3028_v40, %v3930_v16  ;;  %v3115_v2 = vmul.f32 %v3114_v63, %v3112_v49 }
 0x334   : > { %v3026_v10 = vsel %vm3024_vm5, %v3928_v53, %v3025_v59  ;;  %v3199_v24 = vshll.u32 %v3198_v43, 30  ;;  %vm3131_vm13 = vcmp.eq.s32.totalorder %v3126_v18, 2  ;;  %vm3127_vm12 = vcmp.lt.s32.totalorder %v3126_v18, 2 }
 0x335   : > { %v3030_v60 = vsel %vm3023_vm4, %v3026_v10, %v3029_v51  ;;  %v3116_v1 = vxor.u32 2147483648, %v3115_v2  ;;  %vm3128_vm14 = vcmp.eq.s32.totalorder %v3126_v18, 0  ;;  %v3222_v44 = vsub.s32 4, %v3198_v43 }
 0x336   : > { %v3031_v6 = vsel %vm3020_vm7, nan, %v3030_v60  ;;  %v3200_v50 = vsub.s32 %v3196_v22, %v3199_v24  ;;  %vm3228_vm4 = vweird.f32 %v5873_v8 }
 0x337   : > { %3258 = vst.msk [vmem:[%s4624_s6 + $0x88] sm:$0xff] %vm3241_vm6, %v3031_v6  ;;  %v3117_v14 = vsel %vm3034_vm8, %v3116_v1, %v3115_v2  ;;  %v3223_v37 = vsel %vm3138_vm0, %v3222_v44, %v3198_v43 }
 0x338   : > { %v3120_v56 = vsel %vm3033_vm9, %v5765_v20, %v3117_v14  ;;  %v3202_v55 = vsub.s32 0, %v3200_v50  ;;  %v3225_v58 = vsel %vm3137_vm1, 0, %v3223_v37 }
 0x339   : > { %3931 = vcosq.f32 %v3120_v56  ;;  %v3229_v12 = vadd.s32 3, %v3225_v58 }
 0x33a   : > { %3933 = vsinq.f32 %v3120_v56  ;;  %v3540_v7 = vmin.u32 %v3202_v55, %v3200_v50 }
 0x33b   : > { %v3230_v53 = vand.u32 3, %v3229_v12 }
 0x33c   : > { %v3204_v28 = vclz %v3540_v7 }
 0x33d   : > { %vm3235_vm11 = vcmp.eq.s32.totalorder %v3230_v53, 2  ;;  %vm3232_vm3 = vcmp.eq.s32.totalorder %v3230_v53, 0  ;;  %vm3231_vm2 = vcmp.lt.s32.totalorder %v3230_v53, 2 }
 0x33e   : > { %v3541_v23 = vadd.s32 4294967294, %v3204_v28 }
 0x340   : > { %vm3542_vm10 = vcmp.lt.s32.totalorder %v3541_v23, 0 }
 0x341   : > { %v3207_v61 = vsel %vm3542_vm10, 0, %v3541_v23 }
 0x342   : > { %v3208_v39 = vsub.s32 32, %v3207_v61  ;;  %v3212_v27 = vsub.s32 4294967266, %v3207_v61  ;;  %v3209_v52 = vshll.u32 %v3200_v50, %v3207_v61 }
 0x343   : > { %v3932_v15 = vpop.eup %3931 }
 0x344   : > { %v3934_v32 = vpop.eup %3933  ;;  %v3132_v21 = vxor.u32 2147483648, %v3932_v15  ;;  %v3210_v11 = vshrl.u32 %v3192_v31, %v3208_v39  ;;  %v3213_v25 = vadd.s32 127, %v3212_v27 }
 0x345   : > { %v3129_v46 = vxor.u32 2147483648, %v3934_v32 }
 0x346   : > { %v3133_v33 = vsel %vm3131_vm13, %v3132_v21, %v3934_v32  ;;  %v3211_v36 = vor.u32 %v3210_v11, %v3209_v52  ;;  %v3214_v47 = vshll.u32 %v3213_v25, 23 }
 0x347   : > { %v3130_v26 = vsel %vm3128_vm14, %v3932_v15, %v3129_v46 }
 0x348   : > { %v3134_v17 = vsel %vm3127_vm12, %v3130_v26, %v3133_v33  ;;  %v3215_v62 = vor.u32 4788187, %v3214_v47  ;;  %v3218_v30 = vcvt.s32.f32 %v3211_v36 }
 0x349   : > { %v3135_v38 = vsel %vm3124_vm15, nan, %v3134_v17 }
 0x34a   : > { %3259 = vst [vmem:[%s4624_s6 + $0x90] sm:$0xff] %v3135_v38  ;;  %v3216_v45 = vand.u32 2147483647, %v3215_v62 }
 0x34c   : > { %v3219_v13 = vmul.f32 %v3218_v30, %v3216_v45 }
 0x34e   : > { %v3220_v35 = vxor.u32 2147483648, %v3219_v13 }
 0x350   : > { %v3221_v9 = vsel %vm3138_vm0, %v3220_v35, %v3219_v13 }
 0x351   : > { %v3224_v20 = vsel %vm3137_vm1, %v5873_v8, %v3221_v9 }
 0x352   : > { %3935 = vcosq.f32 %v3224_v20 }
 0x353   : > { %3937 = vsinq.f32 %v3224_v20 }
 0x35c   : > { %v3936_v57 = vpop.eup %3935 }
 0x35d   : > { %v3938_v48 = vpop.eup %3937  ;;  %v3236_v16 = vxor.u32 2147483648, %v3936_v57  ;;  %3267 = sbr.rel (!%p4083_p4) target bundleno = 931 (0x3a3), region = 36 }
 0x35e   : > { %v3233_v40 = vxor.u32 2147483648, %v3938_v48 }
 0x35f   : > { %v3237_v42 = vsel %vm3235_vm11, %v3236_v16, %v3938_v48 }
 0x360   : > { %v3234_v59 = vsel %vm3232_vm3, %v3936_v57, %v3233_v40 }
 0x361   : > { %v3238_v54 = vsel %vm3231_vm2, %v3234_v59, %v3237_v42 }
 0x362   : > { %v3239_v34 = vsel %vm3228_vm4, nan, %v3238_v54 }
 0x363   : > { %3260 = vst.msk [vmem:[%s4624_s6 + $0x98] sm:$0xff] %vm3241_vm6, %v3239_v34 }
 0x364   : > { %s6169_s7 = smov (!%p3270_p8, %s3269_s7), 10 }
 0x365   : > { %s3557_s12 = sshll.u32 %s6169_s7, 8 }
 0x366   : > { %p3548_p9 = scmp.eq.s32.totalorder %s3557_s12, 0 }
 0x367   : > { %3939 = sdivrem.u32 (!%p3548_p9), %s6169_s7, 10 }
 0x368   : > { %3280 = sbr.rel (%p3548_p9) target bundleno = 931 (0x3a3), region = 40 }
 0x370   : > { %s6023_s14 = spop.drf %3939 }
 0x371   : > { %p3549_p10 = scmp.le.s32.totalorder %s6023_s14, 0 }
 0x372   : > { %s6162_s15 = smov (!%p3549_p10), %s6017_s11  ;;  %s6163_s17 = smov (!%p3549_p10), %s4624_s6 }
 0x373   : > { %3414 = sbr.rel (%p3549_p10) target bundleno = 902 (0x386), region = 88  ;;  %s6032_s18 = smov (!%p3549_p10), 0  }
 0x374   : > { %s6034_s20 = smov (!%p3549_p10), 0  }
 0x37a LB: >> { %v3294_v8 = vld [vmem:[%s4005_s17] sm:$0xff]  ;;  %v3296_v3 = vld [vmem:[%s4005_s17 + $0x10] sm:$0xff]  ;;  %s3334_s21 = sadd.s32 1, %s4009_s18  ;;  %v3314_v6 = vld [vmem:[%s4005_s17 + $0x8] sm:$0xff]  ;;  %s3288_s20 = sadd.s32 1, %s4013_s20   ;;  %s4013_s20 = sphi %s6034_s20, %s3288_s20   ;;  %s4009_s18 = sphi %s6032_s18, %s6164_s18   ;;  %s4005_s17 = sphi %s6163_s17, %s3339_s17   ;;  %s4001_s15 = sphi %s6162_s15, %s3340_s15  }
 0x37b   : >> { %v3298_v51 = vld [vmem:[%s4005_s17 + $0x20] sm:$0xff]  ;;  %3295 = vst [vmem:[%s4001_s15] sm:$0xff] %v3294_v8  ;;  %3297 = vst [vmem:[%s4001_s15 + $0x10] sm:$0xff] %v3296_v3  ;;  %v3300_v4 = vld [vmem:[%s4005_s17 + $0x30] sm:$0xff]  ;;  %p3335_p11 = scmp.ge.s32.totalorder %s3334_s21, %s6023_s14  ;;  %p3287_p12 = scmp.ge.s32.totalorder %s3288_s20, %s6023_s14 }
 0x37c   : >> { %3299 = vst [vmem:[%s4001_s15 + $0x20] sm:$0xff] %v3298_v51  ;;  %v3302_v10 = vld [vmem:[%s4005_s17 + $0x40] sm:$0xff]  ;;  %v3304_v49 = vld [vmem:[%s4005_s17 + $0x50] sm:$0xff]  ;;  %3301 = vst [vmem:[%s4001_s15 + $0x30] sm:$0xff] %v3300_v4 }
 0x37d   : >> { %3303 = vst [vmem:[%s4001_s15 + $0x40] sm:$0xff] %v3302_v10  ;;  %3305 = vst [vmem:[%s4001_s15 + $0x50] sm:$0xff] %v3304_v49  ;;  %v3306_v63 = vld [vmem:[%s4005_s17 + $0x60] sm:$0xff]  ;;  %v3308_v22 = vld [vmem:[%s4005_s17 + $0x70] sm:$0xff]  ;;  %s6171_s21 = smov (%p3335_p11, %s3334_s21), 0 }
 0x37e   : >> { %v3310_v60 = vld [vmem:[%s4005_s17 + $0x80] sm:$0xff]  ;;  %3307 = vst [vmem:[%s4001_s15 + $0x60] sm:$0xff] %v3306_v63  ;;  %3309 = vst [vmem:[%s4001_s15 + $0x70] sm:$0xff] %v3308_v22  ;;  %v3312_v41 = vld [vmem:[%s4005_s17 + $0x90] sm:$0xff]  ;;  %s3337_s22 = smul.u32 160, %s6171_s21  ;;  %s6164_s18 = smov %s6171_s21 }
 0x37f   : >> { %3311 = vst [vmem:[%s4001_s15 + $0x80] sm:$0xff] %v3310_v60  ;;  %v3316_v2 = vld [vmem:[%s4005_s17 + $0x18] sm:$0xff]  ;;  %3313 = vst [vmem:[%s4001_s15 + $0x90] sm:$0xff] %v3312_v41  ;;  %v3318_v19 = vld [vmem:[%s4005_s17 + $0x28] sm:$0xff]  ;;  %3290 = sbr.rel (!%p3287_p12) target bundleno = 890 (0x37a), region = 94 }
 0x380   : >> { %3315 = vst [vmem:[%s4001_s15 + $0x8] sm:$0xff] %v3314_v6  ;;  %3317 = vst [vmem:[%s4001_s15 + $0x18] sm:$0xff] %v3316_v2  ;;  %v3320_v1 = vld [vmem:[%s4005_s17 + $0x38] sm:$0xff]  ;;  %v3322_v43 = vld [vmem:[%s4005_s17 + $0x48] sm:$0xff] }
 0x381   : >> { %3319 = vst [vmem:[%s4001_s15 + $0x28] sm:$0xff] %v3318_v19  ;;  %3321 = vst [vmem:[%s4001_s15 + $0x38] sm:$0xff] %v3320_v1  ;;  %v3324_v0 = vld [vmem:[%s4005_s17 + $0x58] sm:$0xff]  ;;  %v3326_v14 = vld [vmem:[%s4005_s17 + $0x68] sm:$0xff] }
 0x382   : >> { %3323 = vst [vmem:[%s4001_s15 + $0x48] sm:$0xff] %v3322_v43  ;;  %v3328_v24 = vld [vmem:[%s4005_s17 + $0x78] sm:$0xff]  ;;  %3325 = vst [vmem:[%s4001_s15 + $0x58] sm:$0xff] %v3324_v0  ;;  %v3330_v56 = vld [vmem:[%s4005_s17 + $0x88] sm:$0xff] }
 0x383   : >> { %3327 = vst [vmem:[%s4001_s15 + $0x68] sm:$0xff] %v3326_v14  ;;  %3329 = vst [vmem:[%s4001_s15 + $0x78] sm:$0xff] %v3328_v24  ;;  %v3332_v5 = vld [vmem:[%s4005_s17 + $0x98] sm:$0xff]  ;;  %s3339_s17 = scalar_lea.vmem %s4624_s6, %s3337_s22 [#allocation2]  }
 0x384   : >> { %3331 = vst [vmem:[%s4001_s15 + $0x88] sm:$0xff] %v3330_v56  ;;  %3333 = vst [vmem:[%s4001_s15 + $0x98] sm:$0xff] %v3332_v5  ;;  %s3340_s15 = scalar_lea.vmem %s6017_s11, %s3337_s22  }
 0x386 PF: > { %3941 = sdivrem.u32 %s6169_s7, 10 }
 0x387   : > { %s3550_s23 = smul.u32 160, %s6023_s14 }
 0x389   : > { %s6102_s24 = scalar_lea.vmem %s4624_s6, %s3550_s23 [#allocation2]   ;;  %s6105_s25 = scalar_lea.vmem %s6017_s11, %s3550_s23  }
 0x38f   : > { %s3942_s26 = spop.drf %3941 }
 0x390   : > { %p3552_p13 = scmp.le.s32.totalorder %s3942_s26, 0 }
 0x391   : > { %s4015_s27 = smov (!%p3552_p13), %s6105_s25   ;;  %s4019_s28 = smov (!%p3552_p13), %s6102_s24  }
 0x392   : > { %3428 = sbr.rel (%p3552_p13) target bundleno = 931 (0x3a3), region = 99  ;;  %s4023_s29 = smov (!%p3552_p13), 0  }
 0x393   : > { %s4027_s30 = smov (!%p3552_p13), 0  }
 0x399 LB: >> { %v3357_v50 = vld [vmem:[%s4021_s28] sm:$0xff]  ;;  %v3359_v55 = vld [vmem:[%s4021_s28 + $0x8] sm:$0xff]  ;;  %s3361_s4 = sadd.s32 1, %s4025_s29  ;;  %s3351_s30 = sadd.s32 1, %s4029_s30   ;;  %s4029_s30 = sphi %s4027_s30, %s3351_s30   ;;  %s4025_s29 = sphi %s4023_s29, %s4024_s29   ;;  %s4021_s28 = sphi %s4019_s28, %s3366_s28   ;;  %s4017_s27 = sphi %s4015_s27, %s3367_s27  }
 0x39a   : >> { %3358 = vst [vmem:[%s4017_s27] sm:$0xff] %v3357_v50  ;;  %3360 = vst [vmem:[%s4017_s27 + $0x8] sm:$0xff] %v3359_v55  ;;  %p3362_p0 = scmp.ge.s32.totalorder %s3361_s4, %s3942_s26  ;;  %p3350_p1 = scmp.ge.s32.totalorder %s3351_s30, %s3942_s26 }
 0x39c   : >> { %s6173_s4 = smov (%p3362_p0, %s3361_s4), 0  ;;  %3353 = sbr.rel (!%p3350_p1) target bundleno = 921 (0x399), region = 105 }
 0x39d   : >> { %s3553_s5 = sshll.u32 %s6173_s4, 4  ;;  %s4024_s29 = smov %s6173_s4  }
 0x39e   : >> { %s3366_s28 = scalar_lea.vmem %s6102_s24, %s3553_s5 [#allocation2]   ;;  %s3367_s27 = scalar_lea.vmem %s6105_s25, %s3553_s5  }
 0x3a3 PF: > { %p10_p2 = scmp.ge.s32.totalorder %s4073_s16, 6   ;;  %s6165_s12 = smov %s3993_s13 }
 0x3a4   : > { %s6166_s13 = smov %s4081_s19  ;;  %s6167_s14 = smov %s4073_s16 }
 0x3a5   :  { %12 = sbr.rel (!%p10_p2) target bundleno = 2 (0x2), region = 116 }

</bundles_post_ra>
